<compile_context>
chip_gen: v6e
topology: v6e:2x2x1
jax: 0.10.0
libtpu: 0.0.40
codegen_flags: <defaults>
</compile_context>

<pallas_src>
import functools

import numpy as np

import jax
import jax.numpy as jnp
from jax import lax
from jax.experimental import pallas as pl
from jax.experimental.pallas import tpu as pltpu

SCALE = 4
HIDDEN = 32          # hidden channel count of the reference network
R2 = SCALE * SCALE   # channels produced by the pre-shuffle conv (16)


# ----------------------------------------------------------------------------
# Fused Pallas kernel: whole network (minus the final pixel-shuffle permute)
# ----------------------------------------------------------------------------
def _fused_sisr_kernel(x_ref, w_in, b_in, w_h1, b_h1, w_h2, b_h2,
                       w_o1, b_o1, w_f, b_f,
                       o_ref,
                       buf_ref, p_ref, h_ref,
                       *, H, W, OFF):
    """All refs are VMEM.

    x_ref  : (1, 1, HW)            LR image, channels-first, flattened spatial.
    w_*    : (Cout, 9*Cin) conv matrices;  b_* : (Cout, 1) biases.
    o_ref  : (1, R2, HW)           pre-shuffle output (16 sub-pixel channels).
    buf_ref: (HIDDEN, OFF+HW+OFF)  zero-padded line buffer for in-kernel im2col.
    p_ref  : (9*HIDDEN, HW)        im2col patch scratch (reused by every layer).
    h_ref  : (HIDDEN, HW)          skip-connection activation.
    """
    HW = H * W

    # Column-validity masks for the +-1 horizontal taps (vertical taps are
    # handled by the zero padding of the line buffer).
    w_pos = lax.broadcasted_iota(jnp.int32, (1, HW), 1) % W
    col_ok = {-1: w_pos >= 1, 0: None, 1: w_pos <= W - 2}

    # Zero the line buffer once per image; only its borders need to stay zero
    # and the per-layer writes below only touch the center region.
    buf_ref[...] = jnp.zeros_like(buf_ref)

    def conv3x3(act, cin, w_ref, b_ref, relu=False, skip=None):
        """act: (cin, HW) f32 channels-first.  Returns (Cout, HW) f32."""
        buf_ref[0:cin, OFF:OFF + HW] = act
        for k in range(9):                       # unrolled at trace time
            dy, dx = k // 3 - 1, k % 3 - 1
            d = dy * W + dx
            win = buf_ref[0:cin, OFF + d:OFF + d + HW]
            mask = col_ok[dx]
            if mask is not None:
                win = jnp.where(mask, win, 0.0)
            p_ref[k * cin:(k + 1) * cin, :] = win
        out = jnp.dot(w_ref[...], p_ref[0:9 * cin, :],
                      preferred_element_type=jnp.float32)
        out = out + b_ref[...]
        if relu:
            out = jnp.maximum(out, 0.0)
        if skip is not None:
            out = out + skip
        return out

    x = x_ref[0]                                            # (1, HW)
    h = conv3x3(x, 1, w_in, b_in)                           # input conv 1->32
    h_ref[...] = h
    y = conv3x3(h, HIDDEN, w_h1, b_h1, relu=True)           # hidden conv + ReLU
    y = conv3x3(y, HIDDEN, w_h2, b_h2, skip=h_ref[...])     # hidden conv + skip
    z = conv3x3(y, HIDDEN, w_o1, b_o1)                      # pre-shuffle 32->16
    u = conv3x3(z, R2, w_f, b_f)                            # folded shuffle+out2
    o_ref[0] = u.astype(o_ref.dtype)


# ----------------------------------------------------------------------------
# Parameter preparation (JAX glue, runs once under jit)
# ----------------------------------------------------------------------------
def _conv_to_mat(w_hwio):
    """(3,3,Cin,Cout) -> (Cout, 9*Cin) with (kh,kw,cin) fastest-varying order."""
    kh, kw, cin, cout = w_hwio.shape
    return jnp.transpose(w_hwio, (3, 0, 1, 2)).reshape(cout, kh * kw * cin)


def _fold_shuffle_and_out2(w2_hwio, b2, r):
    """Fold Conv(1->1,3x3) after PixelShuffle(r) into an equivalent
    (r*r -> r*r) 3x3 conv applied *before* the shuffle (both ops are linear).

    HR pixel (r*h+i, r*w+j) tap (dy,dx) reads z[(i+dy)%r * r + (j+dx)%r] at LR
    offset ((i+dy)//r, (j+dx)//r), with matching zero-padding at the borders.
    """
    idx = np.full((r * r, 3, 3, r * r), 9, dtype=np.int32)   # 9 -> zero tap
    for i in range(r):
        for j in range(r):
            co = i * r + j
            for dy in (-1, 0, 1):
                for dx in (-1, 0, 1):
                    ii, jj = i + dy, j + dx
                    sh, ip = ii // r, ii % r
                    sw, jp = jj // r, jj % r
                    idx[co, 1 + sh, 1 + sw, ip * r + jp] = (1 + dy) * 3 + (1 + dx)
    taps = jnp.concatenate([w2_hwio.reshape(9),
                            jnp.zeros((1,), w2_hwio.dtype)])
    w_f = taps[jnp.asarray(idx)].reshape(r * r, 9 * r * r)   # (16, 144)
    b_f = jnp.broadcast_to(b2.reshape(1, 1), (r * r, 1)).astype(jnp.float32)
    return w_f, b_f


def _pixel_shuffle_nchw(x, r):
    """torch.nn.PixelShuffle on NCHW data."""
    n, c, h, w = x.shape
    x = x.reshape(n, c // (r * r), r, r, h, w)
    x = jnp.transpose(x, (0, 1, 4, 2, 5, 3))
    return x.reshape(n, c // (r * r), h * r, w * r)


# ----------------------------------------------------------------------------
# Public forward (PyTorch-style NCHW in / NCHW out)
# ----------------------------------------------------------------------------
def simple_sisr_forward(x_nchw, params):
    n, cin, h, w = x_nchw.shape
    assert cin == 1
    hw = h * w
    off = ((w + 1 + 127) // 128) * 128      # padded-line-buffer offset (>= W+1)
    buf_w = off + hw + off

    mats = [
        (_conv_to_mat(params["in"][0]),   params["in"][1].reshape(-1, 1)),
        (_conv_to_mat(params["h1"][0]),   params["h1"][1].reshape(-1, 1)),
        (_conv_to_mat(params["h2"][0]),   params["h2"][1].reshape(-1, 1)),
        (_conv_to_mat(params["out1"][0]), params["out1"][1].reshape(-1, 1)),
        _fold_shuffle_and_out2(*params["out2"], SCALE),
    ]

    x_cf = x_nchw.reshape(n, 1, hw).astype(jnp.float32)   # channels-first, flat

    flat_args = [x_cf]
    in_specs = [pl.BlockSpec((1, 1, hw), lambda i: (i, 0, 0))]
    for wm, bm in mats:
        flat_args += [wm, bm]
        in_specs += [pl.BlockSpec(wm.shape, lambda i: (0, 0)),
                     pl.BlockSpec(bm.shape, lambda i: (0, 0))]

    flops = 2 * n * hw * 9 * (1 * HIDDEN + 2 * HIDDEN * HIDDEN
                              + HIDDEN * R2 + R2 * R2)
    bytes_accessed = 4 * (x_cf.size + sum(a.size for a in flat_args[1:])
                          + n * R2 * hw)

    kernel = functools.partial(_fused_sisr_kernel, H=h, W=w, OFF=off)
    u = pl.pallas_call(
        kernel,
        out_shape=jax.ShapeDtypeStruct((n, R2, hw), jnp.float32),
        grid=(n,),
        in_specs=in_specs,
        out_specs=pl.BlockSpec((1, R2, hw), lambda i: (i, 0, 0)),
        scratch_shapes=[
            pltpu.VMEM((HIDDEN, buf_w), jnp.float32),    # padded line buffer
            pltpu.VMEM((9 * HIDDEN, hw), jnp.float32),   # im2col patches
            pltpu.VMEM((HIDDEN, hw), jnp.float32),       # skip connection
        ],
        compiler_params=pltpu.CompilerParams(
            dimension_semantics=("parallel",)),
        cost_estimate=pl.CostEstimate(flops=flops, transcendentals=0,
                                      bytes_accessed=bytes_accessed),
    )(*flat_args)

    u_nchw = u.reshape(n, R2, h, w)
    return _pixel_shuffle_nchw(u_nchw, SCALE)            # (n, 1, 4h, 4w)


# ----------------------------------------------------------------------------
# Deterministic parameter init (matches the PyTorch module's shapes)
# ----------------------------------------------------------------------------
def init_params(key):
    def init_conv(k, cin, cout):
        k1, k2 = jax.random.split(k)
        bound = 1.0 / float(jnp.sqrt(cin * 9.0))
        w = jax.random.uniform(k1, (3, 3, cin, cout), jnp.float32, -bound, bound)
        b = jax.random.uniform(k2, (cout,), jnp.float32, -bound, bound)
        return w, b

    keys = jax.random.split(key, 5)
    return {
        "in":   init_conv(keys[0], 1, HIDDEN),        # input_layers conv
        "h1":   init_conv(keys[1], HIDDEN, HIDDEN),   # hidden conv 1 (+ReLU)
        "h2":   init_conv(keys[2], HIDDEN, HIDDEN),   # hidden conv 2
        "out1": init_conv(keys[3], HIDDEN, R2),       # pre-shuffle conv
        "out2": init_conv(keys[4], 1, 1),             # post-shuffle conv
    }


# ----------------------------------------------------------------------------
# Pure-JAX NCHW reference (mirrors the PyTorch module exactly; validates both
# the fused kernel and the shuffle/out2 algebraic folding independently)
# ----------------------------------------------------------------------------
def _ref_conv_nchw(x, w_hwio, b):
    w_oihw = jnp.transpose(w_hwio, (3, 2, 0, 1))
    out = lax.conv_general_dilated(
        x, w_oihw, window_strides=(1, 1), padding=((1, 1), (1, 1)),
        dimension_numbers=("NCHW", "OIHW", "NCHW"))
    return out + b.reshape(1, -1, 1, 1)


def reference_forward(x_nchw, params):
    h = _ref_conv_nchw(x_nchw, *params["in"])
    y = jax.nn.relu(_ref_conv_nchw(h, *params["h1"]))
    y = _ref_conv_nchw(y, *params["h2"]) + h
    y = _ref_conv_nchw(y, *params["out1"])
    y = _pixel_shuffle_nchw(y, SCALE)
    y = _ref_conv_nchw(y, *params["out2"])
    return y


if __name__ == "__main__":
    key = jax.random.PRNGKey(0)
    k_param, k_x = jax.random.split(key)
    params = init_params(k_param)

    # PyTorch-style NCHW input: batch=2, 1 channel, 16x16 low-res image.
    x = jax.random.normal(k_x, (2, 1, 16, 16), jnp.float32)

    out = jax.block_until_ready(jax.jit(simple_sisr_forward)(x, params))
    ref = jax.block_until_ready(reference_forward(x, params))

    assert out.shape == (2, 1, 16 * SCALE, 16 * SCALE), out.shape
    assert jnp.allclose(out, ref, atol=1e-4, rtol=1e-4), (
        float(jnp.max(jnp.abs(out - ref))))

    print("KERNEL_OK")
</pallas_src>

<mosaic_0001>
module attributes {stable_mosaic.version = 11 : i64} {
  func.func @_fused_sisr_kernel(%arg0: i32, %arg1: memref<1x1x256xf32, #tpu.memory_space<vmem>>, %arg2: memref<32x9xf32, #tpu.memory_space<vmem>>, %arg3: memref<32x1xf32, #tpu.memory_space<vmem>>, %arg4: memref<32x288xf32, #tpu.memory_space<vmem>>, %arg5: memref<32x1xf32, #tpu.memory_space<vmem>>, %arg6: memref<32x288xf32, #tpu.memory_space<vmem>>, %arg7: memref<32x1xf32, #tpu.memory_space<vmem>>, %arg8: memref<16x288xf32, #tpu.memory_space<vmem>>, %arg9: memref<16x1xf32, #tpu.memory_space<vmem>>, %arg10: memref<16x144xf32, #tpu.memory_space<vmem>>, %arg11: memref<16x1xf32, #tpu.memory_space<vmem>>, %arg12: memref<1x16x256xf32, #tpu.memory_space<vmem>>, %arg13: memref<32x512xf32, #tpu.memory_space<vmem>>, %arg14: memref<288x256xf32, #tpu.memory_space<vmem>>, %arg15: memref<32x256xf32, #tpu.memory_space<vmem>>) attributes {dimension_semantics = [#tpu.dimension_semantics<parallel>], iteration_bounds = array<i64: 2>, scalar_prefetch = 0 : i64, scratch_operands = 3 : i64, tpu.core_type = #tpu.core_type<tc>, window_params = [{transform_indices = @transform_0, window_bounds = array<i64: 1, 1, 256>}, {pipeline_mode = #tpu.pipeline_mode<synchronous>, transform_indices = @transform_1, window_bounds = array<i64: 32, 9>}, {pipeline_mode = #tpu.pipeline_mode<synchronous>, transform_indices = @transform_2, window_bounds = array<i64: 32, 1>}, {pipeline_mode = #tpu.pipeline_mode<synchronous>, transform_indices = @transform_3, window_bounds = array<i64: 32, 288>}, {pipeline_mode = #tpu.pipeline_mode<synchronous>, transform_indices = @transform_4, window_bounds = array<i64: 32, 1>}, {pipeline_mode = #tpu.pipeline_mode<synchronous>, transform_indices = @transform_5, window_bounds = array<i64: 32, 288>}, {pipeline_mode = #tpu.pipeline_mode<synchronous>, transform_indices = @transform_6, window_bounds = array<i64: 32, 1>}, {pipeline_mode = #tpu.pipeline_mode<synchronous>, transform_indices = @transform_7, window_bounds = array<i64: 16, 288>}, {pipeline_mode = #tpu.pipeline_mode<synchronous>, transform_indices = @transform_8, window_bounds = array<i64: 16, 1>}, {pipeline_mode = #tpu.pipeline_mode<synchronous>, transform_indices = @transform_9, window_bounds = array<i64: 16, 144>}, {pipeline_mode = #tpu.pipeline_mode<synchronous>, transform_indices = @transform_10, window_bounds = array<i64: 16, 1>}, {transform_indices = @transform_11, window_bounds = array<i64: 1, 16, 256>}]} {
    %0 = tpu.iota {dimensions = array<i32: 1>} : vector<1x256xi32>
    %c16_i32 = arith.constant 16 : i32
    %c0_i32 = arith.constant 0 : i32
    %1 = arith.cmpi eq, %c16_i32, %c0_i32 : i32
    %c1_i32 = arith.constant 1 : i32
    %2 = arith.select %1, %c1_i32, %c16_i32 : i32
    %3 = vector.broadcast %2 : i32 to vector<1x256xi32>
    %4 = arith.remsi %0, %3 : vector<1x256xi32>
    %c0_i32_0 = arith.constant 0 : i32
    %5 = vector.broadcast %c0_i32_0 : i32 to vector<1x256xi32>
    %6 = arith.cmpi ne, %4, %5 : vector<1x256xi32>
    %c0_i32_1 = arith.constant 0 : i32
    %7 = vector.broadcast %c0_i32_1 : i32 to vector<1x256xi32>
    %8 = arith.cmpi slt, %4, %7 : vector<1x256xi32>
    %c0_i32_2 = arith.constant 0 : i32
    %9 = arith.cmpi slt, %2, %c0_i32_2 : i32
    %10 = vector.broadcast %9 : i1 to vector<1x256xi1>
    %11 = vector.broadcast %10 : vector<1x256xi1> to vector<1x256xi1>
    %12 = arith.xori %8, %11 : vector<1x256xi1>
    %13 = arith.andi %12, %6 : vector<1x256xi1>
    %14 = vector.broadcast %2 : i32 to vector<1x256xi32>
    %15 = arith.addi %4, %14 : vector<1x256xi32>
    %16 = arith.select %13, %15, %4 : vector<1x256xi1>, vector<1x256xi32>
    %c1_i32_3 = arith.constant 1 : i32
    %17 = vector.broadcast %c1_i32_3 : i32 to vector<1x256xi32>
    %18 = arith.cmpi sge, %16, %17 : vector<1x256xi32>
    %c14_i32 = arith.constant 14 : i32
    %19 = vector.broadcast %c14_i32 : i32 to vector<1x256xi32>
    %20 = arith.cmpi sle, %16, %19 : vector<1x256xi32>
    %cst = arith.constant 0.000000e+00 : f32
    %21 = vector.broadcast %cst : f32 to vector<32x512xf32>
    %c0 = arith.constant 0 : index
    %c0_4 = arith.constant 0 : index
    %22 = vector.load %arg13[%c0, %c0_4] : memref<32x512xf32, #tpu.memory_space<vmem>>, vector<32x512xf32>
    tpu.vector_store %arg13[%c0, %c0_4], %21 {strides = array<i32>} : memref<32x512xf32, #tpu.memory_space<vmem>>, vector<32x512xf32>,
    %c0_5 = arith.constant 0 : index
    %c0_6 = arith.constant 0 : index
    %c0_7 = arith.constant 0 : index
    %23 = vector.load %arg1[%c0_5, %c0_6, %c0_7] : memref<1x1x256xf32, #tpu.memory_space<vmem>>, vector<1x1x256xf32>
    %24 = vector.shape_cast %23 : vector<1x1x256xf32> to vector<1x256xf32>
    %c0_8 = arith.constant 0 : index
    %c128 = arith.constant 128 : index
    %25 = vector.load %arg13[%c0_8, %c128] : memref<32x512xf32, #tpu.memory_space<vmem>>, vector<1x256xf32>
    tpu.vector_store %arg13[%c0_8, %c128], %24 {strides = array<i32>} : memref<32x512xf32, #tpu.memory_space<vmem>>, vector<1x256xf32>,
    %c0_9 = arith.constant 0 : index
    %c111 = arith.constant 111 : index
    %26 = vector.load %arg13[%c0_9, %c111] : memref<32x512xf32, #tpu.memory_space<vmem>>, vector<1x256xf32>
    %cst_10 = arith.constant 0.000000e+00 : f32
    %27 = vector.broadcast %cst_10 : f32 to vector<1x256xf32>
    %28 = arith.select %18, %26, %27 : vector<1x256xi1>, vector<1x256xf32>
    %c0_11 = arith.constant 0 : index
    %c0_12 = arith.constant 0 : index
    %29 = vector.load %arg14[%c0_11, %c0_12] : memref<288x256xf32, #tpu.memory_space<vmem>>, vector<1x256xf32>
    tpu.vector_store %arg14[%c0_11, %c0_12], %28 {strides = array<i32>} : memref<288x256xf32, #tpu.memory_space<vmem>>, vector<1x256xf32>,
    %c0_13 = arith.constant 0 : index
    %c112 = arith.constant 112 : index
    %30 = vector.load %arg13[%c0_13, %c112] : memref<32x512xf32, #tpu.memory_space<vmem>>, vector<1x256xf32>
    %c1 = arith.constant 1 : index
    %c0_14 = arith.constant 0 : index
    %31 = vector.load %arg14[%c1, %c0_14] : memref<288x256xf32, #tpu.memory_space<vmem>>, vector<1x256xf32>
    tpu.vector_store %arg14[%c1, %c0_14], %30 {strides = array<i32>} : memref<288x256xf32, #tpu.memory_space<vmem>>, vector<1x256xf32>,
    %c0_15 = arith.constant 0 : index
    %c113 = arith.constant 113 : index
    %32 = vector.load %arg13[%c0_15, %c113] : memref<32x512xf32, #tpu.memory_space<vmem>>, vector<1x256xf32>
    %cst_16 = arith.constant 0.000000e+00 : f32
    %33 = vector.broadcast %cst_16 : f32 to vector<1x256xf32>
    %34 = arith.select %20, %32, %33 : vector<1x256xi1>, vector<1x256xf32>
    %c2 = arith.constant 2 : index
    %c0_17 = arith.constant 0 : index
    %35 = vector.load %arg14[%c2, %c0_17] : memref<288x256xf32, #tpu.memory_space<vmem>>, vector<1x256xf32>
    tpu.vector_store %arg14[%c2, %c0_17], %34 {strides = array<i32>} : memref<288x256xf32, #tpu.memory_space<vmem>>, vector<1x256xf32>,
    %c0_18 = arith.constant 0 : index
    %c127 = arith.constant 127 : index
    %36 = vector.load %arg13[%c0_18, %c127] : memref<32x512xf32, #tpu.memory_space<vmem>>, vector<1x256xf32>
    %cst_19 = arith.constant 0.000000e+00 : f32
    %37 = vector.broadcast %cst_19 : f32 to vector<1x256xf32>
    %38 = arith.select %18, %36, %37 : vector<1x256xi1>, vector<1x256xf32>
    %c3 = arith.constant 3 : index
    %c0_20 = arith.constant 0 : index
    %39 = vector.load %arg14[%c3, %c0_20] : memref<288x256xf32, #tpu.memory_space<vmem>>, vector<1x256xf32>
    tpu.vector_store %arg14[%c3, %c0_20], %38 {strides = array<i32>} : memref<288x256xf32, #tpu.memory_space<vmem>>, vector<1x256xf32>,
    %c0_21 = arith.constant 0 : index
    %c128_22 = arith.constant 128 : index
    %40 = vector.load %arg13[%c0_21, %c128_22] : memref<32x512xf32, #tpu.memory_space<vmem>>, vector<1x256xf32>
    %c4 = arith.constant 4 : index
    %c0_23 = arith.constant 0 : index
    %41 = vector.load %arg14[%c4, %c0_23] : memref<288x256xf32, #tpu.memory_space<vmem>>, vector<1x256xf32>
    tpu.vector_store %arg14[%c4, %c0_23], %40 {strides = array<i32>} : memref<288x256xf32, #tpu.memory_space<vmem>>, vector<1x256xf32>,
    %c0_24 = arith.constant 0 : index
    %c129 = arith.constant 129 : index
    %42 = vector.load %arg13[%c0_24, %c129] : memref<32x512xf32, #tpu.memory_space<vmem>>, vector<1x256xf32>
    %cst_25 = arith.constant 0.000000e+00 : f32
    %43 = vector.broadcast %cst_25 : f32 to vector<1x256xf32>
    %44 = arith.select %20, %42, %43 : vector<1x256xi1>, vector<1x256xf32>
    %c5 = arith.constant 5 : index
    %c0_26 = arith.constant 0 : index
    %45 = vector.load %arg14[%c5, %c0_26] : memref<288x256xf32, #tpu.memory_space<vmem>>, vector<1x256xf32>
    tpu.vector_store %arg14[%c5, %c0_26], %44 {strides = array<i32>} : memref<288x256xf32, #tpu.memory_space<vmem>>, vector<1x256xf32>,
    %c0_27 = arith.constant 0 : index
    %c143 = arith.constant 143 : index
    %46 = vector.load %arg13[%c0_27, %c143] : memref<32x512xf32, #tpu.memory_space<vmem>>, vector<1x256xf32>
    %cst_28 = arith.constant 0.000000e+00 : f32
    %47 = vector.broadcast %cst_28 : f32 to vector<1x256xf32>
    %48 = arith.select %18, %46, %47 : vector<1x256xi1>, vector<1x256xf32>
    %c6 = arith.constant 6 : index
    %c0_29 = arith.constant 0 : index
    %49 = vector.load %arg14[%c6, %c0_29] : memref<288x256xf32, #tpu.memory_space<vmem>>, vector<1x256xf32>
    tpu.vector_store %arg14[%c6, %c0_29], %48 {strides = array<i32>} : memref<288x256xf32, #tpu.memory_space<vmem>>, vector<1x256xf32>,
    %c0_30 = arith.constant 0 : index
    %c144 = arith.constant 144 : index
    %50 = vector.load %arg13[%c0_30, %c144] : memref<32x512xf32, #tpu.memory_space<vmem>>, vector<1x256xf32>
    %c7 = arith.constant 7 : index
    %c0_31 = arith.constant 0 : index
    %51 = vector.load %arg14[%c7, %c0_31] : memref<288x256xf32, #tpu.memory_space<vmem>>, vector<1x256xf32>
    tpu.vector_store %arg14[%c7, %c0_31], %50 {strides = array<i32>} : memref<288x256xf32, #tpu.memory_space<vmem>>, vector<1x256xf32>,
    %c0_32 = arith.constant 0 : index
    %c145 = arith.constant 145 : index
    %52 = vector.load %arg13[%c0_32, %c145] : memref<32x512xf32, #tpu.memory_space<vmem>>, vector<1x256xf32>
    %cst_33 = arith.constant 0.000000e+00 : f32
    %53 = vector.broadcast %cst_33 : f32 to vector<1x256xf32>
    %54 = arith.select %20, %52, %53 : vector<1x256xi1>, vector<1x256xf32>
    %c8 = arith.constant 8 : index
    %c0_34 = arith.constant 0 : index
    %55 = vector.load %arg14[%c8, %c0_34] : memref<288x256xf32, #tpu.memory_space<vmem>>, vector<1x256xf32>
    tpu.vector_store %arg14[%c8, %c0_34], %54 {strides = array<i32>} : memref<288x256xf32, #tpu.memory_space<vmem>>, vector<1x256xf32>,
    %c0_35 = arith.constant 0 : index
    %c0_36 = arith.constant 0 : index
    %56 = vector.load %arg2[%c0_35, %c0_36] : memref<32x9xf32, #tpu.memory_space<vmem>>, vector<32x9xf32>
    %c0_37 = arith.constant 0 : index
    %c0_38 = arith.constant 0 : index
    %57 = vector.load %arg14[%c0_37, %c0_38] : memref<288x256xf32, #tpu.memory_space<vmem>>, vector<9x256xf32>
    %cst_39 = arith.constant dense<0.000000e+00> : vector<32x256xf32>
    %58 = tpu.matmul %56, %57, %cst_39 {dimension_numbers = #tpu.dot_dimension_numbers<[1], [0], [0], [1], [0, 0, 1, 1], [], []>} : vector<32x9xf32>, vector<9x256xf32>, vector<32x256xf32> -> vector<32x256xf32>
    %c0_40 = arith.constant 0 : index
    %c0_41 = arith.constant 0 : index
    %59 = vector.load %arg3[%c0_40, %c0_41] : memref<32x1xf32, #tpu.memory_space<vmem>>, vector<32x1xf32>
    %60 = vector.broadcast %59 : vector<32x1xf32> to vector<32x256xf32>
    %61 = arith.addf %58, %60 : vector<32x256xf32>
    %c0_42 = arith.constant 0 : index
    %c0_43 = arith.constant 0 : index
    %62 = vector.load %arg15[%c0_42, %c0_43] : memref<32x256xf32, #tpu.memory_space<vmem>>, vector<32x256xf32>
    tpu.vector_store %arg15[%c0_42, %c0_43], %61 {strides = array<i32>} : memref<32x256xf32, #tpu.memory_space<vmem>>, vector<32x256xf32>,
    %c0_44 = arith.constant 0 : index
    %c128_45 = arith.constant 128 : index
    %63 = vector.load %arg13[%c0_44, %c128_45] : memref<32x512xf32, #tpu.memory_space<vmem>>, vector<32x256xf32>
    tpu.vector_store %arg13[%c0_44, %c128_45], %61 {strides = array<i32>} : memref<32x512xf32, #tpu.memory_space<vmem>>, vector<32x256xf32>,
    %c0_46 = arith.constant 0 : index
    %c111_47 = arith.constant 111 : index
    %64 = vector.load %arg13[%c0_46, %c111_47] : memref<32x512xf32, #tpu.memory_space<vmem>>, vector<32x256xf32>
    %cst_48 = arith.constant 0.000000e+00 : f32
    %65 = vector.shape_cast %18 : vector<1x256xi1> to vector<1x256xi1>
    %66 = vector.broadcast %65 : vector<1x256xi1> to vector<32x256xi1>
    %67 = vector.broadcast %cst_48 : f32 to vector<32x256xf32>
    %68 = arith.select %66, %64, %67 : vector<32x256xi1>, vector<32x256xf32>
    %c0_49 = arith.constant 0 : index
    %c0_50 = arith.constant 0 : index
    %69 = vector.load %arg14[%c0_49, %c0_50] : memref<288x256xf32, #tpu.memory_space<vmem>>, vector<32x256xf32>
    tpu.vector_store %arg14[%c0_49, %c0_50], %68 {strides = array<i32>} : memref<288x256xf32, #tpu.memory_space<vmem>>, vector<32x256xf32>,
    %c0_51 = arith.constant 0 : index
    %c112_52 = arith.constant 112 : index
    %70 = vector.load %arg13[%c0_51, %c112_52] : memref<32x512xf32, #tpu.memory_space<vmem>>, vector<32x256xf32>
    %c32 = arith.constant 32 : index
    %c0_53 = arith.constant 0 : index
    %71 = vector.load %arg14[%c32, %c0_53] : memref<288x256xf32, #tpu.memory_space<vmem>>, vector<32x256xf32>
    tpu.vector_store %arg14[%c32, %c0_53], %70 {strides = array<i32>} : memref<288x256xf32, #tpu.memory_space<vmem>>, vector<32x256xf32>,
    %c0_54 = arith.constant 0 : index
    %c113_55 = arith.constant 113 : index
    %72 = vector.load %arg13[%c0_54, %c113_55] : memref<32x512xf32, #tpu.memory_space<vmem>>, vector<32x256xf32>
    %cst_56 = arith.constant 0.000000e+00 : f32
    %73 = vector.shape_cast %20 : vector<1x256xi1> to vector<1x256xi1>
    %74 = vector.broadcast %73 : vector<1x256xi1> to vector<32x256xi1>
    %75 = vector.broadcast %cst_56 : f32 to vector<32x256xf32>
    %76 = arith.select %74, %72, %75 : vector<32x256xi1>, vector<32x256xf32>
    %c64 = arith.constant 64 : index
    %c0_57 = arith.constant 0 : index
    %77 = vector.load %arg14[%c64, %c0_57] : memref<288x256xf32, #tpu.memory_space<vmem>>, vector<32x256xf32>
    tpu.vector_store %arg14[%c64, %c0_57], %76 {strides = array<i32>} : memref<288x256xf32, #tpu.memory_space<vmem>>, vector<32x256xf32>,
    %c0_58 = arith.constant 0 : index
    %c127_59 = arith.constant 127 : index
    %78 = vector.load %arg13[%c0_58, %c127_59] : memref<32x512xf32, #tpu.memory_space<vmem>>, vector<32x256xf32>
    %cst_60 = arith.constant 0.000000e+00 : f32
    %79 = vector.shape_cast %18 : vector<1x256xi1> to vector<1x256xi1>
    %80 = vector.broadcast %79 : vector<1x256xi1> to vector<32x256xi1>
    %81 = vector.broadcast %cst_60 : f32 to vector<32x256xf32>
    %82 = arith.select %80, %78, %81 : vector<32x256xi1>, vector<32x256xf32>
    %c96 = arith.constant 96 : index
    %c0_61 = arith.constant 0 : index
    %83 = vector.load %arg14[%c96, %c0_61] : memref<288x256xf32, #tpu.memory_space<vmem>>, vector<32x256xf32>
    tpu.vector_store %arg14[%c96, %c0_61], %82 {strides = array<i32>} : memref<288x256xf32, #tpu.memory_space<vmem>>, vector<32x256xf32>,
    %c0_62 = arith.constant 0 : index
    %c128_63 = arith.constant 128 : index
    %84 = vector.load %arg13[%c0_62, %c128_63] : memref<32x512xf32, #tpu.memory_space<vmem>>, vector<32x256xf32>
    %c128_64 = arith.constant 128 : index
    %c0_65 = arith.constant 0 : index
    %85 = vector.load %arg14[%c128_64, %c0_65] : memref<288x256xf32, #tpu.memory_space<vmem>>, vector<32x256xf32>
    tpu.vector_store %arg14[%c128_64, %c0_65], %84 {strides = array<i32>} : memref<288x256xf32, #tpu.memory_space<vmem>>, vector<32x256xf32>,
    %c0_66 = arith.constant 0 : index
    %c129_67 = arith.constant 129 : index
    %86 = vector.load %arg13[%c0_66, %c129_67] : memref<32x512xf32, #tpu.memory_space<vmem>>, vector<32x256xf32>
    %cst_68 = arith.constant 0.000000e+00 : f32
    %87 = vector.shape_cast %20 : vector<1x256xi1> to vector<1x256xi1>
    %88 = vector.broadcast %87 : vector<1x256xi1> to vector<32x256xi1>
    %89 = vector.broadcast %cst_68 : f32 to vector<32x256xf32>
    %90 = arith.select %88, %86, %89 : vector<32x256xi1>, vector<32x256xf32>
    %c160 = arith.constant 160 : index
    %c0_69 = arith.constant 0 : index
    %91 = vector.load %arg14[%c160, %c0_69] : memref<288x256xf32, #tpu.memory_space<vmem>>, vector<32x256xf32>
    tpu.vector_store %arg14[%c160, %c0_69], %90 {strides = array<i32>} : memref<288x256xf32, #tpu.memory_space<vmem>>, vector<32x256xf32>,
    %c0_70 = arith.constant 0 : index
    %c143_71 = arith.constant 143 : index
    %92 = vector.load %arg13[%c0_70, %c143_71] : memref<32x512xf32, #tpu.memory_space<vmem>>, vector<32x256xf32>
    %cst_72 = arith.constant 0.000000e+00 : f32
    %93 = vector.shape_cast %18 : vector<1x256xi1> to vector<1x256xi1>
    %94 = vector.broadcast %93 : vector<1x256xi1> to vector<32x256xi1>
    %95 = vector.broadcast %cst_72 : f32 to vector<32x256xf32>
    %96 = arith.select %94, %92, %95 : vector<32x256xi1>, vector<32x256xf32>
    %c192 = arith.constant 192 : index
    %c0_73 = arith.constant 0 : index
    %97 = vector.load %arg14[%c192, %c0_73] : memref<288x256xf32, #tpu.memory_space<vmem>>, vector<32x256xf32>
    tpu.vector_store %arg14[%c192, %c0_73], %96 {strides = array<i32>} : memref<288x256xf32, #tpu.memory_space<vmem>>, vector<32x256xf32>,
    %c0_74 = arith.constant 0 : index
    %c144_75 = arith.constant 144 : index
    %98 = vector.load %arg13[%c0_74, %c144_75] : memref<32x512xf32, #tpu.memory_space<vmem>>, vector<32x256xf32>
    %c224 = arith.constant 224 : index
    %c0_76 = arith.constant 0 : index
    %99 = vector.load %arg14[%c224, %c0_76] : memref<288x256xf32, #tpu.memory_space<vmem>>, vector<32x256xf32>
    tpu.vector_store %arg14[%c224, %c0_76], %98 {strides = array<i32>} : memref<288x256xf32, #tpu.memory_space<vmem>>, vector<32x256xf32>,
    %c0_77 = arith.constant 0 : index
    %c145_78 = arith.constant 145 : index
    %100 = vector.load %arg13[%c0_77, %c145_78] : memref<32x512xf32, #tpu.memory_space<vmem>>, vector<32x256xf32>
    %cst_79 = arith.constant 0.000000e+00 : f32
    %101 = vector.shape_cast %20 : vector<1x256xi1> to vector<1x256xi1>
    %102 = vector.broadcast %101 : vector<1x256xi1> to vector<32x256xi1>
    %103 = vector.broadcast %cst_79 : f32 to vector<32x256xf32>
    %104 = arith.select %102, %100, %103 : vector<32x256xi1>, vector<32x256xf32>
    %c256 = arith.constant 256 : index
    %c0_80 = arith.constant 0 : index
    %105 = vector.load %arg14[%c256, %c0_80] : memref<288x256xf32, #tpu.memory_space<vmem>>, vector<32x256xf32>
    tpu.vector_store %arg14[%c256, %c0_80], %104 {strides = array<i32>} : memref<288x256xf32, #tpu.memory_space<vmem>>, vector<32x256xf32>,
    %c0_81 = arith.constant 0 : index
    %c0_82 = arith.constant 0 : index
    %106 = vector.load %arg4[%c0_81, %c0_82] : memref<32x288xf32, #tpu.memory_space<vmem>>, vector<32x288xf32>
    %c0_83 = arith.constant 0 : index
    %c0_84 = arith.constant 0 : index
    %107 = vector.load %arg14[%c0_83, %c0_84] : memref<288x256xf32, #tpu.memory_space<vmem>>, vector<288x256xf32>
    %cst_85 = arith.constant dense<0.000000e+00> : vector<32x256xf32>
    %108 = tpu.matmul %106, %107, %cst_85 {dimension_numbers = #tpu.dot_dimension_numbers<[1], [0], [0], [1], [0, 0, 1, 1], [], []>} : vector<32x288xf32>, vector<288x256xf32>, vector<32x256xf32> -> vector<32x256xf32>
    %c0_86 = arith.constant 0 : index
    %c0_87 = arith.constant 0 : index
    %109 = vector.load %arg5[%c0_86, %c0_87] : memref<32x1xf32, #tpu.memory_space<vmem>>, vector<32x1xf32>
    %110 = vector.broadcast %109 : vector<32x1xf32> to vector<32x256xf32>
    %111 = arith.addf %108, %110 : vector<32x256xf32>
    %cst_88 = arith.constant 0.000000e+00 : f32
    %112 = vector.broadcast %cst_88 : f32 to vector<32x256xf32>
    %113 = arith.maximumf %111, %112 : vector<32x256xf32>
    %c0_89 = arith.constant 0 : index
    %c0_90 = arith.constant 0 : index
    %114 = vector.load %arg15[%c0_89, %c0_90] : memref<32x256xf32, #tpu.memory_space<vmem>>, vector<32x256xf32>
    %c0_91 = arith.constant 0 : index
    %c128_92 = arith.constant 128 : index
    %115 = vector.load %arg13[%c0_91, %c128_92] : memref<32x512xf32, #tpu.memory_space<vmem>>, vector<32x256xf32>
    tpu.vector_store %arg13[%c0_91, %c128_92], %113 {strides = array<i32>} : memref<32x512xf32, #tpu.memory_space<vmem>>, vector<32x256xf32>,
    %c0_93 = arith.constant 0 : index
    %c111_94 = arith.constant 111 : index
    %116 = vector.load %arg13[%c0_93, %c111_94] : memref<32x512xf32, #tpu.memory_space<vmem>>, vector<32x256xf32>
    %cst_95 = arith.constant 0.000000e+00 : f32
    %117 = vector.shape_cast %18 : vector<1x256xi1> to vector<1x256xi1>
    %118 = vector.broadcast %117 : vector<1x256xi1> to vector<32x256xi1>
    %119 = vector.broadcast %cst_95 : f32 to vector<32x256xf32>
    %120 = arith.select %118, %116, %119 : vector<32x256xi1>, vector<32x256xf32>
    %c0_96 = arith.constant 0 : index
    %c0_97 = arith.constant 0 : index
    %121 = vector.load %arg14[%c0_96, %c0_97] : memref<288x256xf32, #tpu.memory_space<vmem>>, vector<32x256xf32>
    tpu.vector_store %arg14[%c0_96, %c0_97], %120 {strides = array<i32>} : memref<288x256xf32, #tpu.memory_space<vmem>>, vector<32x256xf32>,
    %c0_98 = arith.constant 0 : index
    %c112_99 = arith.constant 112 : index
    %122 = vector.load %arg13[%c0_98, %c112_99] : memref<32x512xf32, #tpu.memory_space<vmem>>, vector<32x256xf32>
    %c32_100 = arith.constant 32 : index
    %c0_101 = arith.constant 0 : index
    %123 = vector.load %arg14[%c32_100, %c0_101] : memref<288x256xf32, #tpu.memory_space<vmem>>, vector<32x256xf32>
    tpu.vector_store %arg14[%c32_100, %c0_101], %122 {strides = array<i32>} : memref<288x256xf32, #tpu.memory_space<vmem>>, vector<32x256xf32>,
    %c0_102 = arith.constant 0 : index
    %c113_103 = arith.constant 113 : index
    %124 = vector.load %arg13[%c0_102, %c113_103] : memref<32x512xf32, #tpu.memory_space<vmem>>, vector<32x256xf32>
    %cst_104 = arith.constant 0.000000e+00 : f32
    %125 = vector.shape_cast %20 : vector<1x256xi1> to vector<1x256xi1>
    %126 = vector.broadcast %125 : vector<1x256xi1> to vector<32x256xi1>
    %127 = vector.broadcast %cst_104 : f32 to vector<32x256xf32>
    %128 = arith.select %126, %124, %127 : vector<32x256xi1>, vector<32x256xf32>
    %c64_105 = arith.constant 64 : index
    %c0_106 = arith.constant 0 : index
    %129 = vector.load %arg14[%c64_105, %c0_106] : memref<288x256xf32, #tpu.memory_space<vmem>>, vector<32x256xf32>
    tpu.vector_store %arg14[%c64_105, %c0_106], %128 {strides = array<i32>} : memref<288x256xf32, #tpu.memory_space<vmem>>, vector<32x256xf32>,
    %c0_107 = arith.constant 0 : index
    %c127_108 = arith.constant 127 : index
    %130 = vector.load %arg13[%c0_107, %c127_108] : memref<32x512xf32, #tpu.memory_space<vmem>>, vector<32x256xf32>
    %cst_109 = arith.constant 0.000000e+00 : f32
    %131 = vector.shape_cast %18 : vector<1x256xi1> to vector<1x256xi1>
    %132 = vector.broadcast %131 : vector<1x256xi1> to vector<32x256xi1>
    %133 = vector.broadcast %cst_109 : f32 to vector<32x256xf32>
    %134 = arith.select %132, %130, %133 : vector<32x256xi1>, vector<32x256xf32>
    %c96_110 = arith.constant 96 : index
    %c0_111 = arith.constant 0 : index
    %135 = vector.load %arg14[%c96_110, %c0_111] : memref<288x256xf32, #tpu.memory_space<vmem>>, vector<32x256xf32>
    tpu.vector_store %arg14[%c96_110, %c0_111], %134 {strides = array<i32>} : memref<288x256xf32, #tpu.memory_space<vmem>>, vector<32x256xf32>,
    %c0_112 = arith.constant 0 : index
    %c128_113 = arith.constant 128 : index
    %136 = vector.load %arg13[%c0_112, %c128_113] : memref<32x512xf32, #tpu.memory_space<vmem>>, vector<32x256xf32>
    %c128_114 = arith.constant 128 : index
    %c0_115 = arith.constant 0 : index
    %137 = vector.load %arg14[%c128_114, %c0_115] : memref<288x256xf32, #tpu.memory_space<vmem>>, vector<32x256xf32>
    tpu.vector_store %arg14[%c128_114, %c0_115], %136 {strides = array<i32>} : memref<288x256xf32, #tpu.memory_space<vmem>>, vector<32x256xf32>,
    %c0_116 = arith.constant 0 : index
    %c129_117 = arith.constant 129 : index
    %138 = vector.load %arg13[%c0_116, %c129_117] : memref<32x512xf32, #tpu.memory_space<vmem>>, vector<32x256xf32>
    %cst_118 = arith.constant 0.000000e+00 : f32
    %139 = vector.shape_cast %20 : vector<1x256xi1> to vector<1x256xi1>
    %140 = vector.broadcast %139 : vector<1x256xi1> to vector<32x256xi1>
    %141 = vector.broadcast %cst_118 : f32 to vector<32x256xf32>
    %142 = arith.select %140, %138, %141 : vector<32x256xi1>, vector<32x256xf32>
    %c160_119 = arith.constant 160 : index
    %c0_120 = arith.constant 0 : index
    %143 = vector.load %arg14[%c160_119, %c0_120] : memref<288x256xf32, #tpu.memory_space<vmem>>, vector<32x256xf32>
    tpu.vector_store %arg14[%c160_119, %c0_120], %142 {strides = array<i32>} : memref<288x256xf32, #tpu.memory_space<vmem>>, vector<32x256xf32>,
    %c0_121 = arith.constant 0 : index
    %c143_122 = arith.constant 143 : index
    %144 = vector.load %arg13[%c0_121, %c143_122] : memref<32x512xf32, #tpu.memory_space<vmem>>, vector<32x256xf32>
    %cst_123 = arith.constant 0.000000e+00 : f32
    %145 = vector.shape_cast %18 : vector<1x256xi1> to vector<1x256xi1>
    %146 = vector.broadcast %145 : vector<1x256xi1> to vector<32x256xi1>
    %147 = vector.broadcast %cst_123 : f32 to vector<32x256xf32>
    %148 = arith.select %146, %144, %147 : vector<32x256xi1>, vector<32x256xf32>
    %c192_124 = arith.constant 192 : index
    %c0_125 = arith.constant 0 : index
    %149 = vector.load %arg14[%c192_124, %c0_125] : memref<288x256xf32, #tpu.memory_space<vmem>>, vector<32x256xf32>
    tpu.vector_store %arg14[%c192_124, %c0_125], %148 {strides = array<i32>} : memref<288x256xf32, #tpu.memory_space<vmem>>, vector<32x256xf32>,
    %c0_126 = arith.constant 0 : index
    %c144_127 = arith.constant 144 : index
    %150 = vector.load %arg13[%c0_126, %c144_127] : memref<32x512xf32, #tpu.memory_space<vmem>>, vector<32x256xf32>
    %c224_128 = arith.constant 224 : index
    %c0_129 = arith.constant 0 : index
    %151 = vector.load %arg14[%c224_128, %c0_129] : memref<288x256xf32, #tpu.memory_space<vmem>>, vector<32x256xf32>
    tpu.vector_store %arg14[%c224_128, %c0_129], %150 {strides = array<i32>} : memref<288x256xf32, #tpu.memory_space<vmem>>, vector<32x256xf32>,
    %c0_130 = arith.constant 0 : index
    %c145_131 = arith.constant 145 : index
    %152 = vector.load %arg13[%c0_130, %c145_131] : memref<32x512xf32, #tpu.memory_space<vmem>>, vector<32x256xf32>
    %cst_132 = arith.constant 0.000000e+00 : f32
    %153 = vector.shape_cast %20 : vector<1x256xi1> to vector<1x256xi1>
    %154 = vector.broadcast %153 : vector<1x256xi1> to vector<32x256xi1>
    %155 = vector.broadcast %cst_132 : f32 to vector<32x256xf32>
    %156 = arith.select %154, %152, %155 : vector<32x256xi1>, vector<32x256xf32>
    %c256_133 = arith.constant 256 : index
    %c0_134 = arith.constant 0 : index
    %157 = vector.load %arg14[%c256_133, %c0_134] : memref<288x256xf32, #tpu.memory_space<vmem>>, vector<32x256xf32>
    tpu.vector_store %arg14[%c256_133, %c0_134], %156 {strides = array<i32>} : memref<288x256xf32, #tpu.memory_space<vmem>>, vector<32x256xf32>,
    %c0_135 = arith.constant 0 : index
    %c0_136 = arith.constant 0 : index
    %158 = vector.load %arg6[%c0_135, %c0_136] : memref<32x288xf32, #tpu.memory_space<vmem>>, vector<32x288xf32>
    %c0_137 = arith.constant 0 : index
    %c0_138 = arith.constant 0 : index
    %159 = vector.load %arg14[%c0_137, %c0_138] : memref<288x256xf32, #tpu.memory_space<vmem>>, vector<288x256xf32>
    %cst_139 = arith.constant dense<0.000000e+00> : vector<32x256xf32>
    %160 = tpu.matmul %158, %159, %cst_139 {dimension_numbers = #tpu.dot_dimension_numbers<[1], [0], [0], [1], [0, 0, 1, 1], [], []>} : vector<32x288xf32>, vector<288x256xf32>, vector<32x256xf32> -> vector<32x256xf32>
    %c0_140 = arith.constant 0 : index
    %c0_141 = arith.constant 0 : index
    %161 = vector.load %arg7[%c0_140, %c0_141] : memref<32x1xf32, #tpu.memory_space<vmem>>, vector<32x1xf32>
    %162 = vector.broadcast %161 : vector<32x1xf32> to vector<32x256xf32>
    %163 = arith.addf %160, %162 : vector<32x256xf32>
    %164 = arith.addf %163, %114 : vector<32x256xf32>
    %c0_142 = arith.constant 0 : index
    %c128_143 = arith.constant 128 : index
    %165 = vector.load %arg13[%c0_142, %c128_143] : memref<32x512xf32, #tpu.memory_space<vmem>>, vector<32x256xf32>
    tpu.vector_store %arg13[%c0_142, %c128_143], %164 {strides = array<i32>} : memref<32x512xf32, #tpu.memory_space<vmem>>, vector<32x256xf32>,
    %c0_144 = arith.constant 0 : index
    %c111_145 = arith.constant 111 : index
    %166 = vector.load %arg13[%c0_144, %c111_145] : memref<32x512xf32, #tpu.memory_space<vmem>>, vector<32x256xf32>
    %cst_146 = arith.constant 0.000000e+00 : f32
    %167 = vector.shape_cast %18 : vector<1x256xi1> to vector<1x256xi1>
    %168 = vector.broadcast %167 : vector<1x256xi1> to vector<32x256xi1>
    %169 = vector.broadcast %cst_146 : f32 to vector<32x256xf32>
    %170 = arith.select %168, %166, %169 : vector<32x256xi1>, vector<32x256xf32>
    %c0_147 = arith.constant 0 : index
    %c0_148 = arith.constant 0 : index
    %171 = vector.load %arg14[%c0_147, %c0_148] : memref<288x256xf32, #tpu.memory_space<vmem>>, vector<32x256xf32>
    tpu.vector_store %arg14[%c0_147, %c0_148], %170 {strides = array<i32>} : memref<288x256xf32, #tpu.memory_space<vmem>>, vector<32x256xf32>,
    %c0_149 = arith.constant 0 : index
    %c112_150 = arith.constant 112 : index
    %172 = vector.load %arg13[%c0_149, %c112_150] : memref<32x512xf32, #tpu.memory_space<vmem>>, vector<32x256xf32>
    %c32_151 = arith.constant 32 : index
    %c0_152 = arith.constant 0 : index
    %173 = vector.load %arg14[%c32_151, %c0_152] : memref<288x256xf32, #tpu.memory_space<vmem>>, vector<32x256xf32>
    tpu.vector_store %arg14[%c32_151, %c0_152], %172 {strides = array<i32>} : memref<288x256xf32, #tpu.memory_space<vmem>>, vector<32x256xf32>,
    %c0_153 = arith.constant 0 : index
    %c113_154 = arith.constant 113 : index
    %174 = vector.load %arg13[%c0_153, %c113_154] : memref<32x512xf32, #tpu.memory_space<vmem>>, vector<32x256xf32>
    %cst_155 = arith.constant 0.000000e+00 : f32
    %175 = vector.shape_cast %20 : vector<1x256xi1> to vector<1x256xi1>
    %176 = vector.broadcast %175 : vector<1x256xi1> to vector<32x256xi1>
    %177 = vector.broadcast %cst_155 : f32 to vector<32x256xf32>
    %178 = arith.select %176, %174, %177 : vector<32x256xi1>, vector<32x256xf32>
    %c64_156 = arith.constant 64 : index
    %c0_157 = arith.constant 0 : index
    %179 = vector.load %arg14[%c64_156, %c0_157] : memref<288x256xf32, #tpu.memory_space<vmem>>, vector<32x256xf32>
    tpu.vector_store %arg14[%c64_156, %c0_157], %178 {strides = array<i32>} : memref<288x256xf32, #tpu.memory_space<vmem>>, vector<32x256xf32>,
    %c0_158 = arith.constant 0 : index
    %c127_159 = arith.constant 127 : index
    %180 = vector.load %arg13[%c0_158, %c127_159] : memref<32x512xf32, #tpu.memory_space<vmem>>, vector<32x256xf32>
    %cst_160 = arith.constant 0.000000e+00 : f32
    %181 = vector.shape_cast %18 : vector<1x256xi1> to vector<1x256xi1>
    %182 = vector.broadcast %181 : vector<1x256xi1> to vector<32x256xi1>
    %183 = vector.broadcast %cst_160 : f32 to vector<32x256xf32>
    %184 = arith.select %182, %180, %183 : vector<32x256xi1>, vector<32x256xf32>
    %c96_161 = arith.constant 96 : index
    %c0_162 = arith.constant 0 : index
    %185 = vector.load %arg14[%c96_161, %c0_162] : memref<288x256xf32, #tpu.memory_space<vmem>>, vector<32x256xf32>
    tpu.vector_store %arg14[%c96_161, %c0_162], %184 {strides = array<i32>} : memref<288x256xf32, #tpu.memory_space<vmem>>, vector<32x256xf32>,
    %c0_163 = arith.constant 0 : index
    %c128_164 = arith.constant 128 : index
    %186 = vector.load %arg13[%c0_163, %c128_164] : memref<32x512xf32, #tpu.memory_space<vmem>>, vector<32x256xf32>
    %c128_165 = arith.constant 128 : index
    %c0_166 = arith.constant 0 : index
    %187 = vector.load %arg14[%c128_165, %c0_166] : memref<288x256xf32, #tpu.memory_space<vmem>>, vector<32x256xf32>
    tpu.vector_store %arg14[%c128_165, %c0_166], %186 {strides = array<i32>} : memref<288x256xf32, #tpu.memory_space<vmem>>, vector<32x256xf32>,
    %c0_167 = arith.constant 0 : index
    %c129_168 = arith.constant 129 : index
    %188 = vector.load %arg13[%c0_167, %c129_168] : memref<32x512xf32, #tpu.memory_space<vmem>>, vector<32x256xf32>
    %cst_169 = arith.constant 0.000000e+00 : f32
    %189 = vector.shape_cast %20 : vector<1x256xi1> to vector<1x256xi1>
    %190 = vector.broadcast %189 : vector<1x256xi1> to vector<32x256xi1>
    %191 = vector.broadcast %cst_169 : f32 to vector<32x256xf32>
    %192 = arith.select %190, %188, %191 : vector<32x256xi1>, vector<32x256xf32>
    %c160_170 = arith.constant 160 : index
    %c0_171 = arith.constant 0 : index
    %193 = vector.load %arg14[%c160_170, %c0_171] : memref<288x256xf32, #tpu.memory_space<vmem>>, vector<32x256xf32>
    tpu.vector_store %arg14[%c160_170, %c0_171], %192 {strides = array<i32>} : memref<288x256xf32, #tpu.memory_space<vmem>>, vector<32x256xf32>,
    %c0_172 = arith.constant 0 : index
    %c143_173 = arith.constant 143 : index
    %194 = vector.load %arg13[%c0_172, %c143_173] : memref<32x512xf32, #tpu.memory_space<vmem>>, vector<32x256xf32>
    %cst_174 = arith.constant 0.000000e+00 : f32
    %195 = vector.shape_cast %18 : vector<1x256xi1> to vector<1x256xi1>
    %196 = vector.broadcast %195 : vector<1x256xi1> to vector<32x256xi1>
    %197 = vector.broadcast %cst_174 : f32 to vector<32x256xf32>
    %198 = arith.select %196, %194, %197 : vector<32x256xi1>, vector<32x256xf32>
    %c192_175 = arith.constant 192 : index
    %c0_176 = arith.constant 0 : index
    %199 = vector.load %arg14[%c192_175, %c0_176] : memref<288x256xf32, #tpu.memory_space<vmem>>, vector<32x256xf32>
    tpu.vector_store %arg14[%c192_175, %c0_176], %198 {strides = array<i32>} : memref<288x256xf32, #tpu.memory_space<vmem>>, vector<32x256xf32>,
    %c0_177 = arith.constant 0 : index
    %c144_178 = arith.constant 144 : index
    %200 = vector.load %arg13[%c0_177, %c144_178] : memref<32x512xf32, #tpu.memory_space<vmem>>, vector<32x256xf32>
    %c224_179 = arith.constant 224 : index
    %c0_180 = arith.constant 0 : index
    %201 = vector.load %arg14[%c224_179, %c0_180] : memref<288x256xf32, #tpu.memory_space<vmem>>, vector<32x256xf32>
    tpu.vector_store %arg14[%c224_179, %c0_180], %200 {strides = array<i32>} : memref<288x256xf32, #tpu.memory_space<vmem>>, vector<32x256xf32>,
    %c0_181 = arith.constant 0 : index
    %c145_182 = arith.constant 145 : index
    %202 = vector.load %arg13[%c0_181, %c145_182] : memref<32x512xf32, #tpu.memory_space<vmem>>, vector<32x256xf32>
    %cst_183 = arith.constant 0.000000e+00 : f32
    %203 = vector.shape_cast %20 : vector<1x256xi1> to vector<1x256xi1>
    %204 = vector.broadcast %203 : vector<1x256xi1> to vector<32x256xi1>
    %205 = vector.broadcast %cst_183 : f32 to vector<32x256xf32>
    %206 = arith.select %204, %202, %205 : vector<32x256xi1>, vector<32x256xf32>
    %c256_184 = arith.constant 256 : index
    %c0_185 = arith.constant 0 : index
    %207 = vector.load %arg14[%c256_184, %c0_185] : memref<288x256xf32, #tpu.memory_space<vmem>>, vector<32x256xf32>
    tpu.vector_store %arg14[%c256_184, %c0_185], %206 {strides = array<i32>} : memref<288x256xf32, #tpu.memory_space<vmem>>, vector<32x256xf32>,
    %c0_186 = arith.constant 0 : index
    %c0_187 = arith.constant 0 : index
    %208 = vector.load %arg8[%c0_186, %c0_187] : memref<16x288xf32, #tpu.memory_space<vmem>>, vector<16x288xf32>
    %c0_188 = arith.constant 0 : index
    %c0_189 = arith.constant 0 : index
    %209 = vector.load %arg14[%c0_188, %c0_189] : memref<288x256xf32, #tpu.memory_space<vmem>>, vector<288x256xf32>
    %cst_190 = arith.constant dense<0.000000e+00> : vector<16x256xf32>
    %210 = tpu.matmul %208, %209, %cst_190 {dimension_numbers = #tpu.dot_dimension_numbers<[1], [0], [0], [1], [0, 0, 1, 1], [], []>} : vector<16x288xf32>, vector<288x256xf32>, vector<16x256xf32> -> vector<16x256xf32>
    %c0_191 = arith.constant 0 : index
    %c0_192 = arith.constant 0 : index
    %211 = vector.load %arg9[%c0_191, %c0_192] : memref<16x1xf32, #tpu.memory_space<vmem>>, vector<16x1xf32>
    %212 = vector.broadcast %211 : vector<16x1xf32> to vector<16x256xf32>
    %213 = arith.addf %210, %212 : vector<16x256xf32>
    %c0_193 = arith.constant 0 : index
    %c128_194 = arith.constant 128 : index
    %214 = vector.load %arg13[%c0_193, %c128_194] : memref<32x512xf32, #tpu.memory_space<vmem>>, vector<16x256xf32>
    tpu.vector_store %arg13[%c0_193, %c128_194], %213 {strides = array<i32>} : memref<32x512xf32, #tpu.memory_space<vmem>>, vector<16x256xf32>,
    %c0_195 = arith.constant 0 : index
    %c111_196 = arith.constant 111 : index
    %215 = vector.load %arg13[%c0_195, %c111_196] : memref<32x512xf32, #tpu.memory_space<vmem>>, vector<16x256xf32>
    %cst_197 = arith.constant 0.000000e+00 : f32
    %216 = vector.shape_cast %18 : vector<1x256xi1> to vector<1x256xi1>
    %217 = vector.broadcast %216 : vector<1x256xi1> to vector<16x256xi1>
    %218 = vector.broadcast %cst_197 : f32 to vector<16x256xf32>
    %219 = arith.select %217, %215, %218 : vector<16x256xi1>, vector<16x256xf32>
    %c0_198 = arith.constant 0 : index
    %c0_199 = arith.constant 0 : index
    %220 = vector.load %arg14[%c0_198, %c0_199] : memref<288x256xf32, #tpu.memory_space<vmem>>, vector<16x256xf32>
    tpu.vector_store %arg14[%c0_198, %c0_199], %219 {strides = array<i32>} : memref<288x256xf32, #tpu.memory_space<vmem>>, vector<16x256xf32>,
    %c0_200 = arith.constant 0 : index
    %c112_201 = arith.constant 112 : index
    %221 = vector.load %arg13[%c0_200, %c112_201] : memref<32x512xf32, #tpu.memory_space<vmem>>, vector<16x256xf32>
    %c16 = arith.constant 16 : index
    %c0_202 = arith.constant 0 : index
    %222 = vector.load %arg14[%c16, %c0_202] : memref<288x256xf32, #tpu.memory_space<vmem>>, vector<16x256xf32>
    tpu.vector_store %arg14[%c16, %c0_202], %221 {strides = array<i32>} : memref<288x256xf32, #tpu.memory_space<vmem>>, vector<16x256xf32>,
    %c0_203 = arith.constant 0 : index
    %c113_204 = arith.constant 113 : index
    %223 = vector.load %arg13[%c0_203, %c113_204] : memref<32x512xf32, #tpu.memory_space<vmem>>, vector<16x256xf32>
    %cst_205 = arith.constant 0.000000e+00 : f32
    %224 = vector.shape_cast %20 : vector<1x256xi1> to vector<1x256xi1>
    %225 = vector.broadcast %224 : vector<1x256xi1> to vector<16x256xi1>
    %226 = vector.broadcast %cst_205 : f32 to vector<16x256xf32>
    %227 = arith.select %225, %223, %226 : vector<16x256xi1>, vector<16x256xf32>
    %c32_206 = arith.constant 32 : index
    %c0_207 = arith.constant 0 : index
    %228 = vector.load %arg14[%c32_206, %c0_207] : memref<288x256xf32, #tpu.memory_space<vmem>>, vector<16x256xf32>
    tpu.vector_store %arg14[%c32_206, %c0_207], %227 {strides = array<i32>} : memref<288x256xf32, #tpu.memory_space<vmem>>, vector<16x256xf32>,
    %c0_208 = arith.constant 0 : index
    %c127_209 = arith.constant 127 : index
    %229 = vector.load %arg13[%c0_208, %c127_209] : memref<32x512xf32, #tpu.memory_space<vmem>>, vector<16x256xf32>
    %cst_210 = arith.constant 0.000000e+00 : f32
    %230 = vector.shape_cast %18 : vector<1x256xi1> to vector<1x256xi1>
    %231 = vector.broadcast %230 : vector<1x256xi1> to vector<16x256xi1>
    %232 = vector.broadcast %cst_210 : f32 to vector<16x256xf32>
    %233 = arith.select %231, %229, %232 : vector<16x256xi1>, vector<16x256xf32>
    %c48 = arith.constant 48 : index
    %c0_211 = arith.constant 0 : index
    %234 = vector.load %arg14[%c48, %c0_211] : memref<288x256xf32, #tpu.memory_space<vmem>>, vector<16x256xf32>
    tpu.vector_store %arg14[%c48, %c0_211], %233 {strides = array<i32>} : memref<288x256xf32, #tpu.memory_space<vmem>>, vector<16x256xf32>,
    %c0_212 = arith.constant 0 : index
    %c128_213 = arith.constant 128 : index
    %235 = vector.load %arg13[%c0_212, %c128_213] : memref<32x512xf32, #tpu.memory_space<vmem>>, vector<16x256xf32>
    %c64_214 = arith.constant 64 : index
    %c0_215 = arith.constant 0 : index
    %236 = vector.load %arg14[%c64_214, %c0_215] : memref<288x256xf32, #tpu.memory_space<vmem>>, vector<16x256xf32>
    tpu.vector_store %arg14[%c64_214, %c0_215], %235 {strides = array<i32>} : memref<288x256xf32, #tpu.memory_space<vmem>>, vector<16x256xf32>,
    %c0_216 = arith.constant 0 : index
    %c129_217 = arith.constant 129 : index
    %237 = vector.load %arg13[%c0_216, %c129_217] : memref<32x512xf32, #tpu.memory_space<vmem>>, vector<16x256xf32>
    %cst_218 = arith.constant 0.000000e+00 : f32
    %238 = vector.shape_cast %20 : vector<1x256xi1> to vector<1x256xi1>
    %239 = vector.broadcast %238 : vector<1x256xi1> to vector<16x256xi1>
    %240 = vector.broadcast %cst_218 : f32 to vector<16x256xf32>
    %241 = arith.select %239, %237, %240 : vector<16x256xi1>, vector<16x256xf32>
    %c80 = arith.constant 80 : index
    %c0_219 = arith.constant 0 : index
    %242 = vector.load %arg14[%c80, %c0_219] : memref<288x256xf32, #tpu.memory_space<vmem>>, vector<16x256xf32>
    tpu.vector_store %arg14[%c80, %c0_219], %241 {strides = array<i32>} : memref<288x256xf32, #tpu.memory_space<vmem>>, vector<16x256xf32>,
    %c0_220 = arith.constant 0 : index
    %c143_221 = arith.constant 143 : index
    %243 = vector.load %arg13[%c0_220, %c143_221] : memref<32x512xf32, #tpu.memory_space<vmem>>, vector<16x256xf32>
    %cst_222 = arith.constant 0.000000e+00 : f32
    %244 = vector.shape_cast %18 : vector<1x256xi1> to vector<1x256xi1>
    %245 = vector.broadcast %244 : vector<1x256xi1> to vector<16x256xi1>
    %246 = vector.broadcast %cst_222 : f32 to vector<16x256xf32>
    %247 = arith.select %245, %243, %246 : vector<16x256xi1>, vector<16x256xf32>
    %c96_223 = arith.constant 96 : index
    %c0_224 = arith.constant 0 : index
    %248 = vector.load %arg14[%c96_223, %c0_224] : memref<288x256xf32, #tpu.memory_space<vmem>>, vector<16x256xf32>
    tpu.vector_store %arg14[%c96_223, %c0_224], %247 {strides = array<i32>} : memref<288x256xf32, #tpu.memory_space<vmem>>, vector<16x256xf32>,
    %c0_225 = arith.constant 0 : index
    %c144_226 = arith.constant 144 : index
    %249 = vector.load %arg13[%c0_225, %c144_226] : memref<32x512xf32, #tpu.memory_space<vmem>>, vector<16x256xf32>
    %c112_227 = arith.constant 112 : index
    %c0_228 = arith.constant 0 : index
    %250 = vector.load %arg14[%c112_227, %c0_228] : memref<288x256xf32, #tpu.memory_space<vmem>>, vector<16x256xf32>
    tpu.vector_store %arg14[%c112_227, %c0_228], %249 {strides = array<i32>} : memref<288x256xf32, #tpu.memory_space<vmem>>, vector<16x256xf32>,
    %c0_229 = arith.constant 0 : index
    %c145_230 = arith.constant 145 : index
    %251 = vector.load %arg13[%c0_229, %c145_230] : memref<32x512xf32, #tpu.memory_space<vmem>>, vector<16x256xf32>
    %cst_231 = arith.constant 0.000000e+00 : f32
    %252 = vector.shape_cast %20 : vector<1x256xi1> to vector<1x256xi1>
    %253 = vector.broadcast %252 : vector<1x256xi1> to vector<16x256xi1>
    %254 = vector.broadcast %cst_231 : f32 to vector<16x256xf32>
    %255 = arith.select %253, %251, %254 : vector<16x256xi1>, vector<16x256xf32>
    %c128_232 = arith.constant 128 : index
    %c0_233 = arith.constant 0 : index
    %256 = vector.load %arg14[%c128_232, %c0_233] : memref<288x256xf32, #tpu.memory_space<vmem>>, vector<16x256xf32>
    tpu.vector_store %arg14[%c128_232, %c0_233], %255 {strides = array<i32>} : memref<288x256xf32, #tpu.memory_space<vmem>>, vector<16x256xf32>,
    %c0_234 = arith.constant 0 : index
    %c0_235 = arith.constant 0 : index
    %257 = vector.load %arg10[%c0_234, %c0_235] : memref<16x144xf32, #tpu.memory_space<vmem>>, vector<16x144xf32>
    %c0_236 = arith.constant 0 : index
    %c0_237 = arith.constant 0 : index
    %258 = vector.load %arg14[%c0_236, %c0_237] : memref<288x256xf32, #tpu.memory_space<vmem>>, vector<144x256xf32>
    %cst_238 = arith.constant dense<0.000000e+00> : vector<16x256xf32>
    %259 = tpu.matmul %257, %258, %cst_238 {dimension_numbers = #tpu.dot_dimension_numbers<[1], [0], [0], [1], [0, 0, 1, 1], [], []>} : vector<16x144xf32>, vector<144x256xf32>, vector<16x256xf32> -> vector<16x256xf32>
    %c0_239 = arith.constant 0 : index
    %c0_240 = arith.constant 0 : index
    %260 = vector.load %arg11[%c0_239, %c0_240] : memref<16x1xf32, #tpu.memory_space<vmem>>, vector<16x1xf32>
    %261 = vector.broadcast %260 : vector<16x1xf32> to vector<16x256xf32>
    %262 = arith.addf %259, %261 : vector<16x256xf32>
    %c0_241 = arith.constant 0 : index
    %c0_242 = arith.constant 0 : index
    %c0_243 = arith.constant 0 : index
    %263 = vector.load %arg12[%c0_241, %c0_242, %c0_243] : memref<1x16x256xf32, #tpu.memory_space<vmem>>, vector<1x16x256xf32>
    %264 = vector.shape_cast %263 : vector<1x16x256xf32> to vector<16x256xf32>
    %265 = vector.shape_cast %262 : vector<16x256xf32> to vector<1x16x256xf32>
    tpu.vector_store %arg12[%c0_241, %c0_242, %c0_243], %265 {strides = array<i32>} : memref<1x16x256xf32, #tpu.memory_space<vmem>>, vector<1x16x256xf32>,
    return
  }
  func.func @transform_0(%arg0: i32) -> (i32, i32, i32) {
    %c0_i32 = arith.constant 0 : i32
    %c0_i32_0 = arith.constant 0 : i32
    %c0_i32_1 = arith.constant 0 : i32
    return %arg0, %c0_i32, %c0_i32_0 : i32, i32, i32
  }
  func.func @transform_1(%arg0: i32) -> (i32, i32) {
    %c0_i32 = arith.constant 0 : i32
    %c0_i32_0 = arith.constant 0 : i32
    %c0_i32_1 = arith.constant 0 : i32
    return %c0_i32, %c0_i32_0 : i32, i32
  }
  func.func @transform_2(%arg0: i32) -> (i32, i32) {
    %c0_i32 = arith.constant 0 : i32
    %c0_i32_0 = arith.constant 0 : i32
    %c0_i32_1 = arith.constant 0 : i32
    return %c0_i32, %c0_i32_0 : i32, i32
  }
  func.func @transform_3(%arg0: i32) -> (i32, i32) {
    %c0_i32 = arith.constant 0 : i32
    %c0_i32_0 = arith.constant 0 : i32
    %c0_i32_1 = arith.constant 0 : i32
    return %c0_i32, %c0_i32_0 : i32, i32
  }
  func.func @transform_4(%arg0: i32) -> (i32, i32) {
    %c0_i32 = arith.constant 0 : i32
    %c0_i32_0 = arith.constant 0 : i32
    %c0_i32_1 = arith.constant 0 : i32
    return %c0_i32, %c0_i32_0 : i32, i32
  }
  func.func @transform_5(%arg0: i32) -> (i32, i32) {
    %c0_i32 = arith.constant 0 : i32
    %c0_i32_0 = arith.constant 0 : i32
    %c0_i32_1 = arith.constant 0 : i32
    return %c0_i32, %c0_i32_0 : i32, i32
  }
  func.func @transform_6(%arg0: i32) -> (i32, i32) {
    %c0_i32 = arith.constant 0 : i32
    %c0_i32_0 = arith.constant 0 : i32
    %c0_i32_1 = arith.constant 0 : i32
    return %c0_i32, %c0_i32_0 : i32, i32
  }
  func.func @transform_7(%arg0: i32) -> (i32, i32) {
    %c0_i32 = arith.constant 0 : i32
    %c0_i32_0 = arith.constant 0 : i32
    %c0_i32_1 = arith.constant 0 : i32
    return %c0_i32, %c0_i32_0 : i32, i32
  }
  func.func @transform_8(%arg0: i32) -> (i32, i32) {
    %c0_i32 = arith.constant 0 : i32
    %c0_i32_0 = arith.constant 0 : i32
    %c0_i32_1 = arith.constant 0 : i32
    return %c0_i32, %c0_i32_0 : i32, i32
  }
  func.func @transform_9(%arg0: i32) -> (i32, i32) {
    %c0_i32 = arith.constant 0 : i32
    %c0_i32_0 = arith.constant 0 : i32
    %c0_i32_1 = arith.constant 0 : i32
    return %c0_i32, %c0_i32_0 : i32, i32
  }
  func.func @transform_10(%arg0: i32) -> (i32, i32) {
    %c0_i32 = arith.constant 0 : i32
    %c0_i32_0 = arith.constant 0 : i32
    %c0_i32_1 = arith.constant 0 : i32
    return %c0_i32, %c0_i32_0 : i32, i32
  }
  func.func @transform_11(%arg0: i32) -> (i32, i32, i32) {
    %c0_i32 = arith.constant 0 : i32
    %c0_i32_0 = arith.constant 0 : i32
    %c0_i32_1 = arith.constant 0 : i32
    return %arg0, %c0_i32, %c0_i32_0 : i32, i32, i32
  }
}

</mosaic_0001>

<bundles_post_ra>
// kernel: simple_sisr_forward.1
= control target key start
LH: loop header
LB: loop body
LE: loop exit
PB: predicated region body
PF: predicated region fallthrough
CT: control target
= control target key end

     0   :  { %s4823_s17 = smov 0   ;;  %s6936_s0 = inlined_call_operand.vmem [shape: f32[2,1,256], index: 0, kind: input, shape index: {}]   ;;  %s6937_s1 = inlined_call_operand.vmem [shape: f32[32,9], index: 1, kind: input, shape index: {}]   ;;  %s6938_s2 = inlined_call_operand.vmem [shape: f32[32,1], index: 2, kind: input, shape index: {}]   ;;  %s6939_s3 = inlined_call_operand.vmem [shape: f32[32,288], index: 3, kind: input, shape index: {}]   ;;  %s6940_s4 = inlined_call_operand.vmem [shape: f32[32,1], index: 4, kind: input, shape index: {}]   ;;  %s6941_s5 = inlined_call_operand.vmem [shape: f32[32,288], index: 5, kind: input, shape index: {}]   ;;  %s6942_s6 = inlined_call_operand.vmem [shape: f32[32,1], index: 6, kind: input, shape index: {}]   ;;  %s6943_s7 = inlined_call_operand.vmem [shape: f32[16,288], index: 7, kind: input, shape index: {}]   ;;  %s6944_s8 = inlined_call_operand.vmem [shape: f32[16,1], index: 8, kind: input, shape index: {}]   ;;  %s6945_s9 = inlined_call_operand.vmem [shape: f32[16,144], index: 9, kind: input, shape index: {}]   ;;  %s6946_s10 = inlined_call_operand.vmem [shape: f32[16,1], index: 10, kind: input, shape index: {}]   ;;  %s6947_s11 = inlined_call_operand.vmem [shape: f32[2,16,256], index: 11, kind: output, shape index: {}]  }
   0x1 LB: > { %s4242_s18 = sadd.s32 4294967295, %s4750_s17   ;;  %p4246_p0 = scmp.ge.s32.totalorder %s4750_s17, 1  ;;  %s4750_s17 = sphi %s4823_s17, %s21_s17  }
   0x2   : > { %p336_p1 = scmp.lt.s32.totalorder %s4750_s17, 3 }
   0x4   : > { %p337_p2 = pnand %p4246_p0, %p336_p1 }
   0x6   : > { %340 = sbr.rel (%p337_p2) target bundleno = 2130 (0x852), region = 64 }
   0xb   : > { %p375_p3 = scmp.lt.s32.totalorder %s4242_s18, 1  ;;  %v384_v0 = vlaneseq  ;;  %v6948_v1 = vmov 0.0   ;;  %s4753_s23 = smov 111   ;;  %v763_v35 = vld [vmem:[%s6938_s2 + $0x18] sm:$0xff]  ;;  %v762_v36 = vld [vmem:[%s6938_s2 + $0x10] sm:$0xff]  ;;  %v4761_v37 = vmov 0  }
   0xc   : > { %416 = vst [vmem:[#allocation2 + $0x8] sm:$0xff] %v6948_v1  ;;  %417 = vst [vmem:[#allocation2 + $0x10] sm:$0xff] %v6948_v1  ;;  %868 = vmatprep.mubr.f32.mxu0 %v6948_v1  ;;  %s4754_s24 = smov 17   ;;  %s4755_s25 = smov 15   ;;  %4290 = vset.pattern.permute.xlu0 %v4761_v37  ;;  %v760_v38 = vld [vmem:[%s6938_s2] sm:$0xff]  ;;  %v761_v39 = vld [vmem:[%s6938_s2 + $0x8] sm:$0xff] }
   0xd   : > { %418 = vst [vmem:[#allocation2 + $0x18] sm:$0xff] %v6948_v1  ;;  %415 = vst [vmem:[#allocation2] sm:$0xff] %v6948_v1  ;;  %s6985_s18 = smov (!%p375_p3, %s4242_s18), 1  ;;  %vm4840_vm0 = vcmp.lt.s32.totalorder %v384_v0, 256  ;;  %v4850_v4 = vshrl.u32 %v384_v0, 7  ;;  %s4756_s26 = smov 1   ;;  %4291 = vset.pattern.permute.xlu1 %v4761_v37 }
   0xe   : > { %s4247_s19 = sshll.u32 %s6985_s18, 1  ;;  %s4757_s27 = smov 127   ;;  %v385_v40 = vand.u32 127, %v384_v0  ;;  %v4762_v42 = vmov 1966171168   ;;  %vm724_vm1 = vcmask 908288  }
   0xf   : > { %s378_s22 = scalar_lea.vmem %s6936_s0, %s4247_s19  ;;  %v451_v5 = vsub.s32 2, %v4850_v4  ;;  %v443_v6 = vsub.s32 0, %v4850_v4  ;;  %v447_v7 = vsub.s32 1, %v4850_v4  ;;  %s4758_s28 = smov 113   ;;  %v470_v43 = vunpack.c.l.s4 %v4762_v42  ;;  %v754_v2 = vld [vmem:[%s6937_s1 + $0x10] sm:$0xff]  ;;  %v4048_v58 = vld [vmem:[%s6945_s9] sm:$0xff] }
  0x10   : > { %v431_v3 = vld [vmem:[%s378_s22] sm:$0x3]  ;;  %s4759_s29 = smov 16   ;;  %s4760_s30 = smov 112   ;;  %v386_v41 = vadd.s32 128, %v385_v40  ;;  %v391_v44 = vand.u32 15, %v385_v40 }
  0x11   : > { %437 = vst.msk [vmem:[#allocation2 + $0x8] ss:$8 sm:$0x3] %vm4840_vm0, %v431_v3  ;;  %v471_v48 = vunpack.c.0.s8 %v470_v43  ;;  %vm459_vm4 = vcmask 138240   ;;  %vm517_vm7 = vcmask 121856   ;;  %vm565_vm8 = vcmask 7168  }
  0x12   : > { %v398_v45 = vand.u32 15, %v386_v41  ;;  %vm4912_vm2 = vcmp.le.s32.totalorder %v391_v44, 14  ;;  %vm4929_vm5 = vcmp.ge.s32.totalorder %v391_v44, 1  ;;  %vm797_vm9 = vcmask 1040384   ;;  %v4051_v59 = vld [vmem:[%s6945_s9 + $0x18] sm:$0xff]  ;;  %s4270_s13 = sshll.u32 %s6985_s18, 5 }
  0x13   : > { %v4921_v53 = vsub.s32 %v471_v48, %v4850_v4  ;;  %vm617_vm10 = vcmask 1039360   ;;  %vm665_vm11 = vcmask 924672   ;;  %vm491_vm12 = vcmask 130048   ;;  %s383_s16 = scalar_lea.vmem %s6947_s11, %s4270_s13 }
  0x14   : > { %vm4916_vm3 = vcmp.le.s32.totalorder %v398_v45, 14  ;;  %vm4933_vm6 = vcmp.ge.s32.totalorder %v398_v45, 1  ;;  %vm698_vm13 = vcmask 916480   ;;  %vm784_vm14 = vcmask 72704  }
  0x15   : > { %vm1665_vm15 = vcmask 261120  }
  0x18   : > { %v704_v8 = vld [vmem:[#allocation2 + $0x8] ss:$8 sm:$0x7] }
  0x19   : > { %v439_v9 = vld [vmem:[#allocation2] ss:$8 sm:$0x7]  ;;  %v717_v10 = vrot.slane %v704_v8, %v451_v5  ;;  %v709_v11 = vrot.slane %v704_v8, %v443_v6  ;;  %v713_v12 = vrot.slane %v704_v8, %v447_v7 }
  0x1a   : > { %v444_v13 = vrot.slane %v439_v9, %v443_v6  ;;  %v448_v14 = vrot.slane %v439_v9, %v447_v7  ;;  %v452_v15 = vrot.slane %v439_v9, %v451_v5  ;;  %v497_v16 = vld [vmem:[#allocation2] ss:$8 sm:$0x7] }
  0x1b   : > { %722 = vrot.lane.b32.xlu1 %v717_v10, %s4753_s23  ;;  %718 = vrot.lane.b32.xlu0 %v709_v11, %s4753_s23  ;;  %v502_v17 = vrot.slane %v497_v16, %v443_v6  ;;  %v506_v18 = vrot.slane %v497_v16, %v447_v7  ;;  %v545_v19 = vld [vmem:[#allocation2] ss:$8 sm:$0x7]  ;;  %v510_v20 = vrot.slane %v497_v16, %v451_v5 }
  0x1c   : > { %v550_v21 = vrot.slane %v545_v19, %v443_v6  ;;  %v554_v22 = vrot.slane %v545_v19, %v447_v7  ;;  %v558_v23 = vrot.slane %v545_v19, %v451_v5  ;;  %v597_v24 = vld [vmem:[#allocation2 + $0x8] ss:$8 sm:$0x7] }
  0x1d   : > { %v602_v25 = vrot.slane %v597_v24, %v443_v6  ;;  %v606_v26 = vrot.slane %v597_v24, %v447_v7  ;;  %v645_v27 = vld [vmem:[#allocation2 + $0x8] ss:$8 sm:$0x7]  ;;  %v610_v28 = vrot.slane %v597_v24, %v451_v5 }
  0x1e   : > { %v650_v29 = vrot.slane %v645_v27, %v443_v6  ;;  %v593_v30 = vld [vmem:[#allocation2 + $0x8] ss:$8 sm:$0x3]  ;;  %v654_v31 = vrot.slane %v645_v27, %v447_v7  ;;  %v658_v32 = vrot.slane %v645_v27, %v451_v5 }
  0x1f   : > { %720 = vrot.lane.b32.xlu0 %v713_v12, %s4753_s23  ;;  %453 = vrot.lane.b32.xlu1 %v444_v13, %s4754_s24  ;;  %595 = vst.msk [vmem:[#allocation3 + $0x4] ss:$8 sm:$0x3] %vm4840_vm0, %v593_v30  ;;  %v486_v33 = vld [vmem:[#allocation2] ss:$8 sm:$0x7] }
  0x20   : > { %v693_v34 = vld [vmem:[#allocation2 + $0x8] ss:$8 sm:$0x7] }
  0x23   : > { %455 = vrot.lane.b32.xlu0 %v448_v14, %s4754_s24  ;;  %457 = vrot.lane.b32.xlu1 %v452_v15, %s4754_s24 }
  0x27   : > { %511 = vrot.lane.b32.xlu0 %v502_v17, %s4755_s25  ;;  %513 = vrot.lane.b32.xlu1 %v506_v18, %s4755_s25 }
  0x2b   : > { %515 = vrot.lane.b32.xlu0 %v510_v20, %s4755_s25  ;;  %559 = vrot.lane.b32.xlu1 %v550_v21, %s4756_s26 }
  0x2f   : > { %561 = vrot.lane.b32.xlu0 %v554_v22, %s4756_s26  ;;  %563 = vrot.lane.b32.xlu1 %v558_v23, %s4756_s26 }
  0x33   : > { %611 = vrot.lane.b32.xlu0 %v602_v25, %s4757_s27  ;;  %613 = vrot.lane.b32.xlu1 %v606_v26, %s4757_s27 }
  0x37   : > { %615 = vrot.lane.b32.xlu0 %v610_v28, %s4757_s27  ;;  %659 = vrot.lane.b32.xlu1 %v650_v29, %s4758_s28 }
  0x3b   : > { %661 = vrot.lane.b32.xlu0 %v654_v31, %s4758_s28  ;;  %663 = vrot.lane.b32.xlu1 %v658_v32, %s4758_s28 }
  0x3f   : > { %488 = vrot.lane.b32.xlu0 %v486_v33, %s4759_s29  ;;  %695 = vrot.lane.b32.xlu1 %v693_v34, %s4760_s30 }
  0x43   : > { %781 = vperm.xlu0 %4290, %v763_v35   ;;  %776 = vperm.xlu1 %4291, %v762_v36  }
  0x47   : > { %766 = vperm.xlu0 %4290, %v760_v38   ;;  %771 = vperm.xlu1 %4291, %v761_v39  }
  0x4b   : > { %4293 = vrot.lane.b32.xlu1 %v6948_v1, %s4756_s26  ;;  %4298 = vrot.lane.b32.xlu0 %v6948_v1, %s4756_s26 }
  0x4f   : > { %4303 = vrot.lane.b32.xlu1 %v6948_v1, %s4755_s25  ;;  %4308 = vrot.lane.b32.xlu0 %v6948_v1, %s4755_s25 }
  0x53   : > { %4313 = vrot.lane.b32.xlu1 %v6948_v1, %s4759_s29  ;;  %4318 = vrot.lane.b32.xlu0 %v6948_v1, %s4759_s29 }
  0x57   : > { %4323 = vrot.lane.b32.xlu1 %v6948_v1, %s4754_s24  ;;  %4328 = vrot.lane.b32.xlu0 %v6948_v1, %s4754_s24 }
  0x5b   : > { %4338 = vrot.lane.b32.xlu1 %v6948_v1, %s4760_s30  ;;  %4333 = vrot.lane.b32.xlu0 %v6948_v1, %s4760_s30 }
  0x5f   : > { %4343 = vrot.lane.b32.xlu1 %v6948_v1, %s4758_s28 }
  0x8d   : > { %v723_v46 = vpop.permute.xlu1 %722  ;;  %v719_v47 = vpop.permute.xlu0 %718 }
  0x91   : > { %v721_v51 = vpop.permute.xlu0 %720  ;;  %v454_v52 = vpop.permute.xlu1 %453 }
  0x92   : > { %v725_v54 = vsel %vm724_vm1, %v719_v47, %v721_v51  ;;  %v726_v55 = vsel %vm724_vm1, %v721_v51, %v723_v46 }
  0x93   : > { %v729_v56 = vsel %vm4912_vm2, %v725_v54, 0.0  ;;  %v730_v57 = vsel %vm4916_vm3, %v726_v55, 0.0 }
  0x94   : > { %v733_v60 = vcombine.low %v729_v56, %v730_v57 }
  0x95   : > { %v456_v61 = vpop.permute.xlu0 %455  ;;  %v458_v62 = vpop.permute.xlu1 %457 }
  0x96   : > { %v740_v63 = vrot.slane %v733_v60, %v4921_v53  ;;  %v460_v0 = vsel %vm459_vm4, %v454_v52, %v456_v61  ;;  %v461_v3 = vsel %vm459_vm4, %v456_v61, %v458_v62 }
  0x97   : > { %v464_v4 = vsel %vm4929_vm5, %v460_v0, 0.0  ;;  %v465_v5 = vsel %vm4933_vm6, %v461_v3, 0.0  ;;  %v752_v3 = vld [vmem:[%s6937_s1] sm:$0xff] }
  0x98   : > { %v747_v6 = vrot.slane %v740_v63, %v4921_v53  ;;  %v468_v7 = vcombine.low %v464_v4, %v465_v5  ;;  %v755_v4 = vld [vmem:[%s6937_s1 + $0x18] sm:$0xff] }
  0x99   : > { %v512_v8 = vpop.permute.xlu0 %511  ;;  %v514_v9 = vpop.permute.xlu1 %513 }
  0x9a   : > { %750 = vst.msk [vmem:[#allocation3 + $0x10] ss:$8 sm:$0x3] %vm4840_vm0, %v747_v6  ;;  %v475_v10 = vrot.slane %v468_v7, %v4921_v53  ;;  %v518_v12 = vsel %vm517_vm7, %v512_v8, %v514_v9 }
  0x9b   : > { %v522_v16 = vsel %vm4912_vm2, %v518_v12, 0.0 }
  0x9c   : > { %v482_v11 = vrot.slane %v475_v10, %v4921_v53 }
  0x9d   : > { %v516_v13 = vpop.permute.xlu0 %515  ;;  %v560_v14 = vpop.permute.xlu1 %559 }
  0x9e   : > { %484 = vst.msk [vmem:[#allocation3] ss:$8 sm:$0x3] %vm4840_vm0, %v482_v11  ;;  %v519_v15 = vsel %vm517_vm7, %v514_v9, %v516_v13 }
  0x9f   : > { %v523_v17 = vsel %vm4916_vm3, %v519_v15, 0.0 }
  0xa0   : > { %v526_v18 = vcombine.low %v522_v16, %v523_v17 }
  0xa1   : > { %v562_v19 = vpop.permute.xlu0 %561  ;;  %v564_v20 = vpop.permute.xlu1 %563  ;;  %v759_v21 = vld [vmem:[#allocation3 + $0x18] sm:$0x1]  ;;  %v758_v22 = vld [vmem:[#allocation3 + $0x10] sm:$0x1] }
  0xa2   : > { %v533_v23 = vrot.slane %v526_v18, %v4921_v53  ;;  %v566_v24 = vsel %vm565_vm8, %v560_v14, %v562_v19  ;;  %v567_v25 = vsel %vm565_vm8, %v562_v19, %v564_v20  ;;  %4250 = vmatprep.subr.msk.mxu0 %vm797_vm9, %v759_v21 }
  0xa3   : > { %v570_v26 = vsel %vm4929_vm5, %v566_v24, 0.0  ;;  %v571_v27 = vsel %vm4933_vm6, %v567_v25, 0.0  ;;  %4251 = vmatpush1.msk.msra.mxu0 %vm797_vm9, %v758_v22 }
  0xa4   : > { %v540_v28 = vrot.slane %v533_v23, %v4921_v53  ;;  %v574_v29 = vcombine.low %v570_v26, %v571_v27 }
  0xa5   : > { %v612_v30 = vpop.permute.xlu0 %611  ;;  %v614_v31 = vpop.permute.xlu1 %613 }
  0xa6   : > { %543 = vst.msk [vmem:[#allocation3 + $0x2] ss:$8 sm:$0x3] %vm4840_vm0, %v540_v28  ;;  %v581_v32 = vrot.slane %v574_v29, %v4921_v53  ;;  %v618_v34 = vsel %vm617_vm10, %v612_v30, %v614_v31 }
  0xa7   : > { %v622_v38 = vsel %vm4912_vm2, %v618_v34, 0.0 }
  0xa8   : > { %v588_v33 = vrot.slane %v581_v32, %v4921_v53 }
  0xa9   : > { %v616_v35 = vpop.permute.xlu0 %615  ;;  %v660_v36 = vpop.permute.xlu1 %659 }
  0xaa   : > { %591 = vst.msk [vmem:[#allocation3 + $0x3] ss:$8 sm:$0x3] %vm4840_vm0, %v588_v33  ;;  %v619_v37 = vsel %vm617_vm10, %v614_v31, %v616_v35 }
  0xab   : > { %v623_v39 = vsel %vm4916_vm3, %v619_v37, 0.0 }
  0xac   : > { %v626_v40 = vcombine.low %v622_v38, %v623_v39 }
  0xad   : > { %v662_v41 = vpop.permute.xlu0 %661  ;;  %v664_v42 = vpop.permute.xlu1 %663 }
  0xae   : > { %v633_v43 = vrot.slane %v626_v40, %v4921_v53  ;;  %v666_v44 = vsel %vm665_vm11, %v660_v36, %v662_v41  ;;  %v667_v45 = vsel %vm665_vm11, %v662_v41, %v664_v42  ;;  %v1558_v42 = vld [vmem:[%s6939_s3 + $0x8] sm:$0xff] }
  0xaf   : > { %v670_v46 = vsel %vm4929_vm5, %v666_v44, 0.0  ;;  %v671_v47 = vsel %vm4933_vm6, %v667_v45, 0.0  ;;  %1742 = vmatprep.mubr.f32.mxu1 %v1558_v42 }
  0xb0   : > { %v640_v48 = vrot.slane %v633_v43, %v4921_v53  ;;  %v674_v51 = vcombine.low %v670_v46, %v671_v47  ;;  %v1644_v47 = vld [vmem:[%s6940_s4 + $0x18] sm:$0xff] }
  0xb1   : > { %v489_v52 = vpop.permute.xlu0 %488  ;;  %v696_v54 = vpop.permute.xlu1 %695 }
  0xb2   : > { %643 = vst.msk [vmem:[#allocation3 + $0x5] ss:$8 sm:$0x3] %vm4840_vm0, %v640_v48  ;;  %v681_v55 = vrot.slane %v674_v51, %v4921_v53  ;;  %v490_v56 = vrot.slane %v489_v52, 1  ;;  %v697_v57 = vrot.slane %v696_v54, 1 }
  0xb4   : > { %v688_v60 = vrot.slane %v681_v55, %v4921_v53  ;;  %v492_v61 = vsel %vm491_vm12, %v489_v52, %v490_v56  ;;  %v699_v62 = vsel %vm698_vm13, %v696_v54, %v697_v57  ;;  %v753_v53 = vld [vmem:[%s6937_s1 + $0x8] sm:$0xff]  ;;  %v1643_v54 = vld [vmem:[%s6940_s4 + $0x10] sm:$0xff]  ;;  %v1641_v57 = vld [vmem:[%s6940_s4] sm:$0xff] }
  0xb5   : > { %495 = vst.msk [vmem:[#allocation3 + $0x1] ss:$8 sm:$0x3] %vm4840_vm0, %v492_v61  ;;  %702 = vst.msk [vmem:[#allocation3 + $0x7] ss:$8 sm:$0x3] %vm4840_vm0, %v699_v62 }
  0xb6   : > { %691 = vst.msk [vmem:[#allocation3 + $0x6] ss:$8 sm:$0x3] %vm4840_vm0, %v688_v60  ;;  %v1642_v52 = vld [vmem:[%s6940_s4 + $0x8] sm:$0xff] }
  0xbd   : > { %v757_v63 = vld [vmem:[#allocation3 + $0x8] sm:$0xff]  ;;  %v756_v0 = vld [vmem:[#allocation3] sm:$0xff] }
  0xbe   : > { %834 = vmatprep.subr.mxu0 %v757_v63  ;;  %v782_v5 = vpop.permute.xlu0 %781  ;;  %v777_v6 = vpop.permute.xlu1 %776 }
  0xbf   : > { %835 = vmatpush1.msra.mxu0 %v756_v0 }
  0xc0   : > { %4252 = vmatmul.mubr.msk.f32.vlgmr.msra.gmra.mxu0 %vm784_vm14, %v752_v3 }
  0xc1   : > { %874 = vmatprep.mubr.f32.mxu0 %v6948_v1 }
  0xc2   : > { %v767_v7 = vpop.permute.xlu0 %766  ;;  %v772_v11 = vpop.permute.xlu1 %771 }
  0xc4   : > { %4253 = vmatmul.mubr.msk.f32.gmra.mxu0 %vm784_vm14, %v753_v53 }
  0xc5   : > { %880 = vmatprep.mubr.f32.mxu0 %v6948_v1 }
  0xc6   : > { %v5117_v25 = vpop.permute.xlu1 %4293  ;;  %v5127_v26 = vpop.permute.xlu0 %4298 }
  0xc8   : > { %4254 = vmatmul.mubr.msk.f32.gmra.mxu0 %vm784_vm14, %v754_v2 }
  0xc9   : > { %886 = vmatprep.mubr.f32.mxu0 %v6948_v1 }
  0xca   : > { %v5129_v27 = vpop.permute.xlu1 %4303  ;;  %v5135_v28 = vpop.permute.xlu0 %4308 }
  0xcc   : > { %4255 = vmatmul.mubr.msk.f32.gmra.mxu0 %vm784_vm14, %v755_v4 }
  0xcd   : > { %1831 = vmatprep.mubr.f32.mxu0 %v6948_v1 }
  0xce   : > { %v5137_v29 = vpop.permute.xlu1 %4313  ;;  %v5147_v30 = vpop.permute.xlu0 %4318 }
  0xd2   : > { %v5149_v31 = vpop.permute.xlu1 %4323  ;;  %v5155_v32 = vpop.permute.xlu0 %4328 }
  0xd6   : > { %v5157_v33 = vpop.permute.xlu1 %4338  ;;  %v5167_v34 = vpop.permute.xlu0 %4333 }
  0xda   : > { %v5169_v35 = vpop.permute.xlu1 %4343 }
 0x180   : > { %v870_v8 = vpop.f32.mrf.mxu0 }
 0x181   : > { %v5013_v9 = vadd.f32 %v870_v8, %v767_v7 }
 0x182   : > { %v872_v10 = vpop.f32.mrf.mxu0 }
 0x183   : > { %901 = vst [vmem:[#allocation2 + $0x8] sm:$0xff] %v5013_v9  ;;  %v5016_v12 = vadd.f32 %v872_v10, %v767_v7  ;;  %1429 = vrot.lane.b32.xlu0 %v5013_v9, %s4760_s30  ;;  %1175 = vrot.lane.b32.xlu1 %v5013_v9, %s4756_s26 }
 0x184   : > { %v876_v13 = vpop.f32.mrf.mxu0 }
 0x185   : > { %902 = vst [vmem:[#allocation2 + $0x10] sm:$0xff] %v5016_v12  ;;  %v5023_v14 = vadd.f32 %v876_v13, %v772_v11 }
 0x186   : > { %v878_v15 = vpop.f32.mrf.mxu0 }
 0x187   : > { %6969 = vst [vmem:[#allocation5_spill] sm:$0xff] %v5023_v14  ;;  %1177 = vrot.lane.b32.xlu0 %v5016_v12, %s4756_s26  ;;  %1095 = vrot.lane.b32.xlu1 %v5013_v9, %s4755_s25  ;;  %v5029_v16 = vadd.f32 %v878_v15, %v772_v11  ;;  %903 = vst [vmem:[#allocation2 + $0x28] sm:$0xff] %v5023_v14 }
 0x188   : > { %v882_v17 = vpop.f32.mrf.mxu0 }
 0x189   : > { %6970 = vst [vmem:[#allocation6_spill] sm:$0xff] %v5029_v16  ;;  %v5032_v18 = vadd.f32 %v882_v17, %v777_v6  ;;  %904 = vst [vmem:[#allocation2 + $0x30] sm:$0xff] %v5029_v16 }
 0x18a   : > { %v884_v19 = vpop.f32.mrf.mxu0 }
 0x18b   : > { %6971 = vst [vmem:[#allocation7_spill] sm:$0xff] %v5032_v18  ;;  %v5035_v20 = vadd.f32 %v884_v19, %v777_v6  ;;  %905 = vst [vmem:[#allocation2 + $0x48] sm:$0xff] %v5032_v18  ;;  %1097 = vrot.lane.b32.xlu0 %v5016_v12, %s4755_s25  ;;  %1019 = vrot.lane.b32.xlu1 %v5013_v9, %s4759_s29 }
 0x18c   : > { %v888_v21 = vpop.f32.mrf.mxu0 }
 0x18d   : > { %6972 = vst [vmem:[#allocation8_spill] sm:$0xff] %v5035_v20  ;;  %v5042_v22 = vadd.f32 %v888_v21, %v782_v5  ;;  %906 = vst [vmem:[#allocation2 + $0x50] sm:$0xff] %v5035_v20 }
 0x18e   : > { %v890_v23 = vpop.f32.mrf.mxu0 }
 0x18f   : > { %1243 = vst [vmem:[#allocation3 + $0x130] sm:$0xff] %v5042_v22  ;;  %v5046_v24 = vadd.f32 %v890_v23, %v782_v5  ;;  %1021 = vrot.lane.b32.xlu0 %v5016_v12, %s4759_s29  ;;  %939 = vrot.lane.b32.xlu1 %v5013_v9, %s4754_s24  ;;  %v4296_v23 = vunpack.i.h.bf16 %v5117_v25 }
 0x191   : > { %1244 = vst [vmem:[#allocation3 + $0x138] sm:$0xff] %v5046_v24 }
 0x193   : > { %941 = vrot.lane.b32.xlu0 %v5016_v12, %s4754_s24  ;;  %1431 = vrot.lane.b32.xlu1 %v5016_v12, %s4760_s30 }
 0x197   : > { %1183 = vrot.lane.b32.xlu1 %v5029_v16, %s4756_s26  ;;  %1181 = vrot.lane.b32.xlu0 %v5023_v14, %s4756_s26 }
 0x19b   : > { %1103 = vrot.lane.b32.xlu1 %v5029_v16, %s4755_s25  ;;  %1101 = vrot.lane.b32.xlu0 %v5023_v14, %s4755_s25 }
 0x19f   : > { %1027 = vrot.lane.b32.xlu1 %v5029_v16, %s4759_s29  ;;  %1025 = vrot.lane.b32.xlu0 %v5023_v14, %s4759_s29 }
 0x1a3   : > { %947 = vrot.lane.b32.xlu1 %v5029_v16, %s4754_s24  ;;  %945 = vrot.lane.b32.xlu0 %v5023_v14, %s4754_s24 }
 0x1a7   : > { %1441 = vrot.lane.b32.xlu1 %v5032_v18, %s4760_s30  ;;  %1435 = vrot.lane.b32.xlu0 %v5023_v14, %s4760_s30 }
 0x1ab   : > { %1361 = vrot.lane.b32.xlu1 %v5032_v18, %s4758_s28  ;;  %1437 = vrot.lane.b32.xlu0 %v5029_v16, %s4760_s30 }
 0x1af   : > { %1189 = vrot.lane.b32.xlu1 %v5035_v20, %s4756_s26  ;;  %1187 = vrot.lane.b32.xlu0 %v5032_v18, %s4756_s26 }
 0x1b3   : > { %1109 = vrot.lane.b32.xlu1 %v5035_v20, %s4755_s25  ;;  %1107 = vrot.lane.b32.xlu0 %v5032_v18, %s4755_s25 }
 0x1b7   : > { %1033 = vrot.lane.b32.xlu1 %v5035_v20, %s4759_s29  ;;  %1031 = vrot.lane.b32.xlu0 %v5032_v18, %s4759_s29 }
 0x1bb   : > { %953 = vrot.lane.b32.xlu1 %v5035_v20, %s4754_s24  ;;  %951 = vrot.lane.b32.xlu0 %v5032_v18, %s4754_s24 }
 0x1bf   : > { %1193 = vrot.lane.b32.xlu1 %v5042_v22, %s4756_s26  ;;  %1443 = vrot.lane.b32.xlu0 %v5035_v20, %s4760_s30 }
 0x1c3   : > { %1113 = vrot.lane.b32.xlu1 %v5042_v22, %s4755_s25  ;;  %1363 = vrot.lane.b32.xlu0 %v5035_v20, %s4758_s28 }
 0x1c7   : > { %1037 = vrot.lane.b32.xlu1 %v5042_v22, %s4759_s29  ;;  %1195 = vrot.lane.b32.xlu0 %v5046_v24, %s4756_s26 }
 0x1cb   : > { %957 = vrot.lane.b32.xlu1 %v5042_v22, %s4754_s24  ;;  %1357 = vrot.lane.b32.xlu0 %v5029_v16, %s4758_s28 }
 0x1cf   : > { %1447 = vrot.lane.b32.xlu1 %v5042_v22, %s4760_s30  ;;  %1115 = vrot.lane.b32.xlu0 %v5046_v24, %s4755_s25 }
 0x1d3   : > { %1367 = vrot.lane.b32.xlu1 %v5042_v22, %s4758_s28  ;;  %1355 = vrot.lane.b32.xlu0 %v5023_v14, %s4758_s28 }
 0x1d7   : > { %4348 = vrot.lane.b32.xlu1 %v6948_v1, %s4758_s28  ;;  %1349 = vrot.lane.b32.xlu0 %v5013_v9, %s4758_s28 }
 0x1db   : > { %1351 = vrot.lane.b32.xlu1 %v5016_v12, %s4758_s28  ;;  %1039 = vrot.lane.b32.xlu0 %v5046_v24, %s4759_s29 }
 0x1df   : > { %1287 = vrot.lane.b32.xlu1 %v5042_v22, %s4757_s27  ;;  %959 = vrot.lane.b32.xlu0 %v5046_v24, %s4754_s24 }
 0x1e3   : > { %1281 = vrot.lane.b32.xlu1 %v5032_v18, %s4757_s27  ;;  %4353 = vrot.lane.b32.xlu0 %v6948_v1, %s4757_s27 }
 0x1e7   : > { %1449 = vrot.lane.b32.xlu1 %v5046_v24, %s4760_s30  ;;  %1283 = vrot.lane.b32.xlu0 %v5035_v20, %s4757_s27 }
 0x1eb   : > { %4358 = vrot.lane.b32.xlu1 %v6948_v1, %s4757_s27  ;;  %1277 = vrot.lane.b32.xlu0 %v5029_v16, %s4757_s27 }
 0x1ef   : > { %1271 = vrot.lane.b32.xlu1 %v5016_v12, %s4757_s27  ;;  %1369 = vrot.lane.b32.xlu0 %v5046_v24, %s4758_s28 }
 0x1f3   : > { %1519 = vrot.lane.b32.xlu1 %v5042_v22, %s4753_s23  ;;  %1275 = vrot.lane.b32.xlu0 %v5023_v14, %s4757_s27  ;;  %v4295_v22 = vunpack.i.l.bf16 %v5117_v25 }
 0x1f5   : > { %v5175_v36 = vpop.permute.xlu0 %1429  ;;  %v5177_v37 = vpop.permute.xlu1 %1175 }
 0x1f7   : > { %1289 = vrot.lane.b32.xlu1 %v5046_v24, %s4757_s27  ;;  %1269 = vrot.lane.b32.xlu0 %v5013_v9, %s4757_s27 }
 0x1f9   : > { %v5183_v38 = vpop.permute.xlu0 %1177  ;;  %v5185_v39 = vpop.permute.xlu1 %1095 }
 0x1fb   : > { %1513 = vrot.lane.b32.xlu1 %v5032_v18, %s4753_s23  ;;  %4363 = vrot.lane.b32.xlu0 %v6948_v1, %s4753_s23  ;;  %v4301_v18 = vunpack.i.h.bf16 %v5127_v26 }
 0x1fd   : > { %v5191_v40 = vpop.permute.xlu0 %1097  ;;  %v5193_v41 = vpop.permute.xlu1 %1019 }
 0x1ff   : > { %1521 = vrot.lane.b32.xlu1 %v5046_v24, %s4753_s23  ;;  %1515 = vrot.lane.b32.xlu0 %v5035_v20, %s4753_s23 }
 0x201   : > { %v5202_v43 = vpop.permute.xlu0 %1021  ;;  %v5204_v44 = vpop.permute.xlu1 %939 }
 0x203   : > { %4368 = vrot.lane.b32.xlu1 %v6948_v1, %s4753_s23  ;;  %1509 = vrot.lane.b32.xlu0 %v5029_v16, %s4753_s23 }
 0x205   : > { %v5210_v45 = vpop.permute.xlu0 %941  ;;  %v5212_v46 = vpop.permute.xlu1 %1431 }
 0x207   : > { %1503 = vrot.lane.b32.xlu1 %v5016_v12, %s4753_s23  ;;  %1507 = vrot.lane.b32.xlu0 %v5023_v14, %s4753_s23 }
 0x209   : > { %v1182_v48 = vpop.permute.xlu0 %1181  ;;  %v1184_v51 = vpop.permute.xlu1 %1183 }
 0x20a   : > { %v1200_v20 = vsel %vm565_vm8, %v1182_v48, %v1184_v51  ;;  %v4305_v51 = vunpack.i.l.bf16 %v5129_v27 }
 0x20b   : > { %1662 = vperm.xlu1 %4291, %v1644_v47   ;;  %1501 = vrot.lane.b32.xlu0 %v5013_v9, %s4753_s23 }
 0x20d   : > { %v5229_v55 = vpop.permute.xlu0 %1101  ;;  %v5231_v56 = vpop.permute.xlu1 %1103 }
 0x20f   : > { %1652 = vperm.xlu1 %4291, %v1642_v52   ;;  %1657 = vperm.xlu0 %4290, %v1643_v54  }
 0x211   : > { %v5236_v60 = vpop.permute.xlu0 %1025  ;;  %v5238_v61 = vpop.permute.xlu1 %1027 }
 0x213   : > { %1647 = vperm.xlu0 %4290, %v1641_v57   ;;  %4373 = vrot.lane.b32.xlu1 %v6948_v1, %s4756_s26  ;;  %v4300_v57 = vunpack.i.l.bf16 %v5127_v26  ;;  %v1197_v26 = vsel %vm565_vm8, %v4301_v18, %v5177_v37 }
 0x215   : > { %v5242_v62 = vpop.permute.xlu0 %945  ;;  %v5244_v63 = vpop.permute.xlu1 %947  ;;  %v1199_v25 = vsel %vm565_vm8, %v4300_v57, %v1182_v48  ;;  %v4306_v48 = vunpack.i.h.bf16 %v5129_v27  ;;  %v1120_v27 = vsel %vm517_vm7, %v5229_v55, %v5231_v56 }
 0x217   : > { %4383 = vrot.lane.b32.xlu1 %v6948_v1, %s4755_s25  ;;  %4378 = vrot.lane.b32.xlu0 %v6948_v1, %s4756_s26 }
 0x219   : > { %v5250_v0 = vpop.permute.xlu0 %1435  ;;  %v5252_v3 = vpop.permute.xlu1 %1441 }
 0x21b   : > { %4393 = vrot.lane.b32.xlu1 %v6948_v1, %s4759_s29  ;;  %4388 = vrot.lane.b32.xlu0 %v6948_v1, %s4755_s25 }
 0x21d   : > { %v5258_v53 = vpop.permute.xlu0 %1437  ;;  %v5260_v2 = vpop.permute.xlu1 %1361 }
 0x21f   : > { %4403 = vrot.lane.b32.xlu1 %v6948_v1, %s4754_s24  ;;  %4398 = vrot.lane.b32.xlu0 %v6948_v1, %s4759_s29 }
 0x221   : > { %v1188_v4 = vpop.permute.xlu0 %1187  ;;  %v1190_v5 = vpop.permute.xlu1 %1189 }
 0x222   : > { %v1202_v52 = vsel %vm565_vm8, %v1188_v4, %v1190_v5  ;;  %v1198_v5 = vsel %vm565_vm8, %v5177_v37, %v5183_v38  ;;  %v4311_v37 = vunpack.i.h.bf16 %v5135_v28 }
 0x223   : > { %4418 = vrot.lane.b32.xlu1 %v6948_v1, %s4760_s30  ;;  %4408 = vrot.lane.b32.xlu0 %v6948_v1, %s4754_s24 }
 0x225   : > { %v1108_v6 = vpop.permute.xlu0 %1107  ;;  %v1110_v7 = vpop.permute.xlu1 %1109 }
 0x227   : > { %4423 = vrot.lane.b32.xlu1 %v6948_v1, %s4758_s28  ;;  %4413 = vrot.lane.b32.xlu0 %v6948_v1, %s4760_s30  ;;  %v1201_v1 = vsel %vm565_vm8, %v4296_v23, %v1188_v4  ;;  %v1122_v23 = vsel %vm517_vm7, %v1108_v6, %v1110_v7 }
 0x229   : > { %v5274_v8 = vpop.permute.xlu0 %1031  ;;  %v5276_v10 = vpop.permute.xlu1 %1033 }
 0x22d   : > { %v5278_v11 = vpop.permute.xlu0 %951  ;;  %v5280_v13 = vpop.permute.xlu1 %953 }
 0x231   : > { %v5282_v15 = vpop.permute.xlu0 %1443  ;;  %v1194_v17 = vpop.permute.xlu1 %1193 }
 0x232   : > { %v1203_v24 = vsel %vm565_vm8, %v4295_v22, %v1194_v17 }
 0x235   : > { %v5284_v19 = vpop.permute.xlu0 %1363  ;;  %v1114_v21 = vpop.permute.xlu1 %1113 }
 0x236   : > { %v1123_v4 = vsel %vm517_vm7, %v4305_v51, %v1114_v21 }
 0x239   : > { %v1196_v42 = vpop.permute.xlu0 %1195  ;;  %v1038_v47 = vpop.permute.xlu1 %1037 }
 0x23a   : > { %v1204_v54 = vsel %vm565_vm8, %v1194_v17, %v1196_v42 }
 0x23b   : > { %4576 = vmatprep.subr.msk.mxu1 %vm4933_vm6, %v1204_v54  ;;  %v4316_v54 = vunpack.i.h.bf16 %v5137_v29 }
 0x23c   : > { %4577 = vmatpush1.msk.msra.mxu1 %vm4929_vm5, %v1203_v24 }
 0x23d   : > { %v5298_v22 = vpop.permute.xlu0 %1357  ;;  %v958_v16 = vpop.permute.xlu1 %957  ;;  %4578 = vmatprep.subr.msk.mxu1 %vm4933_vm6, %v1202_v52  ;;  %v1045_v51 = vsel %vm491_vm12, %v4316_v54, %v5274_v8  ;;  %v4341_v54 = vunpack.i.h.bf16 %v5157_v33 }
 0x23e   : > { %4579 = vmatpush1.msk.msra.mxu1 %vm4929_vm5, %v1201_v1  ;;  %v4310_v1 = vunpack.i.l.bf16 %v5135_v28  ;;  %v1117_v28 = vsel %vm517_vm7, %v4311_v37, %v5185_v39  ;;  %v4336_v37 = vunpack.i.h.bf16 %v5167_v34 }
 0x23f   : > { %4580 = vmatprep.subr.msk.mxu1 %vm4933_vm6, %v1200_v20  ;;  %v1121_v20 = vsel %vm517_vm7, %v4306_v48, %v1108_v6  ;;  %v1118_v6 = vsel %vm517_vm7, %v5185_v39, %v5191_v40  ;;  %v4315_v39 = vunpack.i.l.bf16 %v5137_v29  ;;  %v1044_v29 = vsel %vm491_vm12, %v5236_v60, %v5238_v61 }
 0x240   : > { %4581 = vmatpush1.msk.msra.mxu1 %vm4929_vm5, %v1199_v25  ;;  %v1119_v7 = vsel %vm517_vm7, %v4310_v1, %v5229_v55  ;;  %v1046_v25 = vsel %vm491_vm12, %v5274_v8, %v5276_v10  ;;  %v4326_v8 = vunpack.i.h.bf16 %v5149_v31 }
 0x241   : > { %v1116_v17 = vpop.permute.xlu0 %1115  ;;  %v5316_v38 = vpop.permute.xlu1 %1447  ;;  %4582 = vmatprep.subr.msk.mxu1 %vm4933_vm6, %v1198_v5  ;;  %v1047_v57 = vsel %vm491_vm12, %v4315_v39, %v1038_v47  ;;  %v4320_v5 = vunpack.i.l.bf16 %v5147_v30  ;;  %v4345_v39 = vunpack.i.l.bf16 %v5169_v35 }
 0x242   : > { %v1124_v18 = vsel %vm517_vm7, %v1114_v21, %v1116_v17  ;;  %4583 = vmatpush1.msk.msra.mxu1 %vm4929_vm5, %v1197_v26 }
 0x243   : > { %4584 = vmatprep.subr.msk.mxu1 %vm4916_vm3, %v1124_v18  ;;  %v1043_v10 = vsel %vm491_vm12, %v4320_v5, %v5236_v60 }
 0x244   : > { %4585 = vmatpush1.msk.msra.mxu1 %vm4912_vm2, %v1123_v4  ;;  %v4325_v4 = vunpack.i.l.bf16 %v5149_v31  ;;  %v4330_v31 = vunpack.i.l.bf16 %v5155_v32 }
 0x245   : > { %v5336_v21 = vpop.permute.xlu0 %1355  ;;  %v5338_v24 = vpop.permute.xlu1 %1367  ;;  %4586 = vmatprep.subr.msk.mxu1 %vm4916_vm3, %v1122_v23  ;;  %v1042_v23 = vsel %vm491_vm12, %v5193_v41, %v5202_v43  ;;  %v965_v43 = vsel %vm459_vm4, %v4326_v8, %v5278_v11 }
 0x246   : > { %4587 = vmatpush1.msk.msra.mxu1 %vm4912_vm2, %v1121_v20  ;;  %v967_v18 = vsel %vm459_vm4, %v4325_v4, %v958_v16  ;;  %v1377_v4 = vsel %vm665_vm11, %v5260_v2, %v5284_v19 }
 0x247   : > { %4588 = vmatprep.subr.msk.mxu1 %vm4916_vm3, %v1120_v27 }
 0x248   : > { %4589 = vmatpush1.msk.msra.mxu1 %vm4912_vm2, %v1119_v7 }
 0x249   : > { %v5353_v55 = vpop.permute.xlu0 %1349  ;;  %v5355_v56 = vpop.permute.xlu1 %4348  ;;  %4590 = vmatprep.subr.msk.mxu1 %vm4916_vm3, %v1118_v6  ;;  %v4340_v6 = vunpack.i.l.bf16 %v5157_v33 }
 0x24a   : > { %4591 = vmatpush1.msk.msra.mxu1 %vm4912_vm2, %v1117_v28  ;;  %v1458_v28 = vsel %vm698_vm13, %v5282_v15, %v4336_v37  ;;  %v4350_v5 = vunpack.i.l.bf16 %v5355_v56 }
 0x24d   : > { %v1040_v40 = vpop.permute.xlu0 %1039  ;;  %v5364_v42 = vpop.permute.xlu1 %1351 }
 0x24e   : > { %v1048_v52 = vsel %vm491_vm12, %v1038_v47, %v1040_v40  ;;  %v4321_v47 = vunpack.i.h.bf16 %v5147_v30  ;;  %v966_v30 = vsel %vm459_vm4, %v5278_v11, %v5280_v13  ;;  %v963_v13 = vsel %vm459_vm4, %v4330_v31, %v5242_v62 }
 0x24f   : > { %1694 = vmatprep.subr.mxu1 %v1048_v52  ;;  %v962_v11 = vsel %vm459_vm4, %v5204_v44, %v5210_v45 }
 0x250   : > { %1695 = vmatpush1.msra.mxu1 %v1047_v57  ;;  %v1041_v61 = vsel %vm491_vm12, %v4321_v47, %v5193_v41  ;;  %v4331_v41 = vunpack.i.h.bf16 %v5155_v32  ;;  %v4335_v32 = vunpack.i.l.bf16 %v5167_v34  ;;  %v1457_v34 = vsel %vm698_vm13, %v5252_v3, %v5282_v15 }
 0x251   : > { %v960_v26 = vpop.permute.xlu0 %959  ;;  %v5375_v48 = vpop.permute.xlu1 %1287  ;;  %1696 = vmatprep.subr.mxu1 %v1046_v25  ;;  %v4346_v57 = vunpack.i.h.bf16 %v5169_v35  ;;  %v1455_v25 = vsel %vm698_vm13, %v5250_v0, %v5258_v53  ;;  %v1454_v3 = vsel %vm698_vm13, %v5212_v46, %v4341_v54  ;;  %v1453_v35 = vsel %vm698_vm13, %v5175_v36, %v5212_v46  ;;  %v1230_v54 = vld [vmem:[#allocation2 + $0x10] sm:$0xff] }
 0x252   : > { %1697 = vmatpush1.msra.mxu1 %v1045_v51  ;;  %v968_v17 = vsel %vm459_vm4, %v958_v16, %v960_v26  ;;  %v964_v16 = vsel %vm459_vm4, %v5242_v62, %v5244_v63  ;;  %v961_v63 = vsel %vm459_vm4, %v4331_v41, %v5204_v44  ;;  %v4351_v0 = vunpack.i.h.bf16 %v5355_v56 }
 0x253   : > { %1698 = vmatprep.subr.mxu1 %v1044_v29  ;;  %v1378_v15 = vsel %vm665_vm11, %v5284_v19, %v4346_v57  ;;  %v1375_v36 = vsel %vm665_vm11, %v5336_v21, %v5298_v22  ;;  %v1373_v29 = vsel %vm665_vm11, %v5353_v55, %v5364_v42 }
 0x254   : > { %1699 = vmatpush1.msra.mxu1 %v1043_v10  ;;  %v1374_v46 = vsel %vm665_vm11, %v5364_v42, %v4351_v0  ;;  %v1562_v0 = vld [vmem:[%s6939_s3 + $0x28] sm:$0xff] }
 0x255   : > { %v5395_v60 = vpop.permute.xlu0 %4353  ;;  %v5397_v1 = vpop.permute.xlu1 %1281  ;;  %1700 = vmatprep.subr.mxu1 %v1042_v23 }
 0x256   : > { %1701 = vmatpush1.msra.mxu1 %v1041_v61  ;;  %v4355_v56 = vunpack.i.l.bf16 %v5395_v60 }
 0x257   : > { %4592 = vmatprep.subr.msk.mxu1 %vm4933_vm6, %v968_v17 }
 0x258   : > { %4593 = vmatpush1.msk.msra.mxu1 %vm4929_vm5, %v967_v18 }
 0x259   : > { %v5415_v20 = vpop.permute.xlu0 %1283  ;;  %v1450_v27 = vpop.permute.xlu1 %1449  ;;  %4594 = vmatprep.subr.msk.mxu1 %vm4933_vm6, %v966_v30 }
 0x25a   : > { %4595 = vmatpush1.msk.msra.mxu1 %vm4929_vm5, %v965_v43  ;;  %v1460_v44 = vsel %vm698_vm13, %v1450_v27, %v4335_v32  ;;  %v1459_v7 = vsel %vm698_vm13, %v5316_v38, %v1450_v27  ;;  %v1456_v38 = vsel %vm698_vm13, %v5258_v53, %v4340_v6  ;;  %v1297_v23 = vsel %vm617_vm10, %v5397_v1, %v5415_v20 }
 0x25b   : > { %4596 = vmatprep.subr.msk.mxu1 %vm4933_vm6, %v964_v16 }
 0x25c   : > { %4597 = vmatpush1.msk.msra.mxu1 %vm4929_vm5, %v963_v13 }
 0x25d   : > { %v1278_v45 = vpop.permute.xlu0 %1277  ;;  %v5428_v62 = vpop.permute.xlu1 %4358  ;;  %4598 = vmatprep.subr.msk.mxu1 %vm4933_vm6, %v962_v11 }
 0x25e   : > { %4599 = vmatpush1.msk.msra.mxu1 %vm4929_vm5, %v961_v63  ;;  %v4360_v47 = vunpack.i.l.bf16 %v5428_v62  ;;  %v4361_v42 = vunpack.i.h.bf16 %v5428_v62  ;;  %v1607_v62 = vld [vmem:[#allocation3 + $0x130] sm:$0xff] }
 0x25f   : > { %1710 = vmatprep.subr.mxu1 %v1460_v44  ;;  %v1234_v44 = vld [vmem:[#allocation2 + $0x50] sm:$0xff] }
 0x260   : > { %1711 = vmatpush2.msra.mxu1 %v1459_v7  ;;  %v1296_v18 = vsel %vm617_vm10, %v1278_v45, %v4360_v47 }
 0x261   : > { %v1370_v40 = vpop.permute.xlu0 %1369  ;;  %v1272_v52 = vpop.permute.xlu1 %1271  ;;  %1712 = vmatprep.subr.mxu1 %v1458_v28  ;;  %v1233_v28 = vld [vmem:[#allocation2 + $0x48] sm:$0xff] }
 0x262   : > { %1713 = vmatpush2.msra.mxu1 %v1457_v34  ;;  %v1380_v51 = vsel %vm665_vm11, %v1370_v40, %v4345_v39  ;;  %v1379_v33 = vsel %vm665_vm11, %v5338_v24, %v1370_v40  ;;  %v1376_v24 = vsel %vm665_vm11, %v5298_v22, %v4350_v5  ;;  %v4356_v22 = vunpack.i.h.bf16 %v5395_v60  ;;  %v1232_v40 = vld [vmem:[#allocation2 + $0x30] sm:$0xff]  ;;  %v1561_v5 = vld [vmem:[%s6939_s3 + $0x20] sm:$0xff] }
 0x263   : > { %1714 = vmatprep.subr.mxu1 %v1456_v38  ;;  %v1294_v60 = vsel %vm617_vm10, %v1272_v52, %v4361_v42  ;;  %v1557_v38 = vld [vmem:[%s6939_s3] sm:$0xff] }
 0x264   : > { %1715 = vmatpush2.msra.mxu1 %v1455_v25  ;;  %v1298_v55 = vsel %vm617_vm10, %v5415_v20, %v4356_v22  ;;  %v1229_v25 = vld [vmem:[#allocation2 + $0x8] sm:$0xff] }
 0x265   : > { %v1276_v53 = vpop.permute.xlu0 %1275  ;;  %v1520_v26 = vpop.permute.xlu1 %1519  ;;  %1716 = vmatprep.subr.mxu1 %v1454_v3  ;;  %v1559_v3 = vld [vmem:[%s6939_s3 + $0x10] sm:$0xff] }
 0x266   : > { %1717 = vmatpush2.msra.mxu1 %v1453_v35  ;;  %v1564_v35 = vld [vmem:[%s6939_s3 + $0x38] sm:$0xff] }
 0x267   : > { %4600 = vmatprep.subr.msk.mxu1 %vm4933_vm6, %v1380_v51 }
 0x268   : > { %4601 = vmatpush2.msk.msra.mxu1 %vm4929_vm5, %v1379_v33  ;;  %v1560_v33 = vld [vmem:[%s6939_s3 + $0x18] sm:$0xff] }
 0x269   : > { %v1270_v2 = vpop.permute.xlu0 %1269  ;;  %v1290_v19 = vpop.permute.xlu1 %1289  ;;  %4602 = vmatprep.subr.msk.mxu1 %vm4933_vm6, %v1378_v15  ;;  %v5565_v15 = vld [vmem:[#allocation2 + $0x18] sm:$0xff] }
 0x26a   : > { %4603 = vmatpush2.msk.msra.mxu1 %vm4929_vm5, %v1377_v4  ;;  %v1300_v21 = vsel %vm617_vm10, %v1290_v19, %v4355_v56  ;;  %v1299_v10 = vsel %vm617_vm10, %v5375_v48, %v1290_v19  ;;  %v1295_v48 = vsel %vm617_vm10, %v1276_v53, %v1278_v45  ;;  %v1293_v1 = vsel %vm617_vm10, %v1270_v2, %v1272_v52  ;;  %v1608_v45 = vld [vmem:[#allocation3 + $0x138] sm:$0xff]  ;;  %v1231_v52 = vld [vmem:[#allocation2 + $0x28] sm:$0xff]  ;;  %v1563_v53 = vld [vmem:[%s6939_s3 + $0x30] sm:$0xff] }
 0x26b   : > { %4604 = vmatprep.subr.msk.mxu1 %vm4933_vm6, %v1376_v24  ;;  %v1565_v4 = vld [vmem:[%s6939_s3 + $0x40] sm:$0xff]  ;;  %v1566_v24 = vld [vmem:[%s6939_s3 + $0x48] sm:$0xff] }
 0x26c   : > { %4605 = vmatpush2.msk.msra.mxu1 %vm4929_vm5, %v1375_v36  ;;  %v1568_v36 = vld [vmem:[%s6939_s3 + $0x58] sm:$0xff] }
 0x26d   : > { %v4364_v17 = vpop.permute.xlu0 %4363  ;;  %v1514_v8 = vpop.permute.xlu1 %1513  ;;  %4606 = vmatprep.subr.msk.mxu1 %vm4933_vm6, %v1374_v46 }
 0x26e   : > { %4607 = vmatpush2.msk.msra.mxu1 %vm4929_vm5, %v1373_v29  ;;  %v4366_v61 = vunpack.i.h.bf16 %v4364_v17  ;;  %v4365_v30 = vunpack.i.l.bf16 %v4364_v17 }
 0x26f   : > { %4608 = vmatprep.subr.msk.mxu1 %vm4916_vm3, %v1300_v21 }
 0x270   : > { %4609 = vmatpush2.msk.msra.mxu1 %vm4912_vm2, %v1299_v10 }
 0x271   : > { %v1516_v31 = vpop.permute.xlu0 %1515  ;;  %v1522_v43 = vpop.permute.xlu1 %1521  ;;  %4610 = vmatprep.subr.msk.mxu1 %vm4916_vm3, %v1298_v55 }
 0x272   : > { %v1530_v16 = vsel %vm724_vm1, %v1516_v31, %v4366_v61  ;;  %v1531_v41 = vsel %vm724_vm1, %v1520_v26, %v1522_v43  ;;  %v1532_v13 = vsel %vm724_vm1, %v1522_v43, %v4365_v30  ;;  %4611 = vmatpush2.msk.msra.mxu1 %vm4912_vm2, %v1297_v23  ;;  %v1529_v11 = vsel %vm724_vm1, %v1514_v8, %v1516_v31  ;;  %v1567_v26 = vld [vmem:[%s6939_s3 + $0x50] sm:$0xff] }
 0x273   : > { %4612 = vmatprep.subr.msk.mxu1 %vm4916_vm3, %v1296_v18  ;;  %4614 = vmatprep.subr.msk.mxu0 %vm4916_vm3, %v1532_v13 }
 0x274   : > { %4613 = vmatpush2.msk.msra.mxu1 %vm4912_vm2, %v1295_v48  ;;  %4616 = vmatpush1.msk.msra.mxu0 %vm4912_vm2, %v1531_v41 }
 0x275   : > { %v1510_v20 = vpop.permute.xlu0 %1509  ;;  %v4369_v27 = vpop.permute.xlu1 %4368  ;;  %4615 = vmatprep.subr.msk.mxu1 %vm4916_vm3, %v1294_v60  ;;  %4618 = vmatprep.subr.msk.mxu0 %vm4916_vm3, %v1530_v16 }
 0x276   : > { %v4371_v63 = vunpack.i.h.bf16 %v4369_v27  ;;  %v4370_v32 = vunpack.i.l.bf16 %v4369_v27  ;;  %4617 = vmatpush2.msk.msra.mxu1 %vm4912_vm2, %v1293_v1  ;;  %4619 = vmatpush1.msk.msra.mxu0 %vm4912_vm2, %v1529_v11 }
 0x277   : > { %1734 = vmatprep.subr.mxu1 %v1608_v45 }
 0x278   : > { %v1528_v37 = vsel %vm724_vm1, %v1510_v20, %v4370_v32  ;;  %1735 = vmatpush2.msra.mxu1 %v1607_v62 }
 0x279   : > { %v1508_v7 = vpop.permute.xlu0 %1507  ;;  %v1504_v6 = vpop.permute.xlu1 %1503  ;;  %1736 = vmatprep.subr.mxu1 %v1234_v44  ;;  %4620 = vmatprep.subr.msk.mxu0 %vm4916_vm3, %v1528_v37 }
 0x27a   : > { %v1527_v39 = vsel %vm724_vm1, %v1508_v7, %v1510_v20  ;;  %v1526_v34 = vsel %vm724_vm1, %v1504_v6, %v4371_v63  ;;  %1737 = vmatpush2.msra.mxu1 %v1233_v28 }
 0x27b   : > { %1738 = vmatprep.subr.mxu1 %v1232_v40  ;;  %4621 = vmatpush1.msk.msra.mxu0 %vm4912_vm2, %v1527_v39 }
 0x27c   : > { %1739 = vmatpush2.msra.mxu1 %v1231_v52  ;;  %4622 = vmatprep.subr.msk.mxu0 %vm4916_vm3, %v1526_v34 }
 0x27d   : > { %v1502_v57 = vpop.permute.xlu0 %1501  ;;  %1740 = vmatprep.subr.mxu1 %v1230_v54 }
 0x27e   : > { %v1525_v51 = vsel %vm724_vm1, %v1502_v57, %v1504_v6  ;;  %1741 = vmatpush2.msra.mxu1 %v1229_v25 }
 0x27f   : > { %1743 = vmatmul.mubr.f32.vlgmr.msra.gmra.mxu1 %v1557_v38  ;;  %4623 = vmatpush1.msk.msra.mxu0 %vm4912_vm2, %v1525_v51 }
 0x280   : > { %1748 = vmatprep.mubr.f32.mxu1 %v1561_v5  ;;  %4256 = vmatmul.mubr.msk.f32.vlgmr.msra.gmra.mxu0 %vm1665_vm15, %v1559_v3  ;;  %v6973_v5 = vmov 0.0  }
 0x281   : > { %1837 = vmatprep.mubr.f32.mxu0 %v5565_v15 }
 0x283   : > { %1749 = vmatmul.mubr.f32.gmra.mxu1 %v1560_v33 }
 0x284   : > { %1754 = vmatprep.mubr.f32.mxu1 %v1564_v35  ;;  %4257 = vmatmul.mubr.msk.f32.gmra.mxu0 %vm1665_vm15, %v1562_v0 }
 0x285   : > { %1843 = vmatprep.mubr.f32.mxu0 %v5565_v15 }
 0x286   : > { %v1663_v56 = vpop.permute.xlu1 %1662 }
 0x287   : > { %1755 = vmatmul.mubr.f32.gmra.mxu1 %v1563_v53 }
 0x288   : > { %1760 = vmatprep.mubr.f32.mxu1 %v1567_v26  ;;  %4258 = vmatmul.mubr.msk.f32.gmra.mxu0 %vm1665_vm15, %v1565_v4 }
 0x289   : > { %1849 = vmatprep.mubr.f32.mxu0 %v5565_v15 }
 0x28a   : > { %v1658_v46 = vpop.permute.xlu0 %1657  ;;  %v1653_v21 = vpop.permute.xlu1 %1652 }
 0x28b   : > { %1761 = vmatmul.mubr.f32.gmra.mxu1 %v1566_v24 }
 0x28c   : > { %2793 = vmatprep.mubr.f32.mxu1 %v5565_v15  ;;  %4259 = vmatmul.mubr.msk.f32.gmra.mxu0 %vm1665_vm15, %v1568_v36 }
 0x28e   : > { %v1648_v2 = vpop.permute.xlu0 %1647  ;;  %v5696_v25 = vpop.permute.xlu1 %4373 }
 0x292   : > { %v5706_v51 = vpop.permute.xlu0 %4378  ;;  %v5708_v3 = vpop.permute.xlu1 %4383 }
 0x296   : > { %v5714_v33 = vpop.permute.xlu0 %4388  ;;  %v5716_v35 = vpop.permute.xlu1 %4393 }
 0x29a   : > { %v5726_v0 = vpop.permute.xlu0 %4398  ;;  %v5728_v53 = vpop.permute.xlu1 %4403 }
 0x29e   : > { %v5734_v26 = vpop.permute.xlu0 %4408  ;;  %v5736_v4 = vpop.permute.xlu1 %4418 }
 0x2a2   : > { %v5746_v24 = vpop.permute.xlu0 %4413  ;;  %v5748_v36 = vpop.permute.xlu1 %4423 }
 0x33f   : > { %v1744_v19 = vpop.f32.mrf.mxu1 }
 0x340   : > { %v1745_v29 = vadd.f32 %v1744_v19, %v1648_v2  ;;  %v1833_v22 = vpop.f32.mrf.mxu0 }
 0x341   : > { %v1746_v47 = vpop.f32.mrf.mxu1 }
 0x342   : > { %v1747_v10 = vadd.f32 %v1746_v47, %v1648_v2  ;;  %v1834_v55 = vadd.f32 %v1833_v22, %v1745_v29  ;;  %v1835_v17 = vpop.f32.mrf.mxu0  ;;  %v2521_v22 = vld [vmem:[%s6941_s5 + $0x8] sm:$0xff] }
 0x343   : > { %v1750_v42 = vpop.f32.mrf.mxu1  ;;  %2704 = vmatprep.mubr.f32.mxu0 %v2521_v22 }
 0x344   : > { %v5592_v8 = vmax.f32 %v1834_v55, 0.0  ;;  %v1751_v23 = vadd.f32 %v1750_v42, %v1653_v21  ;;  %v1836_v18 = vadd.f32 %v1835_v17, %v1747_v10  ;;  %v1839_v61 = vpop.f32.mrf.mxu0  ;;  %v2607_v17 = vld [vmem:[%s6942_s6 + $0x18] sm:$0xff] }
 0x345   : > { %v1752_v48 = vpop.f32.mrf.mxu1 }
 0x346   : > { %1872 = vst [vmem:[#allocation2 + $0x8] sm:$0xff] %v5592_v8  ;;  %v5595_v30 = vmax.f32 %v1836_v18, 0.0  ;;  %v1753_v60 = vadd.f32 %v1752_v48, %v1653_v21  ;;  %v1840_v31 = vadd.f32 %v1839_v61, %v1751_v23  ;;  %2392 = vrot.lane.b32.xlu0 %v5592_v8, %s4760_s30  ;;  %2138 = vrot.lane.b32.xlu1 %v5592_v8, %s4756_s26  ;;  %v1841_v1 = vpop.f32.mrf.mxu0  ;;  %v2606_v48 = vld [vmem:[%s6942_s6 + $0x10] sm:$0xff]  ;;  %v2605_v61 = vld [vmem:[%s6942_s6 + $0x8] sm:$0xff] }
 0x347   : > { %v1756_v43 = vpop.f32.mrf.mxu1 }
 0x348   : > { %1873 = vst [vmem:[#allocation2 + $0x10] sm:$0xff] %v5595_v30  ;;  %v5602_v16 = vmax.f32 %v1840_v31, 0.0  ;;  %v1757_v41 = vadd.f32 %v1756_v43, %v1658_v46  ;;  %v1842_v13 = vadd.f32 %v1841_v1, %v1753_v60  ;;  %v1845_v20 = vpop.f32.mrf.mxu0  ;;  %v5814_v31 = vpack.i.bf16 %v5565_v15, %v5565_v15 }
 0x349   : > { %v1758_v11 = vpop.f32.mrf.mxu1 }
 0x34a   : > { %1874 = vst [vmem:[#allocation2 + $0x28] sm:$0xff] %v5602_v16  ;;  %v5605_v27 = vmax.f32 %v1842_v13, 0.0  ;;  %v1759_v63 = vadd.f32 %v1758_v11, %v1658_v46  ;;  %v1846_v32 = vadd.f32 %v1845_v20, %v1757_v41  ;;  %2140 = vrot.lane.b32.xlu0 %v5595_v30, %s4756_s26  ;;  %2058 = vrot.lane.b32.xlu1 %v5592_v8, %s4755_s25  ;;  %v1847_v62 = vpop.f32.mrf.mxu0  ;;  %6974 = vst [vmem:[#allocation9_spill] sm:$0xff] %v5814_v31 }
 0x34b   : > { %v1762_v45 = vpop.f32.mrf.mxu1 }
 0x34c   : > { %1875 = vst [vmem:[#allocation2 + $0x30] sm:$0xff] %v5605_v27  ;;  %v5612_v37 = vmax.f32 %v1846_v32, 0.0  ;;  %v1763_v44 = vadd.f32 %v1762_v45, %v1663_v56  ;;  %v1848_v7 = vadd.f32 %v1847_v62, %v1759_v63  ;;  %v1851_v28 = vpop.f32.mrf.mxu0 }
 0x34d   : > { %v1764_v6 = vpop.f32.mrf.mxu1 }
 0x34e   : > { %1876 = vst [vmem:[#allocation2 + $0x48] sm:$0xff] %v5612_v37  ;;  %v5615_v39 = vmax.f32 %v1848_v7, 0.0  ;;  %v1765_v34 = vadd.f32 %v1764_v6, %v1663_v56  ;;  %v1852_v40 = vadd.f32 %v1851_v28, %v1763_v44  ;;  %2060 = vrot.lane.b32.xlu0 %v5595_v30, %s4755_s25  ;;  %1986 = vrot.lane.b32.xlu1 %v5592_v8, %s4759_s29  ;;  %v1853_v52 = vpop.f32.mrf.mxu0 }
 0x350   : > { %1877 = vst [vmem:[#allocation2 + $0x50] sm:$0xff] %v5615_v39  ;;  %v5622_v54 = vmax.f32 %v1852_v40, 0.0  ;;  %v1854_v38 = vadd.f32 %v1853_v52, %v1765_v34  ;;  %v4375_v52 = vunpack.i.l.bf16 %v5696_v25 }
 0x352   : > { %1878 = vst [vmem:[#allocation2 + $0x68] sm:$0xff] %v5622_v54  ;;  %v5625_v57 = vmax.f32 %v1854_v38, 0.0  ;;  %1988 = vrot.lane.b32.xlu0 %v5595_v30, %s4759_s29  ;;  %1906 = vrot.lane.b32.xlu1 %v5592_v8, %s4754_s24 }
 0x354   : > { %1879 = vst [vmem:[#allocation2 + $0x70] sm:$0xff] %v5625_v57 }
 0x356   : > { %1908 = vrot.lane.b32.xlu0 %v5595_v30, %s4754_s24  ;;  %2394 = vrot.lane.b32.xlu1 %v5595_v30, %s4760_s30 }
 0x35a   : > { %2144 = vrot.lane.b32.xlu0 %v5602_v16, %s4756_s26  ;;  %2146 = vrot.lane.b32.xlu1 %v5605_v27, %s4756_s26 }
 0x35e   : > { %2064 = vrot.lane.b32.xlu0 %v5602_v16, %s4755_s25  ;;  %2066 = vrot.lane.b32.xlu1 %v5605_v27, %s4755_s25 }
 0x362   : > { %1992 = vrot.lane.b32.xlu0 %v5602_v16, %s4759_s29  ;;  %1994 = vrot.lane.b32.xlu1 %v5605_v27, %s4759_s29 }
 0x366   : > { %1912 = vrot.lane.b32.xlu0 %v5602_v16, %s4754_s24  ;;  %1914 = vrot.lane.b32.xlu1 %v5605_v27, %s4754_s24 }
 0x36a   : > { %2398 = vrot.lane.b32.xlu0 %v5602_v16, %s4760_s30  ;;  %2404 = vrot.lane.b32.xlu1 %v5612_v37, %s4760_s30 }
 0x36e   : > { %2400 = vrot.lane.b32.xlu0 %v5605_v27, %s4760_s30  ;;  %2324 = vrot.lane.b32.xlu1 %v5612_v37, %s4758_s28 }
 0x372   : > { %2150 = vrot.lane.b32.xlu0 %v5612_v37, %s4756_s26  ;;  %2152 = vrot.lane.b32.xlu1 %v5615_v39, %s4756_s26 }
 0x376   : > { %2070 = vrot.lane.b32.xlu0 %v5612_v37, %s4755_s25  ;;  %2072 = vrot.lane.b32.xlu1 %v5615_v39, %s4755_s25 }
 0x37a   : > { %1998 = vrot.lane.b32.xlu0 %v5612_v37, %s4759_s29  ;;  %2000 = vrot.lane.b32.xlu1 %v5615_v39, %s4759_s29 }
 0x37e   : > { %1918 = vrot.lane.b32.xlu0 %v5612_v37, %s4754_s24  ;;  %1920 = vrot.lane.b32.xlu1 %v5615_v39, %s4754_s24 }
 0x382   : > { %2406 = vrot.lane.b32.xlu0 %v5615_v39, %s4760_s30  ;;  %2156 = vrot.lane.b32.xlu1 %v5622_v54, %s4756_s26 }
 0x386   : > { %2326 = vrot.lane.b32.xlu0 %v5615_v39, %s4758_s28  ;;  %2076 = vrot.lane.b32.xlu1 %v5622_v54, %s4755_s25 }
 0x38a   : > { %2158 = vrot.lane.b32.xlu0 %v5625_v57, %s4756_s26  ;;  %2004 = vrot.lane.b32.xlu1 %v5622_v54, %s4759_s29 }
 0x38e   : > { %2320 = vrot.lane.b32.xlu0 %v5605_v27, %s4758_s28  ;;  %1924 = vrot.lane.b32.xlu1 %v5622_v54, %s4754_s24 }
 0x392   : > { %2078 = vrot.lane.b32.xlu0 %v5625_v57, %s4755_s25  ;;  %2410 = vrot.lane.b32.xlu1 %v5622_v54, %s4760_s30 }
 0x396   : > { %2318 = vrot.lane.b32.xlu0 %v5602_v16, %s4758_s28  ;;  %2330 = vrot.lane.b32.xlu1 %v5622_v54, %s4758_s28 }
 0x39a   : > { %2312 = vrot.lane.b32.xlu0 %v5592_v8, %s4758_s28  ;;  %4428 = vrot.lane.b32.xlu1 %v6973_v5, %s4758_s28 }
 0x39e   : > { %2006 = vrot.lane.b32.xlu0 %v5625_v57, %s4759_s29  ;;  %2314 = vrot.lane.b32.xlu1 %v5595_v30, %s4758_s28 }
 0x3a2   : > { %1926 = vrot.lane.b32.xlu0 %v5625_v57, %s4754_s24  ;;  %2250 = vrot.lane.b32.xlu1 %v5622_v54, %s4757_s27 }
 0x3a6   : > { %4433 = vrot.lane.b32.xlu0 %v6973_v5, %s4757_s27  ;;  %2244 = vrot.lane.b32.xlu1 %v5612_v37, %s4757_s27 }
 0x3aa   : > { %2246 = vrot.lane.b32.xlu0 %v5615_v39, %s4757_s27  ;;  %2412 = vrot.lane.b32.xlu1 %v5625_v57, %s4760_s30 }
 0x3ae   : > { %2240 = vrot.lane.b32.xlu0 %v5605_v27, %s4757_s27  ;;  %4438 = vrot.lane.b32.xlu1 %v6973_v5, %s4757_s27 }
 0x3b2   : > { %2332 = vrot.lane.b32.xlu0 %v5625_v57, %s4758_s28  ;;  %2234 = vrot.lane.b32.xlu1 %v5595_v30, %s4757_s27 }
 0x3b6   : > { %2238 = vrot.lane.b32.xlu0 %v5602_v16, %s4757_s27  ;;  %2482 = vrot.lane.b32.xlu1 %v5622_v54, %s4753_s23  ;;  %v4376_v54 = vunpack.i.h.bf16 %v5696_v25 }
 0x3b8   : > { %v5754_v46 = vpop.permute.xlu0 %2392  ;;  %v5756_v56 = vpop.permute.xlu1 %2138 }
 0x3ba   : > { %2232 = vrot.lane.b32.xlu0 %v5592_v8, %s4757_s27  ;;  %2252 = vrot.lane.b32.xlu1 %v5625_v57, %s4757_s27 }
 0x3bc   : > { %v5762_v2 = vpop.permute.xlu0 %2140  ;;  %v5764_v19 = vpop.permute.xlu1 %2058 }
 0x3be   : > { %4443 = vrot.lane.b32.xlu0 %v6973_v5, %s4753_s23  ;;  %2476 = vrot.lane.b32.xlu1 %v5612_v37, %s4753_s23 }
 0x3c0   : > { %v5770_v29 = vpop.permute.xlu0 %2060  ;;  %v5772_v47 = vpop.permute.xlu1 %1986 }
 0x3c2   : > { %2478 = vrot.lane.b32.xlu0 %v5615_v39, %s4753_s23  ;;  %2484 = vrot.lane.b32.xlu1 %v5625_v57, %s4753_s23 }
 0x3c4   : > { %v5781_v21 = vpop.permute.xlu0 %1988  ;;  %v5783_v10 = vpop.permute.xlu1 %1906 }
 0x3c6   : > { %2472 = vrot.lane.b32.xlu0 %v5605_v27, %s4753_s23  ;;  %4448 = vrot.lane.b32.xlu1 %v6973_v5, %s4753_s23 }
 0x3c8   : > { %v5789_v55 = vpop.permute.xlu0 %1908  ;;  %v5791_v42 = vpop.permute.xlu1 %2394 }
 0x3ca   : > { %2470 = vrot.lane.b32.xlu0 %v5602_v16, %s4753_s23  ;;  %2466 = vrot.lane.b32.xlu1 %v5595_v30, %s4753_s23 }
 0x3cc   : > { %v2145_v23 = vpop.permute.xlu0 %2144  ;;  %v2147_v18 = vpop.permute.xlu1 %2146 }
 0x3ce   : > { %2464 = vrot.lane.b32.xlu0 %v5592_v8, %s4753_s23  ;;  %2625 = vperm.xlu1 %4291, %v2607_v17   ;;  %v2604_v8 = vld [vmem:[%s6942_s6] sm:$0xff] }
 0x3d0   : > { %v5808_v60 = vpop.permute.xlu0 %2064  ;;  %v5810_v30 = vpop.permute.xlu1 %2066 }
 0x3d2   : > { %2620 = vperm.xlu0 %4290, %v2606_v48   ;;  %2615 = vperm.xlu1 %4291, %v2605_v61   ;;  %v4380_v48 = vunpack.i.l.bf16 %v5706_v51 }
 0x3d4   : > { %v5819_v43 = vpop.permute.xlu0 %1992  ;;  %v5821_v1 = vpop.permute.xlu1 %1994  ;;  %v2162_v25 = vsel %vm565_vm8, %v4380_v48, %v2145_v23 }
 0x3d6   : > { %2610 = vperm.xlu0 %4290, %v2604_v8   ;;  %4453 = vrot.lane.b32.xlu1 %v5814_v31, %s4756_s26  ;;  %v2163_v8 = vsel %vm565_vm8, %v2145_v23, %v2147_v18  ;;  %v4385_v18 = vunpack.i.l.bf16 %v5708_v3  ;;  %v4386_v23 = vunpack.i.h.bf16 %v5708_v3  ;;  %v2083_v3 = vsel %vm517_vm7, %v5808_v60, %v5810_v30 }
 0x3d8   : > { %v5825_v16 = vpop.permute.xlu0 %1912  ;;  %v5827_v41 = vpop.permute.xlu1 %1914 }
 0x3da   : > { %4458 = vrot.lane.b32.xlu0 %v5814_v31, %s4756_s26  ;;  %4463 = vrot.lane.b32.xlu1 %v5814_v31, %s4755_s25 }
 0x3dc   : > { %v5833_v13 = vpop.permute.xlu0 %2398  ;;  %v5835_v11 = vpop.permute.xlu1 %2404 }
 0x3de   : > { %4468 = vrot.lane.b32.xlu0 %v5814_v31, %s4755_s25  ;;  %4473 = vrot.lane.b32.xlu1 %v5814_v31, %s4759_s29 }
 0x3e0   : > { %v5841_v20 = vpop.permute.xlu0 %2400  ;;  %v5843_v27 = vpop.permute.xlu1 %2324 }
 0x3e2   : > { %4478 = vrot.lane.b32.xlu0 %v5814_v31, %s4759_s29  ;;  %4483 = vrot.lane.b32.xlu1 %v5814_v31, %s4754_s24 }
 0x3e4   : > { %v2151_v63 = vpop.permute.xlu0 %2150  ;;  %v2153_v32 = vpop.permute.xlu1 %2152 }
 0x3e5   : > { %v2165_v22 = vsel %vm565_vm8, %v2151_v63, %v2153_v32  ;;  %v2164_v61 = vsel %vm565_vm8, %v4376_v54, %v2151_v63  ;;  %v2161_v32 = vsel %vm565_vm8, %v5756_v56, %v5762_v2 }
 0x3e6   : > { %4488 = vrot.lane.b32.xlu0 %v5814_v31, %s4754_s24  ;;  %4498 = vrot.lane.b32.xlu1 %v5814_v31, %s4760_s30 }
 0x3e8   : > { %v2071_v45 = vpop.permute.xlu0 %2070  ;;  %v2073_v62 = vpop.permute.xlu1 %2072 }
 0x3e9   : > { %v2085_v54 = vsel %vm517_vm7, %v2071_v45, %v2073_v62  ;;  %v4391_v62 = vunpack.i.h.bf16 %v5714_v33 }
 0x3ea   : > { %4493 = vrot.lane.b32.xlu0 %v5814_v31, %s4760_s30  ;;  %4503 = vrot.lane.b32.xlu1 %v5814_v31, %s4758_s28  ;;  %v4381_v31 = vunpack.i.h.bf16 %v5706_v51 }
 0x3ec   : > { %v5857_v37 = vpop.permute.xlu0 %1998  ;;  %v5859_v44 = vpop.permute.xlu1 %2000  ;;  %v2160_v51 = vsel %vm565_vm8, %v4381_v31, %v5756_v56  ;;  %v4390_v31 = vunpack.i.l.bf16 %v5714_v33  ;;  %v2080_v33 = vsel %vm517_vm7, %v4391_v62, %v5764_v19  ;;  %v4416_v62 = vunpack.i.h.bf16 %v5746_v24 }
 0x3f0   : > { %v5861_v7 = vpop.permute.xlu0 %1918  ;;  %v5863_v6 = vpop.permute.xlu1 %1920 }
 0x3f4   : > { %v5865_v28 = vpop.permute.xlu0 %2406  ;;  %v2157_v39 = vpop.permute.xlu1 %2156 }
 0x3f5   : > { %v2166_v38 = vsel %vm565_vm8, %v4375_v52, %v2157_v39 }
 0x3f8   : > { %v5867_v34 = vpop.permute.xlu0 %2326  ;;  %v2077_v40 = vpop.permute.xlu1 %2076 }
 0x3f9   : > { %v2086_v63 = vsel %vm517_vm7, %v4385_v18, %v2077_v40 }
 0x3fc   : > { %v2159_v57 = vpop.permute.xlu0 %2158  ;;  %v2005_v5 = vpop.permute.xlu1 %2004 }
 0x3fd   : > { %v2167_v17 = vsel %vm565_vm8, %v2157_v39, %v2159_v57 }
 0x3fe   : > { %4624 = vmatprep.subr.msk.mxu0 %vm4933_vm6, %v2167_v17 }
 0x3ff   : > { %4625 = vmatpush1.msk.msra.mxu0 %vm4929_vm5, %v2166_v38  ;;  %v2084_v38 = vsel %vm517_vm7, %v4386_v23, %v2071_v45  ;;  %v2081_v45 = vsel %vm517_vm7, %v5764_v19, %v5770_v29  ;;  %v4395_v19 = vunpack.i.l.bf16 %v5716_v35 }
 0x400   : > { %v5881_v52 = vpop.permute.xlu0 %2320  ;;  %v1925_v14 = vpop.permute.xlu1 %1924  ;;  %4626 = vmatprep.subr.msk.mxu0 %vm4933_vm6, %v2165_v22 }
 0x401   : > { %4627 = vmatpush1.msk.msra.mxu0 %vm4929_vm5, %v2164_v61  ;;  %v4396_v61 = vunpack.i.h.bf16 %v5716_v35  ;;  %v2011_v35 = vsel %vm491_vm12, %v5819_v43, %v5821_v1 }
 0x402   : > { %4628 = vmatprep.subr.msk.mxu0 %vm4933_vm6, %v2163_v8  ;;  %v2014_v8 = vsel %vm491_vm12, %v4395_v19, %v2005_v5  ;;  %v4425_v19 = vunpack.i.l.bf16 %v5748_v36 }
 0x403   : > { %4629 = vmatpush1.msk.msra.mxu0 %vm4929_vm5, %v2162_v25  ;;  %v2013_v25 = vsel %vm491_vm12, %v5857_v37, %v5859_v44  ;;  %v2012_v18 = vsel %vm491_vm12, %v4396_v61, %v5857_v37  ;;  %v4406_v37 = vunpack.i.h.bf16 %v5728_v53  ;;  %v4421_v61 = vunpack.i.h.bf16 %v5736_v4 }
 0x404   : > { %v2079_v39 = vpop.permute.xlu0 %2078  ;;  %v5899_v2 = vpop.permute.xlu1 %2410  ;;  %4630 = vmatprep.subr.msk.mxu0 %vm4933_vm6, %v2161_v32  ;;  %v4400_v32 = vunpack.i.l.bf16 %v5726_v0 }
 0x405   : > { %v2087_v56 = vsel %vm517_vm7, %v2077_v40, %v2079_v39  ;;  %4631 = vmatpush1.msk.msra.mxu0 %vm4929_vm5, %v2160_v51  ;;  %v2082_v40 = vsel %vm517_vm7, %v4390_v31, %v5808_v60 }
 0x406   : > { %4632 = vmatprep.subr.msk.mxu0 %vm4916_vm3, %v2087_v56  ;;  %v2010_v44 = vsel %vm491_vm12, %v4400_v32, %v5819_v43 }
 0x407   : > { %4633 = vmatpush1.msk.msra.mxu0 %vm4912_vm2, %v2086_v63  ;;  %v4405_v63 = vunpack.i.l.bf16 %v5728_v53  ;;  %v4410_v53 = vunpack.i.l.bf16 %v5734_v26 }
 0x408   : > { %v5919_v57 = vpop.permute.xlu0 %2318  ;;  %v5921_v22 = vpop.permute.xlu1 %2330  ;;  %4634 = vmatprep.subr.msk.mxu0 %vm4916_vm3, %v2085_v54  ;;  %v2009_v54 = vsel %vm491_vm12, %v5772_v47, %v5781_v21  ;;  %v1932_v21 = vsel %vm459_vm4, %v4406_v37, %v5861_v7 }
 0x409   : > { %4635 = vmatpush1.msk.msra.mxu0 %vm4912_vm2, %v2084_v38  ;;  %v1934_v56 = vsel %vm459_vm4, %v4405_v63, %v1925_v14  ;;  %v2340_v63 = vsel %vm665_vm11, %v5843_v27, %v5867_v34 }
 0x40a   : > { %4636 = vmatprep.subr.msk.mxu0 %vm4916_vm3, %v2083_v3 }
 0x40b   : > { %4637 = vmatpush1.msk.msra.mxu0 %vm4912_vm2, %v2082_v40 }
 0x40c   : > { %v5936_v60 = vpop.permute.xlu0 %2312  ;;  %v5938_v30 = vpop.permute.xlu1 %4428  ;;  %4638 = vmatprep.subr.msk.mxu0 %vm4916_vm3, %v2081_v45  ;;  %v4420_v45 = vunpack.i.l.bf16 %v5736_v4 }
 0x40d   : > { %4639 = vmatpush1.msk.msra.mxu0 %vm4912_vm2, %v2080_v33  ;;  %v2421_v33 = vsel %vm698_vm13, %v5865_v28, %v4416_v62  ;;  %v4430_v32 = vunpack.i.l.bf16 %v5938_v30 }
 0x410   : > { %v2007_v29 = vpop.permute.xlu0 %2006  ;;  %v5947_v17 = vpop.permute.xlu1 %2314 }
 0x411   : > { %v2015_v48 = vsel %vm491_vm12, %v2005_v5, %v2007_v29  ;;  %v4401_v5 = vunpack.i.h.bf16 %v5726_v0  ;;  %v1933_v0 = vsel %vm459_vm4, %v5861_v7, %v5863_v6  ;;  %v1930_v6 = vsel %vm459_vm4, %v4410_v53, %v5825_v16 }
 0x412   : > { %2656 = vmatprep.subr.mxu0 %v2015_v48  ;;  %v1929_v7 = vsel %vm459_vm4, %v5783_v10, %v5789_v55 }
 0x413   : > { %2657 = vmatpush1.msra.mxu0 %v2014_v8  ;;  %v2008_v1 = vsel %vm491_vm12, %v4401_v5, %v5772_v47  ;;  %v4411_v47 = vunpack.i.h.bf16 %v5734_v26  ;;  %v4415_v26 = vunpack.i.l.bf16 %v5746_v24  ;;  %v2420_v24 = vsel %vm698_vm13, %v5835_v11, %v5865_v28 }
 0x414   : > { %v1927_v51 = vpop.permute.xlu0 %1926  ;;  %v5958_v23 = vpop.permute.xlu1 %2250  ;;  %2658 = vmatprep.subr.mxu0 %v2013_v25  ;;  %v4426_v8 = vunpack.i.h.bf16 %v5748_v36  ;;  %v2418_v25 = vsel %vm698_vm13, %v5833_v13, %v5841_v20  ;;  %v2417_v11 = vsel %vm698_vm13, %v5791_v42, %v4421_v61  ;;  %v2416_v36 = vsel %vm698_vm13, %v5754_v46, %v5791_v42  ;;  %v2193_v61 = vld [vmem:[#allocation2 + $0x10] sm:$0xff] }
 0x415   : > { %2659 = vmatpush1.msra.mxu0 %v2012_v18  ;;  %v1935_v39 = vsel %vm459_vm4, %v1925_v14, %v1927_v51  ;;  %v1931_v14 = vsel %vm459_vm4, %v5825_v16, %v5827_v41  ;;  %v1928_v41 = vsel %vm459_vm4, %v4411_v47, %v5783_v10  ;;  %v4431_v13 = vunpack.i.h.bf16 %v5938_v30 }
 0x416   : > { %2660 = vmatprep.subr.mxu0 %v2011_v35  ;;  %v2341_v28 = vsel %vm665_vm11, %v5867_v34, %v4426_v8  ;;  %v2338_v46 = vsel %vm665_vm11, %v5919_v57, %v5881_v52  ;;  %v2336_v35 = vsel %vm665_vm11, %v5936_v60, %v5947_v17 }
 0x417   : > { %2661 = vmatpush1.msra.mxu0 %v2010_v44  ;;  %v2337_v42 = vsel %vm665_vm11, %v5947_v17, %v4431_v13  ;;  %v2526_v13 = vld [vmem:[%s6941_s5 + $0x30] sm:$0xff] }
 0x418   : > { %v5978_v43 = vpop.permute.xlu0 %4433  ;;  %v5980_v31 = vpop.permute.xlu1 %2244  ;;  %2662 = vmatprep.subr.mxu0 %v2009_v54 }
 0x419   : > { %2663 = vmatpush1.msra.mxu0 %v2008_v1  ;;  %v4435_v30 = vunpack.i.l.bf16 %v5978_v43 }
 0x41a   : > { %4640 = vmatprep.subr.msk.mxu0 %vm4933_vm6, %v1935_v39 }
 0x41b   : > { %4641 = vmatpush1.msk.msra.mxu0 %vm4929_vm5, %v1934_v56 }
 0x41c   : > { %v5998_v38 = vpop.permute.xlu0 %2246  ;;  %v2413_v3 = vpop.permute.xlu1 %2412  ;;  %4642 = vmatprep.subr.msk.mxu0 %vm4933_vm6, %v1933_v0 }
 0x41d   : > { %4643 = vmatpush1.msk.msra.mxu0 %vm4929_vm5, %v1932_v21  ;;  %v2423_v10 = vsel %vm698_vm13, %v2413_v3, %v4415_v26  ;;  %v2422_v40 = vsel %vm698_vm13, %v5899_v2, %v2413_v3  ;;  %v2419_v2 = vsel %vm698_vm13, %v5841_v20, %v4420_v45  ;;  %v2260_v54 = vsel %vm617_vm10, %v5980_v31, %v5998_v38 }
 0x41e   : > { %4644 = vmatprep.subr.msk.mxu0 %vm4933_vm6, %v1931_v14 }
 0x41f   : > { %4645 = vmatpush1.msk.msra.mxu0 %vm4929_vm5, %v1930_v6 }
 0x420   : > { %v2241_v55 = vpop.permute.xlu0 %2240  ;;  %v6011_v16 = vpop.permute.xlu1 %4438  ;;  %4646 = vmatprep.subr.msk.mxu0 %vm4933_vm6, %v1929_v7 }
 0x421   : > { %4647 = vmatpush1.msk.msra.mxu0 %vm4929_vm5, %v1928_v41  ;;  %v4440_v5 = vunpack.i.l.bf16 %v6011_v16  ;;  %v4441_v17 = vunpack.i.h.bf16 %v6011_v16  ;;  %v2198_v16 = vld [vmem:[#allocation2 + $0x68] sm:$0xff] }
 0x422   : > { %2672 = vmatprep.subr.mxu0 %v2423_v10  ;;  %v2197_v10 = vld [vmem:[#allocation2 + $0x50] sm:$0xff] }
 0x423   : > { %2673 = vmatpush2.msra.mxu0 %v2422_v40  ;;  %v2259_v56 = vsel %vm617_vm10, %v2241_v55, %v4440_v5 }
 0x424   : > { %v2333_v29 = vpop.permute.xlu0 %2332  ;;  %v2235_v48 = vpop.permute.xlu1 %2234  ;;  %2674 = vmatprep.subr.mxu0 %v2421_v33  ;;  %v2196_v33 = vld [vmem:[#allocation2 + $0x48] sm:$0xff] }
 0x425   : > { %2675 = vmatpush2.msra.mxu0 %v2420_v24  ;;  %v2343_v18 = vsel %vm665_vm11, %v2333_v29, %v4425_v19  ;;  %v2342_v4 = vsel %vm665_vm11, %v5921_v22, %v2333_v29  ;;  %v2339_v22 = vsel %vm665_vm11, %v5881_v52, %v4430_v32  ;;  %v4436_v52 = vunpack.i.h.bf16 %v5978_v43  ;;  %v2195_v29 = vld [vmem:[#allocation2 + $0x30] sm:$0xff]  ;;  %v2524_v32 = vld [vmem:[%s6941_s5 + $0x20] sm:$0xff] }
 0x426   : > { %2676 = vmatprep.subr.mxu0 %v2419_v2  ;;  %v2257_v43 = vsel %vm617_vm10, %v2235_v48, %v4441_v17  ;;  %v2520_v2 = vld [vmem:[%s6941_s5] sm:$0xff] }
 0x427   : > { %2677 = vmatpush2.msra.mxu0 %v2418_v25  ;;  %v2261_v60 = vsel %vm617_vm10, %v5998_v38, %v4436_v52  ;;  %v2192_v25 = vld [vmem:[#allocation2 + $0x8] sm:$0xff] }
 0x428   : > { %v2239_v20 = vpop.permute.xlu0 %2238  ;;  %v2483_v51 = vpop.permute.xlu1 %2482  ;;  %2678 = vmatprep.subr.mxu0 %v2417_v11  ;;  %v2522_v11 = vld [vmem:[%s6941_s5 + $0x10] sm:$0xff] }
 0x429   : > { %2679 = vmatpush2.msra.mxu0 %v2416_v36  ;;  %v2527_v36 = vld [vmem:[%s6941_s5 + $0x38] sm:$0xff] }
 0x42a   : > { %4648 = vmatprep.subr.msk.mxu0 %vm4933_vm6, %v2343_v18 }
 0x42b   : > { %4649 = vmatpush2.msk.msra.mxu0 %vm4929_vm5, %v2342_v4  ;;  %v2523_v4 = vld [vmem:[%s6941_s5 + $0x18] sm:$0xff] }
 0x42c   : > { %v2233_v27 = vpop.permute.xlu0 %2232  ;;  %v2253_v34 = vpop.permute.xlu1 %2252  ;;  %4650 = vmatprep.subr.msk.mxu0 %vm4933_vm6, %v2341_v28  ;;  %v2525_v28 = vld [vmem:[%s6941_s5 + $0x28] sm:$0xff] }
 0x42d   : > { %4651 = vmatpush2.msk.msra.mxu0 %vm4929_vm5, %v2340_v63  ;;  %v2263_v57 = vsel %vm617_vm10, %v2253_v34, %v4435_v30  ;;  %v2262_v44 = vsel %vm617_vm10, %v5958_v23, %v2253_v34  ;;  %v2258_v23 = vsel %vm617_vm10, %v2239_v20, %v2241_v55  ;;  %v2256_v31 = vsel %vm617_vm10, %v2233_v27, %v2235_v48  ;;  %v2199_v55 = vld [vmem:[#allocation2 + $0x70] sm:$0xff]  ;;  %v2194_v48 = vld [vmem:[#allocation2 + $0x28] sm:$0xff] }
 0x42e   : > { %4652 = vmatprep.subr.msk.mxu0 %vm4933_vm6, %v2339_v22  ;;  %v2530_v20 = vld [vmem:[%s6941_s5 + $0x50] sm:$0xff]  ;;  %v2529_v63 = vld [vmem:[%s6941_s5 + $0x48] sm:$0xff]  ;;  %v2531_v22 = vld [vmem:[%s6941_s5 + $0x58] sm:$0xff] }
 0x42f   : > { %4653 = vmatpush2.msk.msra.mxu0 %vm4929_vm5, %v2338_v46 }
 0x430   : > { %v4444_v39 = vpop.permute.xlu0 %4443  ;;  %v2477_v37 = vpop.permute.xlu1 %2476  ;;  %4654 = vmatprep.subr.msk.mxu0 %vm4933_vm6, %v2337_v42 }
 0x431   : > { %4655 = vmatpush2.msk.msra.mxu0 %vm4929_vm5, %v2336_v35  ;;  %v4446_v1 = vunpack.i.h.bf16 %v4444_v39  ;;  %v4445_v0 = vunpack.i.l.bf16 %v4444_v39 }
 0x432   : > { %4656 = vmatprep.subr.msk.mxu0 %vm4916_vm3, %v2263_v57 }
 0x433   : > { %4657 = vmatpush2.msk.msra.mxu0 %vm4912_vm2, %v2262_v44 }
 0x434   : > { %v2479_v53 = vpop.permute.xlu0 %2478  ;;  %v2485_v21 = vpop.permute.xlu1 %2484  ;;  %4658 = vmatprep.subr.msk.mxu0 %vm4916_vm3, %v2261_v60 }
 0x435   : > { %v2493_v14 = vsel %vm724_vm1, %v2479_v53, %v4446_v1  ;;  %v2494_v47 = vsel %vm724_vm1, %v2483_v51, %v2485_v21  ;;  %v2495_v6 = vsel %vm724_vm1, %v2485_v21, %v4445_v0  ;;  %4659 = vmatpush2.msk.msra.mxu0 %vm4912_vm2, %v2260_v54  ;;  %v2492_v7 = vsel %vm724_vm1, %v2477_v37, %v2479_v53  ;;  %v2528_v51 = vld [vmem:[%s6941_s5 + $0x40] sm:$0xff] }
 0x436   : > { %4660 = vmatprep.subr.msk.mxu0 %vm4916_vm3, %v2259_v56  ;;  %4662 = vmatprep.subr.msk.mxu1 %vm4916_vm3, %v2495_v6  ;;  %v6975_v53 = vld [vmem:[#allocation5_spill] sm:$0xff]  ;;  %v6976_v6 = vld [vmem:[#allocation6_spill] sm:$0xff] }
 0x437   : > { %4661 = vmatpush2.msk.msra.mxu0 %vm4912_vm2, %v2258_v23  ;;  %4664 = vmatpush1.msk.msra.mxu1 %vm4912_vm2, %v2494_v47 }
 0x438   : > { %v2473_v38 = vpop.permute.xlu0 %2472  ;;  %v4449_v3 = vpop.permute.xlu1 %4448  ;;  %4663 = vmatprep.subr.msk.mxu0 %vm4916_vm3, %v2257_v43  ;;  %4666 = vmatprep.subr.msk.mxu1 %vm4916_vm3, %v2493_v14 }
 0x439   : > { %v4451_v41 = vunpack.i.h.bf16 %v4449_v3  ;;  %v4450_v26 = vunpack.i.l.bf16 %v4449_v3  ;;  %4665 = vmatpush2.msk.msra.mxu0 %vm4912_vm2, %v2256_v31  ;;  %4667 = vmatpush1.msk.msra.mxu1 %vm4912_vm2, %v2492_v7 }
 0x43a   : > { %2696 = vmatprep.subr.mxu0 %v2199_v55  ;;  %v6977_v55 = vld [vmem:[#allocation7_spill] sm:$0xff] }
 0x43b   : > { %v2491_v62 = vsel %vm724_vm1, %v2473_v38, %v4450_v26  ;;  %2697 = vmatpush2.msra.mxu0 %v2198_v16 }
 0x43c   : > { %v2471_v40 = vpop.permute.xlu0 %2470  ;;  %v2467_v45 = vpop.permute.xlu1 %2466  ;;  %2698 = vmatprep.subr.mxu0 %v2197_v10  ;;  %4668 = vmatprep.subr.msk.mxu1 %vm4916_vm3, %v2491_v62 }
 0x43d   : > { %v2490_v19 = vsel %vm724_vm1, %v2471_v40, %v2473_v38  ;;  %v2489_v24 = vsel %vm724_vm1, %v2467_v45, %v4451_v41  ;;  %2699 = vmatpush2.msra.mxu0 %v2196_v33  ;;  %v6978_v33 = vld [vmem:[#allocation8_spill] sm:$0xff] }
 0x43e   : > { %2700 = vmatprep.subr.mxu0 %v2195_v29  ;;  %4669 = vmatpush1.msk.msra.mxu1 %vm4912_vm2, %v2490_v19 }
 0x43f   : > { %2701 = vmatpush2.msra.mxu0 %v2194_v48  ;;  %4670 = vmatprep.subr.msk.mxu1 %vm4916_vm3, %v2489_v24 }
 0x440   : > { %v2465_v8 = vpop.permute.xlu0 %2464  ;;  %2702 = vmatprep.subr.mxu0 %v2193_v61  ;;  %v4573_v61 = vld [vmem:[#allocation3 + $0x130] sm:$0xff] }
 0x441   : > { %v2488_v18 = vsel %vm724_vm1, %v2465_v8, %v2467_v45  ;;  %2703 = vmatpush2.msra.mxu0 %v2192_v25  ;;  %v4574_v25 = vld [vmem:[#allocation3 + $0x138] sm:$0xff] }
 0x442   : > { %2705 = vmatmul.mubr.f32.vlgmr.msra.gmra.mxu0 %v2520_v2  ;;  %4671 = vmatpush1.msk.msra.mxu1 %vm4912_vm2, %v2488_v18 }
 0x443   : > { %2710 = vmatprep.mubr.f32.mxu0 %v2524_v32  ;;  %4260 = vmatmul.mubr.msk.f32.vlgmr.msra.gmra.mxu1 %vm1665_vm15, %v2522_v11 }
 0x444   : > { %2799 = vmatprep.mubr.f32.mxu1 %v5565_v15 }
 0x446   : > { %2711 = vmatmul.mubr.f32.gmra.mxu0 %v2523_v4 }
 0x447   : > { %2716 = vmatprep.mubr.f32.mxu0 %v2527_v36  ;;  %4261 = vmatmul.mubr.msk.f32.gmra.mxu1 %vm1665_vm15, %v2525_v28 }
 0x448   : > { %2805 = vmatprep.mubr.f32.mxu1 %v5565_v15 }
 0x449   : > { %v2626_v42 = vpop.permute.xlu1 %2625 }
 0x44a   : > { %2717 = vmatmul.mubr.f32.gmra.mxu0 %v2526_v13  ;;  %v6979_v13 = vld [vmem:[#allocation9_spill] sm:$0xff] }
 0x44b   : > { %2722 = vmatprep.mubr.f32.mxu0 %v2530_v20  ;;  %4262 = vmatmul.mubr.msk.f32.gmra.mxu1 %vm1665_vm15, %v2528_v51 }
 0x44c   : > { %2811 = vmatprep.mubr.f32.mxu1 %v5565_v15 }
 0x44d   : > { %v2621_v46 = vpop.permute.xlu0 %2620  ;;  %v2616_v52 = vpop.permute.xlu1 %2615 }
 0x44e   : > { %2723 = vmatmul.mubr.f32.gmra.mxu0 %v2529_v63 }
 0x44f   : > { %3711 = vmatprep.mubr.f32.mxu0 %v5565_v15  ;;  %4263 = vmatmul.mubr.msk.f32.gmra.mxu1 %vm1665_vm15, %v2531_v22 }
 0x451   : > { %v2611_v30 = vpop.permute.xlu0 %2610  ;;  %v6293_v28 = vpop.permute.xlu1 %4453 }
 0x455   : > { %v6303_v20 = vpop.permute.xlu0 %4458  ;;  %v6305_v51 = vpop.permute.xlu1 %4463 }
 0x459   : > { %v6311_v63 = vpop.permute.xlu0 %4468  ;;  %v6313_v22 = vpop.permute.xlu1 %4473 }
 0x502   : > { %v2706_v27 = vpop.f32.mrf.mxu0 }
 0x503   : > { %v2707_v34 = vadd.f32 %v2706_v27, %v2611_v30  ;;  %v2795_v5 = vpop.f32.mrf.mxu1 }
 0x504   : > { %v2708_v35 = vpop.f32.mrf.mxu0 }
 0x505   : > { %v2709_v57 = vadd.f32 %v2708_v35, %v2611_v30  ;;  %v2796_v44 = vadd.f32 %v2795_v5, %v2707_v34  ;;  %v2797_v17 = vpop.f32.mrf.mxu1 }
 0x506   : > { %v2712_v60 = vpop.f32.mrf.mxu0 }
 0x507   : > { %v6174_v39 = vadd.f32 %v2796_v44, %v5013_v9  ;;  %v2713_v37 = vadd.f32 %v2712_v60, %v2616_v52  ;;  %v2798_v54 = vadd.f32 %v2797_v17, %v2709_v57  ;;  %v2801_v56 = vpop.f32.mrf.mxu1 }
 0x508   : > { %v2714_v15 = vpop.f32.mrf.mxu0 }
 0x509   : > { %2826 = vst [vmem:[#allocation2 + $0x8] sm:$0xff] %v6174_v39  ;;  %v6178_v23 = vadd.f32 %v2798_v54, %v5016_v12  ;;  %v2715_v1 = vadd.f32 %v2714_v15, %v2616_v52  ;;  %v2802_v0 = vadd.f32 %v2801_v56, %v2713_v37  ;;  %3346 = vrot.lane.b32.xlu0 %v6174_v39, %s4760_s30  ;;  %v2803_v9 = vpop.f32.mrf.mxu1  ;;  %v3475_v37 = vld [vmem:[%s6943_s7 + $0x8] sm:$0xff] }
 0x50a   : > { %3092 = vrot.lane.b32.xlu1 %v6174_v39, %s4756_s26  ;;  %v2718_v43 = vpop.f32.mrf.mxu0  ;;  %3634 = vmatprep.mubr.f32.mxu1 %v3475_v37 }
 0x50b   : > { %2827 = vst [vmem:[#allocation2 + $0x10] sm:$0xff] %v6178_v23  ;;  %v6186_v21 = vadd.f32 %v2802_v0, %v6975_v53  ;;  %v2719_v31 = vadd.f32 %v2718_v43, %v2621_v46  ;;  %v2804_v14 = vadd.f32 %v2803_v9, %v2715_v1  ;;  %v2807_v12 = vpop.f32.mrf.mxu1  ;;  %v3553_v53 = vld [vmem:[%s6944_s8 + $0x8] sm:$0xff] }
 0x50c   : > { %v2720_v47 = vpop.f32.mrf.mxu0 }
 0x50d   : > { %2828 = vst [vmem:[#allocation2 + $0x28] sm:$0xff] %v6186_v21  ;;  %v6190_v7 = vadd.f32 %v2804_v14, %v6976_v6  ;;  %v2721_v38 = vadd.f32 %v2720_v47, %v2621_v46  ;;  %v2808_v3 = vadd.f32 %v2807_v12, %v2719_v31  ;;  %3094 = vrot.lane.b32.xlu0 %v6178_v23, %s4756_s26  ;;  %v2809_v26 = vpop.f32.mrf.mxu1  ;;  %v6323_v46 = vpop.permute.xlu0 %4478  ;;  %v3552_v47 = vld [vmem:[%s6944_s8] sm:$0xff]  ;;  %v6406_v6 = vld [vmem:[#allocation2 + $0x18] sm:$0xff] }
 0x50e   : > { %3012 = vrot.lane.b32.xlu1 %v6174_v39, %s4755_s25  ;;  %v2724_v41 = vpop.f32.mrf.mxu0  ;;  %6980 = vst [vmem:[#allocation5_spill] sm:$0xff] %v6406_v6 }
 0x50f   : > { %2829 = vst [vmem:[#allocation2 + $0x30] sm:$0xff] %v6190_v7  ;;  %v6198_v16 = vadd.f32 %v2808_v3, %v6977_v55  ;;  %v2725_v62 = vadd.f32 %v2724_v41, %v2626_v42  ;;  %v2810_v10 = vadd.f32 %v2809_v26, %v2721_v38  ;;  %v2813_v45 = vpop.f32.mrf.mxu1 }
 0x510   : > { %v2726_v40 = vpop.f32.mrf.mxu0 }
 0x511   : > { %2830 = vst [vmem:[#allocation2 + $0x48] sm:$0xff] %v6198_v16  ;;  %v6202_v19 = vadd.f32 %v2810_v10, %v6978_v33  ;;  %v2727_v24 = vadd.f32 %v2726_v40, %v2626_v42  ;;  %v2814_v29 = vadd.f32 %v2813_v45, %v2725_v62  ;;  %3014 = vrot.lane.b32.xlu0 %v6178_v23, %s4755_s25  ;;  %v2815_v48 = vpop.f32.mrf.mxu1  ;;  %v6325_v42 = vpop.permute.xlu1 %4483 }
 0x512   : > { %2940 = vrot.lane.b32.xlu1 %v6174_v39, %s4759_s29  ;;  %v6331_v30 = vpop.permute.xlu0 %4488 }
 0x513   : > { %2831 = vst [vmem:[#allocation2 + $0x50] sm:$0xff] %v6202_v19  ;;  %v6209_v2 = vadd.f32 %v4573_v61, %v2814_v29  ;;  %v2816_v8 = vadd.f32 %v2815_v48, %v2727_v24 }
 0x515   : > { %2832 = vst [vmem:[#allocation2 + $0x68] sm:$0xff] %v6209_v2  ;;  %v6212_v32 = vadd.f32 %v4574_v25, %v2816_v8  ;;  %2942 = vrot.lane.b32.xlu0 %v6178_v23, %s4759_s29  ;;  %v4499_v27 = vpop.permute.xlu1 %4498 }
 0x516   : > { %2860 = vrot.lane.b32.xlu1 %v6174_v39, %s4754_s24  ;;  %v6341_v34 = vpop.permute.xlu0 %4493  ;;  %v4501_v56 = vunpack.i.h.bf16 %v4499_v27 }
 0x517   : > { %2833 = vst [vmem:[#allocation2 + $0x70] sm:$0xff] %v6212_v32  ;;  %v4496_v25 = vunpack.i.h.bf16 %v6341_v34 }
 0x518   : > { %v6219_v18 = vld [vmem:[#allocation2 + $0x48] sm:$0xff] }
 0x519   : > { %2862 = vrot.lane.b32.xlu0 %v6178_v23, %s4754_s24  ;;  %v6343_v35 = vpop.permute.xlu1 %4503 }
 0x51a   : > { %3348 = vrot.lane.b32.xlu1 %v6178_v23, %s4760_s30  ;;  %v6225_v11 = vld [vmem:[#allocation2 + $0x50] sm:$0xff]  ;;  %v4506_v37 = vunpack.i.h.bf16 %v6343_v35 }
 0x51c   : > { %v6227_v4 = vld [vmem:[#allocation2 + $0x68] sm:$0xff] }
 0x51d   : > { %3098 = vrot.lane.b32.xlu0 %v6186_v21, %s4756_s26  ;;  %3160 = vst [vmem:[#allocation3 + $0x130] sm:$0xff] %v6227_v4 }
 0x51e   : > { %3100 = vrot.lane.b32.xlu1 %v6190_v7, %s4756_s26  ;;  %v6234_v36 = vld [vmem:[#allocation2 + $0x70] sm:$0xff] }
 0x51f   : > { %3161 = vst [vmem:[#allocation3 + $0x138] sm:$0xff] %v6234_v36 }
 0x521   : > { %3018 = vrot.lane.b32.xlu0 %v6186_v21, %s4755_s25 }
 0x522   : > { %3020 = vrot.lane.b32.xlu1 %v6190_v7, %s4755_s25 }
 0x525   : > { %2946 = vrot.lane.b32.xlu0 %v6186_v21, %s4759_s29 }
 0x526   : > { %2948 = vrot.lane.b32.xlu1 %v6190_v7, %s4759_s29 }
 0x529   : > { %2866 = vrot.lane.b32.xlu0 %v6186_v21, %s4754_s24 }
 0x52a   : > { %2868 = vrot.lane.b32.xlu1 %v6190_v7, %s4754_s24 }
 0x52d   : > { %3352 = vrot.lane.b32.xlu0 %v6186_v21, %s4760_s30 }
 0x52e   : > { %3358 = vrot.lane.b32.xlu1 %v6198_v16, %s4760_s30 }
 0x531   : > { %3354 = vrot.lane.b32.xlu0 %v6190_v7, %s4760_s30 }
 0x532   : > { %3278 = vrot.lane.b32.xlu1 %v6198_v16, %s4758_s28 }
 0x535   : > { %3104 = vrot.lane.b32.xlu0 %v6198_v16, %s4756_s26 }
 0x536   : > { %3106 = vrot.lane.b32.xlu1 %v6202_v19, %s4756_s26 }
 0x539   : > { %3024 = vrot.lane.b32.xlu0 %v6198_v16, %s4755_s25 }
 0x53a   : > { %3026 = vrot.lane.b32.xlu1 %v6202_v19, %s4755_s25 }
 0x53d   : > { %2952 = vrot.lane.b32.xlu0 %v6198_v16, %s4759_s29 }
 0x53e   : > { %2954 = vrot.lane.b32.xlu1 %v6202_v19, %s4759_s29 }
 0x541   : > { %2872 = vrot.lane.b32.xlu0 %v6198_v16, %s4754_s24 }
 0x542   : > { %2874 = vrot.lane.b32.xlu1 %v6202_v19, %s4754_s24 }
 0x545   : > { %3360 = vrot.lane.b32.xlu0 %v6202_v19, %s4760_s30 }
 0x546   : > { %3110 = vrot.lane.b32.xlu1 %v6209_v2, %s4756_s26 }
 0x549   : > { %3280 = vrot.lane.b32.xlu0 %v6202_v19, %s4758_s28 }
 0x54a   : > { %3030 = vrot.lane.b32.xlu1 %v6209_v2, %s4755_s25 }
 0x54d   : > { %3112 = vrot.lane.b32.xlu0 %v6212_v32, %s4756_s26 }
 0x54e   : > { %2958 = vrot.lane.b32.xlu1 %v6209_v2, %s4759_s29 }
 0x551   : > { %3274 = vrot.lane.b32.xlu0 %v6190_v7, %s4758_s28 }
 0x552   : > { %2878 = vrot.lane.b32.xlu1 %v6209_v2, %s4754_s24 }
 0x555   : > { %3032 = vrot.lane.b32.xlu0 %v6212_v32, %s4755_s25 }
 0x556   : > { %3364 = vrot.lane.b32.xlu1 %v6209_v2, %s4760_s30 }
 0x559   : > { %3272 = vrot.lane.b32.xlu0 %v6186_v21, %s4758_s28 }
 0x55a   : > { %3284 = vrot.lane.b32.xlu1 %v6209_v2, %s4758_s28 }
 0x55d   : > { %3266 = vrot.lane.b32.xlu0 %v6174_v39, %s4758_s28 }
 0x55e   : > { %4508 = vrot.lane.b32.xlu1 %v6979_v13, %s4758_s28 }
 0x561   : > { %2960 = vrot.lane.b32.xlu0 %v6212_v32, %s4759_s29 }
 0x562   : > { %3268 = vrot.lane.b32.xlu1 %v6178_v23, %s4758_s28 }
 0x565   : > { %2880 = vrot.lane.b32.xlu0 %v6212_v32, %s4754_s24 }
 0x566   : > { %3204 = vrot.lane.b32.xlu1 %v6209_v2, %s4757_s27 }
 0x569   : > { %4513 = vrot.lane.b32.xlu0 %v6979_v13, %s4757_s27 }
 0x56a   : > { %3198 = vrot.lane.b32.xlu1 %v6198_v16, %s4757_s27 }
 0x56d   : > { %3200 = vrot.lane.b32.xlu0 %v6202_v19, %s4757_s27 }
 0x56e   : > { %3366 = vrot.lane.b32.xlu1 %v6212_v32, %s4760_s30 }
 0x571   : > { %3194 = vrot.lane.b32.xlu0 %v6190_v7, %s4757_s27 }
 0x572   : > { %4518 = vrot.lane.b32.xlu1 %v6979_v13, %s4757_s27 }
 0x575   : > { %3286 = vrot.lane.b32.xlu0 %v6212_v32, %s4758_s28 }
 0x576   : > { %3188 = vrot.lane.b32.xlu1 %v6178_v23, %s4757_s27 }
 0x579   : > { %3192 = vrot.lane.b32.xlu0 %v6186_v21, %s4757_s27 }
 0x57a   : > { %3436 = vrot.lane.b32.xlu1 %v6209_v2, %s4753_s23 }
 0x57b   : > { %v3347_v5 = vpop.permute.xlu0 %3346 }
 0x57c   : > { %v6349_v52 = vpop.permute.xlu1 %3092 }
 0x57d   : > { %3186 = vrot.lane.b32.xlu0 %v6174_v39, %s4757_s27 }
 0x57e   : > { %3206 = vrot.lane.b32.xlu1 %v6212_v32, %s4757_s27 }
 0x57f   : > { %v6355_v57 = vpop.permute.xlu0 %3094 }
 0x580   : > { %v6357_v44 = vpop.permute.xlu1 %3012 }
 0x581   : > { %4523 = vrot.lane.b32.xlu0 %v6979_v13, %s4753_s23 }
 0x582   : > { %3430 = vrot.lane.b32.xlu1 %v6198_v16, %s4753_s23  ;;  %v4500_v16 = vunpack.i.l.bf16 %v4499_v27 }
 0x583   : > { %v6363_v60 = vpop.permute.xlu0 %3014 }
 0x584   : > { %v6365_v17 = vpop.permute.xlu1 %2940 }
 0x585   : > { %3432 = vrot.lane.b32.xlu0 %v6202_v19, %s4753_s23 }
 0x586   : > { %3438 = vrot.lane.b32.xlu1 %v6212_v32, %s4753_s23 }
 0x587   : > { %v6374_v54 = vpop.permute.xlu0 %2942 }
 0x588   : > { %v6376_v15 = vpop.permute.xlu1 %2860 }
 0x589   : > { %3426 = vrot.lane.b32.xlu0 %v6190_v7, %s4753_s23 }
 0x58a   : > { %4528 = vrot.lane.b32.xlu1 %v6979_v13, %s4753_s23 }
 0x58b   : > { %v6382_v1 = vpop.permute.xlu0 %2862 }
 0x58c   : > { %v3349_v0 = vpop.permute.xlu1 %3348 }
 0x58d   : > { %v6385_v43 = vsel %vm698_vm13, %v3347_v5, %v3349_v0  ;;  %v6388_v9 = vsel %vm698_vm13, %v3349_v0, %v4501_v56  ;;  %3424 = vrot.lane.b32.xlu0 %v6186_v21, %s4753_s23 }
 0x58e   : > { %3420 = vrot.lane.b32.xlu1 %v6178_v23, %s4753_s23  ;;  %v6410_v23 = vpack.i.bf16 %v6406_v6, %v6406_v6 }
 0x58f   : > { %v3099_v31 = vpop.permute.xlu0 %3098 }
 0x590   : > { %v3101_v14 = vpop.permute.xlu1 %3100  ;;  %6981 = vst [vmem:[#allocation6_spill] sm:$0xff] %v6410_v23 }
 0x591   : > { %3418 = vrot.lane.b32.xlu0 %v6174_v39, %s4753_s23  ;;  %v3117_v6 = vsel %vm565_vm8, %v3099_v31, %v3101_v14  ;;  %v4465_v14 = vunpack.i.l.bf16 %v6305_v51 }
 0x592   : > { %3561 = vperm.xlu1 %4291, %v3553_v53  }
 0x593   : > { %v6402_v12 = vpop.permute.xlu0 %3018 }
 0x594   : > { %v6404_v21 = vpop.permute.xlu1 %3020 }
 0x595   : > { %3556 = vperm.xlu0 %4290, %v3552_v47  }
 0x596   : > { %4553 = vrot.lane.b32.xlu1 %v6410_v23, %s4755_s25 }
 0x597   : > { %v6414_v39 = vpop.permute.xlu0 %2946 }
 0x598   : > { %v6416_v7 = vpop.permute.xlu1 %2948 }
 0x599   : > { %4533 = vrot.lane.b32.xlu0 %v6410_v23, %s4760_s30 }
 0x59b   : > { %v6420_v38 = vpop.permute.xlu0 %2866 }
 0x59c   : > { %v2869_v3 = vpop.permute.xlu1 %2868 }
 0x59d   : > { %v6424_v41 = vsel %vm459_vm4, %v6420_v38, %v2869_v3  ;;  %4538 = vrot.lane.b32.xlu0 %v6410_v23, %s4758_s28  ;;  %v4455_v3 = vunpack.i.l.bf16 %v6293_v28 }
 0x59f   : > { %v3353_v26 = vpop.permute.xlu0 %3352 }
 0x5a0   : > { %v3359_v55 = vpop.permute.xlu1 %3358 }
 0x5a1   : > { %4543 = vrot.lane.b32.xlu0 %v6410_v23, %s4757_s27 }
 0x5a3   : > { %v3355_v62 = vpop.permute.xlu0 %3354 }
 0x5a4   : > { %v3279_v10 = vpop.permute.xlu1 %3278  ;;  %v6431_v40 = vsel %vm698_vm13, %v3353_v26, %v3355_v62  ;;  %v6434_v45 = vsel %vm698_vm13, %v3355_v62, %v4500_v16  ;;  %v4456_v26 = vunpack.i.h.bf16 %v6293_v28 }
 0x5a5   : > { %4548 = vrot.lane.b32.xlu0 %v6410_v23, %s4756_s26 }
 0x5a7   : > { %v3105_v33 = vpop.permute.xlu0 %3104 }
 0x5a8   : > { %v3107_v19 = vpop.permute.xlu1 %3106 }
 0x5a9   : > { %4558 = vrot.lane.b32.xlu0 %v6410_v23, %s4759_s29  ;;  %v4460_v23 = vunpack.i.l.bf16 %v6303_v20 }
 0x5ab   : > { %v3025_v24 = vpop.permute.xlu0 %3024  ;;  %v3116_v28 = vsel %vm565_vm8, %v4460_v23, %v3099_v31  ;;  %v4466_v31 = vunpack.i.h.bf16 %v6305_v51  ;;  %v3037_v51 = vsel %vm517_vm7, %v6402_v12, %v6404_v21 }
 0x5ac   : > { %v3027_v29 = vpop.permute.xlu1 %3026 }
 0x5af   : > { %v6440_v48 = vpop.permute.xlu0 %2952 }
 0x5b0   : > { %v6442_v61 = vpop.permute.xlu1 %2954 }
 0x5b3   : > { %v6444_v2 = vpop.permute.xlu0 %2872 }
 0x5b4   : > { %v6446_v8 = vpop.permute.xlu1 %2874 }
 0x5b7   : > { %v3361_v32 = vpop.permute.xlu0 %3360 }
 0x5b8   : > { %v3111_v13 = vpop.permute.xlu1 %3110  ;;  %v6450_v27 = vsel %vm698_vm13, %v3359_v55, %v3361_v32  ;;  %v6453_v5 = vsel %vm698_vm13, %v3361_v32, %v4496_v25  ;;  %v3119_v25 = vsel %vm565_vm8, %v3105_v33, %v3107_v19  ;;  %v3115_v19 = vsel %vm565_vm8, %v6349_v52, %v6355_v57 }
 0x5b9   : > { %v3120_v55 = vsel %vm565_vm8, %v4455_v3, %v3111_v13 }
 0x5bb   : > { %v3281_v56 = vpop.permute.xlu0 %3280 }
 0x5bc   : > { %v3031_v0 = vpop.permute.xlu1 %3030  ;;  %v6457_v53 = vsel %vm665_vm11, %v3279_v10, %v3281_v56  ;;  %v6460_v47 = vsel %vm665_vm11, %v3281_v56, %v4506_v37  ;;  %v3118_v10 = vsel %vm565_vm8, %v4456_v26, %v3105_v33  ;;  %v4461_v37 = vunpack.i.h.bf16 %v6303_v20 }
 0x5bd   : > { %v3040_v23 = vsel %vm517_vm7, %v4465_v14, %v3031_v0  ;;  %v4470_v26 = vunpack.i.l.bf16 %v6311_v63 }
 0x5be   : > { %v3114_v20 = vsel %vm565_vm8, %v4461_v37, %v6349_v52 }
 0x5bf   : > { %v3113_v16 = vpop.permute.xlu0 %3112 }
 0x5c0   : > { %v2959_v62 = vpop.permute.xlu1 %2958  ;;  %v3121_v32 = vsel %vm565_vm8, %v3111_v13, %v3113_v16  ;;  %v3039_v13 = vsel %vm517_vm7, %v3025_v24, %v3027_v29  ;;  %v4471_v29 = vunpack.i.h.bf16 %v6311_v63 }
 0x5c1   : > { %4672 = vmatprep.subr.msk.mxu1 %vm4933_vm6, %v3121_v32 }
 0x5c2   : > { %4673 = vmatpush1.msk.msra.mxu1 %vm4929_vm5, %v3120_v55  ;;  %v3034_v63 = vsel %vm517_vm7, %v4471_v29, %v6357_v44  ;;  %v2963_v29 = vsel %vm491_vm12, %v6365_v17, %v6374_v54  ;;  %v4491_v54 = vunpack.i.h.bf16 %v6331_v30 }
 0x5c3   : > { %v3275_v56 = vpop.permute.xlu0 %3274  ;;  %4674 = vmatprep.subr.msk.mxu1 %vm4933_vm6, %v3119_v25 }
 0x5c4   : > { %v6474_v3 = vpop.permute.xlu1 %2878  ;;  %4675 = vmatpush1.msk.msra.mxu1 %vm4929_vm5, %v3118_v10  ;;  %v4475_v10 = vunpack.i.l.bf16 %v6313_v22 }
 0x5c5   : > { %4676 = vmatprep.subr.msk.mxu1 %vm4933_vm6, %v3117_v6  ;;  %v3038_v6 = vsel %vm517_vm7, %v4466_v31, %v3025_v24  ;;  %v3035_v24 = vsel %vm517_vm7, %v6357_v44, %v6363_v60  ;;  %v4476_v31 = vunpack.i.h.bf16 %v6313_v22  ;;  %v2965_v22 = vsel %vm491_vm12, %v6414_v39, %v6416_v7 }
 0x5c6   : > { %4677 = vmatpush1.msk.msra.mxu1 %vm4929_vm5, %v3116_v28 }
 0x5c7   : > { %v3033_v33 = vpop.permute.xlu0 %3032  ;;  %4678 = vmatprep.subr.msk.mxu1 %vm4933_vm6, %v3115_v19 }
 0x5c8   : > { %v6492_v57 = vpop.permute.xlu1 %3364  ;;  %v3041_v52 = vsel %vm517_vm7, %v3031_v0, %v3033_v33  ;;  %4679 = vmatpush1.msk.msra.mxu1 %vm4929_vm5, %v3114_v20  ;;  %v3036_v0 = vsel %vm517_vm7, %v4470_v26, %v6402_v12  ;;  %v4480_v33 = vunpack.i.l.bf16 %v6323_v46 }
 0x5c9   : > { %4680 = vmatprep.subr.msk.mxu1 %vm4916_vm3, %v3041_v52 }
 0x5ca   : > { %4681 = vmatpush1.msk.msra.mxu1 %vm4912_vm2, %v3040_v23  ;;  %v2968_v23 = vsel %vm491_vm12, %v4475_v10, %v2959_v62 }
 0x5cb   : > { %v3273_v55 = vpop.permute.xlu0 %3272  ;;  %4682 = vmatprep.subr.msk.mxu1 %vm4916_vm3, %v3039_v13  ;;  %v2966_v13 = vsel %vm491_vm12, %v4476_v31, %v6440_v48 }
 0x5cc   : > { %v6512_v16 = vpop.permute.xlu1 %3284  ;;  %v6520_v21 = vsel %vm665_vm11, %v3273_v55, %v3275_v56  ;;  %4683 = vmatpush1.msk.msra.mxu1 %vm4912_vm2, %v3038_v6  ;;  %v4485_v6 = vunpack.i.l.bf16 %v6325_v42 }
 0x5cd   : > { %4684 = vmatprep.subr.msk.mxu1 %vm4916_vm3, %v3037_v51 }
 0x5ce   : > { %4685 = vmatpush1.msk.msra.mxu1 %vm4912_vm2, %v3036_v0  ;;  %v2888_v0 = vsel %vm459_vm4, %v4485_v6, %v6474_v3 }
 0x5cf   : > { %v3267_v12 = vpop.permute.xlu0 %3266  ;;  %4686 = vmatprep.subr.msk.mxu1 %vm4916_vm3, %v3035_v24 }
 0x5d0   : > { %v4509_v25 = vpop.permute.xlu1 %4508  ;;  %4687 = vmatpush1.msk.msra.mxu1 %vm4912_vm2, %v3034_v63  ;;  %v2882_v63 = vsel %vm459_vm4, %v4491_v54, %v6376_v15  ;;  %v3477_v54 = vld [vmem:[%s6943_s7 + $0x18] sm:$0xff] }
 0x5d1   : > { %v4511_v60 = vunpack.i.h.bf16 %v4509_v25  ;;  %v4510_v32 = vunpack.i.l.bf16 %v4509_v25 }
 0x5d3   : > { %v6537_v44 = vsel %vm665_vm11, %v3275_v56, %v4510_v32  ;;  %v2961_v37 = vpop.permute.xlu0 %2960  ;;  %v2967_v56 = vsel %vm491_vm12, %v6440_v48, %v6442_v61  ;;  %v2964_v61 = vsel %vm491_vm12, %v4480_v33, %v6414_v39  ;;  %v4486_v48 = vunpack.i.h.bf16 %v6325_v42 }
 0x5d4   : > { %v3269_v28 = vpop.permute.xlu1 %3268  ;;  %v2969_v19 = vsel %vm491_vm12, %v2959_v62, %v2961_v37  ;;  %v4481_v62 = vunpack.i.h.bf16 %v6323_v46  ;;  %v2887_v39 = vsel %vm459_vm4, %v6444_v2, %v6446_v8  ;;  %v4490_v42 = vunpack.i.l.bf16 %v6331_v30 }
 0x5d5   : > { %v6542_v14 = vsel %vm665_vm11, %v3267_v12, %v3269_v28  ;;  %v6545_v20 = vsel %vm665_vm11, %v3269_v28, %v4511_v60  ;;  %3586 = vmatprep.subr.mxu1 %v2969_v19  ;;  %v2886_v24 = vsel %vm459_vm4, %v4486_v48, %v6444_v2  ;;  %v2883_v2 = vsel %vm459_vm4, %v6376_v15, %v6382_v1 }
 0x5d6   : > { %3587 = vmatpush1.msra.mxu1 %v2968_v23  ;;  %v2962_v46 = vsel %vm491_vm12, %v4481_v62, %v6365_v17  ;;  %v4495_v17 = vunpack.i.l.bf16 %v6341_v34 }
 0x5d7   : > { %v2881_v52 = vpop.permute.xlu0 %2880  ;;  %3588 = vmatprep.subr.mxu1 %v2967_v56 }
 0x5d8   : > { %v6555_v26 = vpop.permute.xlu1 %3204  ;;  %3589 = vmatpush1.msra.mxu1 %v2966_v13  ;;  %v2889_v51 = vsel %vm459_vm4, %v6474_v3, %v2881_v52  ;;  %v2884_v3 = vsel %vm459_vm4, %v4490_v42, %v6420_v38 }
 0x5d9   : > { %3590 = vmatprep.subr.mxu1 %v2965_v22 }
 0x5da   : > { %3591 = vmatpush1.msra.mxu1 %v2964_v61 }
 0x5db   : > { %v4514_v7 = vpop.permute.xlu0 %4513  ;;  %3592 = vmatprep.subr.mxu1 %v2963_v29 }
 0x5dc   : > { %v3199_v55 = vpop.permute.xlu1 %3198  ;;  %3593 = vmatpush1.msra.mxu1 %v2962_v46  ;;  %v4516_v8 = vunpack.i.h.bf16 %v4514_v7 }
 0x5dd   : > { %4688 = vmatprep.subr.msk.mxu1 %vm4933_vm6, %v2889_v51 }
 0x5de   : > { %4689 = vmatpush1.msk.msra.mxu1 %vm4929_vm5, %v2888_v0 }
 0x5df   : > { %v3201_v30 = vpop.permute.xlu0 %3200  ;;  %4690 = vmatprep.subr.msk.mxu1 %vm4933_vm6, %v2887_v39  ;;  %v3148_v39 = vld [vmem:[#allocation2 + $0x28] sm:$0xff] }
 0x5e0   : > { %v3367_v12 = vpop.permute.xlu1 %3366  ;;  %v3214_v34 = vsel %vm617_vm10, %v3199_v55, %v3201_v30  ;;  %v3215_v38 = vsel %vm617_vm10, %v3201_v30, %v4516_v8  ;;  %4691 = vmatpush1.msk.msra.mxu1 %vm4929_vm5, %v2886_v24  ;;  %v3478_v55 = vld [vmem:[%s6943_s7 + $0x20] sm:$0xff]  ;;  %v3476_v24 = vld [vmem:[%s6943_s7 + $0x10] sm:$0xff] }
 0x5e1   : > { %v3376_v25 = vsel %vm698_vm13, %v6492_v57, %v3367_v12  ;;  %v3377_v60 = vsel %vm698_vm13, %v3367_v12, %v4495_v17  ;;  %4692 = vmatprep.subr.msk.mxu1 %vm4933_vm6, %v6424_v41  ;;  %v4505_v57 = vunpack.i.l.bf16 %v6343_v35  ;;  %v6982_v17 = vld [vmem:[#allocation5_spill] sm:$0xff] }
 0x5e2   : > { %4693 = vmatpush1.msk.msra.mxu1 %vm4929_vm5, %v2884_v3  ;;  %v3479_v3 = vld [vmem:[%s6943_s7 + $0x28] sm:$0xff] }
 0x5e3   : > { %v3195_v15 = vpop.permute.xlu0 %3194  ;;  %4694 = vmatprep.subr.msk.mxu1 %vm4933_vm6, %v2883_v2 }
 0x5e4   : > { %v4519_v1 = vpop.permute.xlu1 %4518  ;;  %4695 = vmatpush1.msk.msra.mxu1 %vm4929_vm5, %v2882_v63 }
 0x5e5   : > { %v4521_v32 = vunpack.i.h.bf16 %v4519_v1  ;;  %v4520_v10 = vunpack.i.l.bf16 %v4519_v1  ;;  %3602 = vmatprep.subr.mxu1 %v3377_v60 }
 0x5e6   : > { %3603 = vmatpush2.msra.mxu1 %v3376_v25 }
 0x5e7   : > { %v3213_v37 = vsel %vm617_vm10, %v3195_v15, %v4520_v10  ;;  %v3287_v41 = vpop.permute.xlu0 %3286  ;;  %3604 = vmatprep.subr.mxu1 %v6453_v5  ;;  %v4515_v5 = vunpack.i.l.bf16 %v4514_v7 }
 0x5e8   : > { %v3189_v28 = vpop.permute.xlu1 %3188  ;;  %v3296_v19 = vsel %vm665_vm11, %v6512_v16, %v3287_v41  ;;  %v3297_v31 = vsel %vm665_vm11, %v3287_v41, %v4505_v57  ;;  %3605 = vmatpush2.msra.mxu1 %v6450_v27 }
 0x5e9   : > { %v3211_v23 = vsel %vm617_vm10, %v3189_v28, %v4521_v32  ;;  %3606 = vmatprep.subr.mxu1 %v6434_v45 }
 0x5ea   : > { %3607 = vmatpush2.msra.mxu1 %v6431_v40 }
 0x5eb   : > { %v3193_v35 = vpop.permute.xlu0 %3192  ;;  %3608 = vmatprep.subr.mxu1 %v6388_v9 }
 0x5ec   : > { %v3437_v56 = vpop.permute.xlu1 %3436  ;;  %v3212_v33 = vsel %vm617_vm10, %v3193_v35, %v3195_v15  ;;  %3609 = vmatpush2.msra.mxu1 %v6385_v43  ;;  %v4049_v35 = vld [vmem:[%s6945_s9 + $0x8] sm:$0xff] }
 0x5ed   : > { %4696 = vmatprep.subr.msk.mxu1 %vm4933_vm6, %v3297_v31  ;;  %v6983_v31 = vld [vmem:[#allocation6_spill] sm:$0xff] }
 0x5ee   : > { %4697 = vmatpush2.msk.msra.mxu1 %vm4929_vm5, %v3296_v19 }
 0x5ef   : > { %v3187_v27 = vpop.permute.xlu0 %3186  ;;  %4698 = vmatprep.subr.msk.mxu1 %vm4933_vm6, %v6460_v47 }
 0x5f0   : > { %v3207_v16 = vpop.permute.xlu1 %3206  ;;  %v3210_v40 = vsel %vm617_vm10, %v3187_v27, %v3189_v28  ;;  %4699 = vmatpush2.msk.msra.mxu1 %vm4929_vm5, %v6457_v53 }
 0x5f1   : > { %v3216_v9 = vsel %vm617_vm10, %v6555_v26, %v3207_v16  ;;  %v3217_v43 = vsel %vm617_vm10, %v3207_v16, %v4515_v5  ;;  %4700 = vmatprep.subr.msk.mxu1 %vm4933_vm6, %v6537_v44 }
 0x5f2   : > { %4701 = vmatpush2.msk.msra.mxu1 %vm4929_vm5, %v6520_v21 }
 0x5f3   : > { %v4524_v45 = vpop.permute.xlu0 %4523  ;;  %4702 = vmatprep.subr.msk.mxu1 %vm4933_vm6, %v6545_v20 }
 0x5f4   : > { %v3431_v47 = vpop.permute.xlu1 %3430  ;;  %4703 = vmatpush2.msk.msra.mxu1 %vm4929_vm5, %v6542_v14  ;;  %v4526_v53 = vunpack.i.h.bf16 %v4524_v45  ;;  %v4525_v13 = vunpack.i.l.bf16 %v4524_v45 }
 0x5f5   : > { %4704 = vmatprep.subr.msk.mxu1 %vm4916_vm3, %v3217_v43 }
 0x5f6   : > { %4705 = vmatpush2.msk.msra.mxu1 %vm4912_vm2, %v3216_v9 }
 0x5f7   : > { %v3433_v44 = vpop.permute.xlu0 %3432  ;;  %4706 = vmatprep.subr.msk.mxu1 %vm4916_vm3, %v3215_v38 }
 0x5f8   : > { %v3439_v21 = vpop.permute.xlu1 %3438  ;;  %v3446_v52 = vsel %vm724_vm1, %v3431_v47, %v3433_v44  ;;  %v3447_v20 = vsel %vm724_vm1, %v3433_v44, %v4526_v53  ;;  %4707 = vmatpush2.msk.msra.mxu1 %vm4912_vm2, %v3214_v34 }
 0x5f9   : > { %v3448_v26 = vsel %vm724_vm1, %v3437_v56, %v3439_v21  ;;  %v3449_v14 = vsel %vm724_vm1, %v3439_v21, %v4525_v13  ;;  %4708 = vmatprep.subr.msk.mxu1 %vm4916_vm3, %v3213_v37  ;;  %v4088_v56 = vld [vmem:[%s6946_s10] sm:$0xff] }
 0x5fa   : > { %4709 = vmatpush2.msk.msra.mxu1 %vm4912_vm2, %v3212_v33  ;;  %4710 = vmatprep.subr.msk.mxu0 %vm4916_vm3, %v3449_v14 }
 0x5fb   : > { %v3427_v6 = vpop.permute.xlu0 %3426  ;;  %4711 = vmatprep.subr.msk.mxu1 %vm4916_vm3, %v3211_v23  ;;  %4712 = vmatpush1.msk.msra.mxu0 %vm4912_vm2, %v3448_v26  ;;  %v4089_v23 = vld [vmem:[%s6946_s10 + $0x8] sm:$0xff] }
 0x5fc   : > { %v4529_v22 = vpop.permute.xlu1 %4528  ;;  %4713 = vmatpush2.msk.msra.mxu1 %vm4912_vm2, %v3210_v40  ;;  %4714 = vmatprep.subr.msk.mxu0 %vm4916_vm3, %v3447_v20 }
 0x5fd   : > { %v4531_v62 = vunpack.i.h.bf16 %v4529_v22  ;;  %v4530_v61 = vunpack.i.l.bf16 %v4529_v22  ;;  %3626 = vmatprep.subr.mxu1 %v6234_v36  ;;  %4715 = vmatpush1.msk.msra.mxu0 %vm4912_vm2, %v3446_v52  ;;  %v3149_v36 = vld [vmem:[#allocation2 + $0x30] sm:$0xff] }
 0x5fe   : > { %3627 = vmatpush2.msra.mxu1 %v6227_v4  ;;  %v3147_v4 = vld [vmem:[#allocation2 + $0x10] sm:$0xff] }
 0x5ff   : > { %v3445_v51 = vsel %vm724_vm1, %v3427_v6, %v4530_v61  ;;  %v3425_v48 = vpop.permute.xlu0 %3424  ;;  %3628 = vmatprep.subr.mxu1 %v6225_v11  ;;  %v3474_v11 = vld [vmem:[%s6943_s7] sm:$0xff] }
 0x600   : > { %v3421_v29 = vpop.permute.xlu1 %3420  ;;  %v3444_v0 = vsel %vm724_vm1, %v3425_v48, %v3427_v6  ;;  %3629 = vmatpush2.msra.mxu1 %v6219_v18  ;;  %4716 = vmatprep.subr.msk.mxu0 %vm4916_vm3, %v3445_v51  ;;  %v3146_v18 = vld [vmem:[#allocation2 + $0x8] sm:$0xff] }
 0x601   : > { %v3443_v46 = vsel %vm724_vm1, %v3421_v29, %v4531_v62  ;;  %3630 = vmatprep.subr.mxu1 %v3149_v36  ;;  %4717 = vmatpush1.msk.msra.mxu0 %vm4912_vm2, %v3444_v0 }
 0x602   : > { %3631 = vmatpush2.msra.mxu1 %v3148_v39  ;;  %4718 = vmatprep.subr.msk.mxu0 %vm4916_vm3, %v3443_v46 }
 0x603   : > { %v3419_v7 = vpop.permute.xlu0 %3418  ;;  %3632 = vmatprep.subr.mxu1 %v3147_v4 }
 0x604   : > { %v3442_v42 = vsel %vm724_vm1, %v3419_v7, %v3421_v29  ;;  %3633 = vmatpush2.msra.mxu1 %v3146_v18 }
 0x605   : > { %3635 = vmatmul.mubr.f32.vlgmr.msra.gmra.mxu1 %v3474_v11  ;;  %4719 = vmatpush1.msk.msra.mxu0 %vm4912_vm2, %v3442_v42 }
 0x606   : > { %3640 = vmatprep.mubr.f32.mxu1 %v3478_v55  ;;  %4264 = vmatmul.mubr.msk.f32.vlgmr.msra.gmra.mxu0 %vm1665_vm15, %v3476_v24 }
 0x607   : > { %3717 = vmatprep.mubr.f32.mxu0 %v6982_v17 }
 0x609   : > { %3641 = vmatmul.mubr.f32.gmra.mxu1 %v3477_v54 }
 0x60a   : > { %4265 = vmatmul.mubr.msk.f32.gmra.mxu0 %vm1665_vm15, %v3479_v3 }
 0x60b   : > { %4266 = vmatprep.mubr.msk.f32.mxu0 %vm491_vm12, %v4049_v35 }
 0x60d   : > { %v3562_v34 = vpop.permute.xlu1 %3561 }
 0x610   : > { %v3557_v8 = vpop.permute.xlu0 %3556 }
 0x611   : > { %v4554_v9 = vpop.permute.xlu1 %4553 }
 0x612   : > { %v4556_v47 = vunpack.i.h.bf16 %v4554_v9 }
 0x614   : > { %v4534_v33 = vpop.permute.xlu0 %4533 }
 0x615   : > { %v4536_v52 = vunpack.i.h.bf16 %v4534_v33 }
 0x618   : > { %v4539_v5 = vpop.permute.xlu0 %4538 }
 0x619   : > { %v4541_v36 = vunpack.i.h.bf16 %v4539_v5 }
 0x61c   : > { %v6802_v27 = vpop.permute.xlu0 %4543 }
 0x61d   : > { %v4546_v61 = vunpack.i.h.bf16 %v6802_v27 }
 0x620   : > { %v4549_v16 = vpop.permute.xlu0 %4548 }
 0x621   : > { %v4551_v44 = vunpack.i.h.bf16 %v4549_v16 }
 0x624   : > { %v4559_v40 = vpop.permute.xlu0 %4558 }
 0x625   : > { %v4561_v14 = vunpack.i.h.bf16 %v4559_v40 }
 0x6c5   : > { %v3636_v63 = vpop.f32.mrf.mxu1 }
 0x6c6   : > { %v3637_v2 = vadd.f32 %v3636_v63, %v3557_v8  ;;  %v3713_v12 = vpop.f32.mrf.mxu0 }
 0x6c7   : > { %v3638_v30 = vpop.f32.mrf.mxu1 }
 0x6c8   : > { %v3639_v38 = vadd.f32 %v3638_v30, %v3557_v8  ;;  %v6712_v25 = vadd.f32 %v3713_v12, %v3637_v2  ;;  %v3715_v15 = vpop.f32.mrf.mxu0  ;;  %v4550_v8 = vunpack.i.l.bf16 %v4549_v16  ;;  %v4560_v12 = vunpack.i.l.bf16 %v4559_v40 }
 0x6c9   : > { %v3642_v60 = vpop.f32.mrf.mxu1 }
 0x6ca   : > { %3724 = vst [vmem:[#allocation2 + $0x8] sm:$0xff] %v6712_v25  ;;  %v3643_v1 = vadd.f32 %v3642_v60, %v3562_v34  ;;  %v6715_v32 = vadd.f32 %v3715_v15, %v3639_v38  ;;  %3984 = vrot.lane.b32.xlu1 %v6712_v25, %s4760_s30  ;;  %3944 = vrot.lane.b32.xlu0 %v6712_v25, %s4758_s28  ;;  %v3719_v57 = vpop.f32.mrf.mxu0 }
 0x6cb   : > { %v3644_v10 = vpop.f32.mrf.mxu1 }
 0x6cc   : > { %3725 = vst [vmem:[#allocation2 + $0x10] sm:$0xff] %v6715_v32  ;;  %v3645_v37 = vadd.f32 %v3644_v10, %v3562_v34  ;;  %v6722_v41 = vadd.f32 %v3719_v57, %v3643_v1  ;;  %v3721_v28 = vpop.f32.mrf.mxu0  ;;  %v4555_v34 = vunpack.i.l.bf16 %v4554_v9  ;;  %v4535_v10 = vunpack.i.l.bf16 %v4534_v33 }
 0x6cd   : > { %v4545_v33 = vunpack.i.l.bf16 %v6802_v27 }
 0x6ce   : > { %3726 = vst [vmem:[#allocation2 + $0x28] sm:$0xff] %v6722_v41  ;;  %v6725_v19 = vadd.f32 %v3721_v28, %v3645_v37  ;;  %3904 = vrot.lane.b32.xlu1 %v6712_v25, %s4757_s27  ;;  %3818 = vrot.lane.b32.xlu0 %v6712_v25, %s4755_s25 }
 0x6d0   : > { %3727 = vst [vmem:[#allocation2 + $0x30] sm:$0xff] %v6725_v19 }
 0x6d2   : > { %3858 = vrot.lane.b32.xlu1 %v6712_v25, %s4756_s26  ;;  %3986 = vrot.lane.b32.xlu0 %v6715_v32, %s4760_s30 }
 0x6d6   : > { %3906 = vrot.lane.b32.xlu0 %v6715_v32, %s4757_s27  ;;  %3782 = vrot.lane.b32.xlu1 %v6712_v25, %s4759_s29 }
 0x6da   : > { %3860 = vrot.lane.b32.xlu0 %v6715_v32, %s4756_s26  ;;  %3946 = vrot.lane.b32.xlu1 %v6715_v32, %s4758_s28 }
 0x6de   : > { %3784 = vrot.lane.b32.xlu0 %v6715_v32, %s4759_s29  ;;  %3820 = vrot.lane.b32.xlu1 %v6715_v32, %s4755_s25 }
 0x6e2   : > { %3950 = vrot.lane.b32.xlu0 %v6722_v41, %s4758_s28  ;;  %3990 = vrot.lane.b32.xlu1 %v6722_v41, %s4760_s30 }
 0x6e6   : > { %3864 = vrot.lane.b32.xlu0 %v6722_v41, %s4756_s26  ;;  %3910 = vrot.lane.b32.xlu1 %v6722_v41, %s4757_s27 }
 0x6ea   : > { %3788 = vrot.lane.b32.xlu0 %v6722_v41, %s4759_s29  ;;  %3824 = vrot.lane.b32.xlu1 %v6722_v41, %s4755_s25 }
 0x6ee   : > { %3992 = vrot.lane.b32.xlu1 %v6725_v19, %s4760_s30  ;;  %3742 = vrot.lane.b32.xlu0 %v6712_v25, %s4754_s24 }
 0x6f2   : > { %3952 = vrot.lane.b32.xlu1 %v6725_v19, %s4758_s28  ;;  %3826 = vrot.lane.b32.xlu0 %v6725_v19, %s4755_s25 }
 0x6f6   : > { %3912 = vrot.lane.b32.xlu1 %v6725_v19, %s4757_s27  ;;  %4026 = vrot.lane.b32.xlu0 %v6722_v41, %s4753_s23 }
 0x6fa   : > { %3748 = vrot.lane.b32.xlu1 %v6722_v41, %s4754_s24  ;;  %3750 = vrot.lane.b32.xlu0 %v6725_v19, %s4754_s24 }
 0x6fe   : > { %3866 = vrot.lane.b32.xlu1 %v6725_v19, %s4756_s26  ;;  %4028 = vrot.lane.b32.xlu0 %v6725_v19, %s4753_s23 }
 0x702   : > { %4563 = vrot.lane.b32.xlu1 %v6983_v31, %s4754_s24  ;;  %4020 = vrot.lane.b32.xlu0 %v6712_v25, %s4753_s23 }
 0x706   : > { %3790 = vrot.lane.b32.xlu1 %v6725_v19, %s4759_s29  ;;  %4097 = vperm.xlu0 %4290, %v4089_v23   ;;  %v4540_v23 = vunpack.i.l.bf16 %v4539_v5 }
 0x70a   : > { %3744 = vrot.lane.b32.xlu1 %v6715_v32, %s4754_s24 }
 0x70e   : > { %4568 = vrot.lane.b32.xlu1 %v6983_v31, %s4753_s23 }
 0x712   : > { %4022 = vrot.lane.b32.xlu1 %v6715_v32, %s4753_s23 }
 0x716   : > { %4092 = vperm.xlu1 %4291, %v4088_v56  }
 0x73c   : > { %v3985_v43 = vpop.permute.xlu1 %3984  ;;  %v3945_v45 = vpop.permute.xlu0 %3944 }
 0x740   : > { %v3905_v53 = vpop.permute.xlu1 %3904  ;;  %v3819_v13 = vpop.permute.xlu0 %3818 }
 0x741   : > { %v6805_v21 = vsel %vm517_vm7, %v4556_v47, %v3819_v13 }
 0x744   : > { %v3859_v20 = vpop.permute.xlu1 %3858  ;;  %v3987_v26 = vpop.permute.xlu0 %3986 }
 0x745   : > { %v6808_v6 = vsel %vm565_vm8, %v4551_v44, %v3859_v20  ;;  %v3996_v22 = vsel %vm698_vm13, %v3985_v43, %v3987_v26  ;;  %v3997_v62 = vsel %vm698_vm13, %v3987_v26, %v4536_v52 }
 0x748   : > { %v3907_v51 = vpop.permute.xlu0 %3906  ;;  %v3783_v48 = vpop.permute.xlu1 %3782 }
 0x749   : > { %v3916_v29 = vsel %vm617_vm10, %v3905_v53, %v3907_v51  ;;  %v3917_v0 = vsel %vm617_vm10, %v3907_v51, %v4546_v61  ;;  %v6816_v46 = vsel %vm491_vm12, %v4561_v14, %v3783_v48 }
 0x74c   : > { %v3861_v39 = vpop.permute.xlu0 %3860  ;;  %v3947_v4 = vpop.permute.xlu1 %3946 }
 0x74d   : > { %v6819_v11 = vsel %vm565_vm8, %v3859_v20, %v3861_v39  ;;  %v3956_v7 = vsel %vm665_vm11, %v3945_v45, %v3947_v4  ;;  %v3957_v18 = vsel %vm665_vm11, %v3947_v4, %v4541_v36 }
 0x750   : > { %v3785_v55 = vpop.permute.xlu0 %3784  ;;  %v3821_v42 = vpop.permute.xlu1 %3820 }
 0x751   : > { %v6824_v24 = vsel %vm491_vm12, %v3783_v48, %v3785_v55  ;;  %v6827_v54 = vsel %vm517_vm7, %v3819_v13, %v3821_v42  ;;  %v4050_v55 = vld [vmem:[%s6945_s9 + $0x10] sm:$0xff] }
 0x754   : > { %v3951_v17 = vpop.permute.xlu0 %3950  ;;  %v3991_v3 = vpop.permute.xlu1 %3990 }
 0x758   : > { %v3865_v63 = vpop.permute.xlu0 %3864  ;;  %v3911_v2 = vpop.permute.xlu1 %3910 }
 0x759   : > { %v3870_v30 = vsel %vm565_vm8, %v4550_v8, %v3865_v63 }
 0x75c   : > { %v3789_v38 = vpop.permute.xlu0 %3788  ;;  %v3825_v60 = vpop.permute.xlu1 %3824 }
 0x75d   : > { %v6831_v15 = vsel %vm491_vm12, %v4560_v12, %v3789_v38  ;;  %v3830_v1 = vsel %vm517_vm7, %v4555_v34, %v3825_v60 }
 0x760   : > { %v3993_v57 = vpop.permute.xlu1 %3992  ;;  %v3743_v37 = vpop.permute.xlu0 %3742 }
 0x761   : > { %v3998_v28 = vsel %vm698_vm13, %v3991_v3, %v3993_v57  ;;  %v3999_v31 = vsel %vm698_vm13, %v3993_v57, %v4535_v10 }
 0x762   : > { %4106 = vmatprep.subr.mxu0 %v3999_v31 }
 0x763   : > { %4107 = vmatpush1.msra.mxu0 %v3998_v28 }
 0x764   : > { %v3953_v35 = vpop.permute.xlu1 %3952  ;;  %v3827_v56 = vpop.permute.xlu0 %3826  ;;  %4108 = vmatprep.subr.mxu0 %v3997_v62 }
 0x765   : > { %v3958_v16 = vsel %vm665_vm11, %v3951_v17, %v3953_v35  ;;  %v3959_v40 = vsel %vm665_vm11, %v3953_v35, %v4540_v23  ;;  %v3831_v9 = vsel %vm517_vm7, %v3825_v60, %v3827_v56  ;;  %4109 = vmatpush1.msra.mxu0 %v3996_v22 }
 0x766   : > { %4720 = vmatprep.subr.msk.mxu0 %vm4933_vm6, %v3959_v40 }
 0x767   : > { %4721 = vmatpush1.msk.msra.mxu0 %vm4929_vm5, %v3958_v16 }
 0x768   : > { %v3913_v43 = vpop.permute.xlu1 %3912  ;;  %v4027_v45 = vpop.permute.xlu0 %4026  ;;  %4722 = vmatprep.subr.msk.mxu0 %vm4933_vm6, %v3957_v18 }
 0x769   : > { %v3918_v5 = vsel %vm617_vm10, %v3911_v2, %v3913_v43  ;;  %v3919_v47 = vsel %vm617_vm10, %v3913_v43, %v4545_v33  ;;  %4723 = vmatpush1.msk.msra.mxu0 %vm4929_vm5, %v3956_v7 }
 0x76a   : > { %4724 = vmatprep.subr.msk.mxu0 %vm4916_vm3, %v3919_v47 }
 0x76b   : > { %4725 = vmatpush1.msk.msra.mxu0 %vm4912_vm2, %v3918_v5 }
 0x76c   : > { %v3749_v27 = vpop.permute.xlu1 %3748  ;;  %v3751_v53 = vpop.permute.xlu0 %3750  ;;  %4726 = vmatprep.subr.msk.mxu0 %vm4916_vm3, %v3917_v0 }
 0x76d   : > { %v3755_v13 = vsel %vm459_vm4, %v3749_v27, %v3751_v53  ;;  %4727 = vmatpush1.msk.msra.mxu0 %vm4912_vm2, %v3916_v29 }
 0x76e   : > { %v3763_v44 = vsel %vm4933_vm6, %v3755_v13, 0.0  ;;  %4118 = vmatprep.subr.mxu0 %v6725_v19 }
 0x76f   : > { %3767 = vst [vmem:[#allocation3 + $0x18] sm:$0xff] %v3763_v44  ;;  %4119 = vmatpush1.msra.mxu0 %v6722_v41 }
 0x770   : > { %v3867_v52 = vpop.permute.xlu1 %3866  ;;  %v4029_v20 = vpop.permute.xlu0 %4028  ;;  %4120 = vmatprep.subr.mxu0 %v6715_v32 }
 0x771   : > { %v3871_v26 = vsel %vm565_vm8, %v3865_v63, %v3867_v52  ;;  %v4034_v14 = vsel %vm724_vm1, %v4027_v45, %v4029_v20  ;;  %4121 = vmatpush1.msra.mxu0 %v6712_v25 }
 0x772   : > { %4728 = vmatprep.subr.msk.mxu0 %vm4933_vm6, %v3871_v26 }
 0x773   : > { %4729 = vmatpush1.msk.msra.mxu0 %vm4929_vm5, %v3870_v30 }
 0x774   : > { %v4564_v22 = vpop.permute.xlu1 %4563  ;;  %4730 = vmatprep.subr.msk.mxu0 %vm4933_vm6, %v6819_v11 }
 0x775   : > { %v4566_v19 = vunpack.i.h.bf16 %v4564_v22  ;;  %v4565_v62 = vunpack.i.l.bf16 %v4564_v22  ;;  %4731 = vmatpush1.msk.msra.mxu0 %vm4929_vm5, %v6808_v6 }
 0x776   : > { %4732 = vmatprep.subr.msk.mxu0 %vm4916_vm3, %v3831_v9 }
 0x777   : > { %v3752_v32 = vsel %vm459_vm4, %v4566_v19, %v3743_v37  ;;  %v3754_v25 = vsel %vm459_vm4, %v4565_v62, %v3749_v27  ;;  %4733 = vmatpush1.msk.msra.mxu0 %vm4912_vm2, %v3830_v1 }
 0x778   : > { %v3760_v41 = vsel %vm4929_vm5, %v3752_v32, 0.0  ;;  %v3762_v61 = vsel %vm4929_vm5, %v3754_v25, 0.0  ;;  %v3791_v51 = vpop.permute.xlu1 %3790  ;;  %4734 = vmatprep.subr.msk.mxu0 %vm4916_vm3, %v6827_v54 }
 0x779   : > { %3764 = vst [vmem:[#allocation3] sm:$0xff] %v3760_v41  ;;  %3766 = vst [vmem:[#allocation3 + $0x10] sm:$0xff] %v3762_v61  ;;  %v3795_v6 = vsel %vm491_vm12, %v3789_v38, %v3791_v51  ;;  %4735 = vmatpush1.msk.msra.mxu0 %vm4912_vm2, %v6805_v21 }
 0x77a   : > { %4130 = vmatprep.subr.mxu0 %v3795_v6 }
 0x77b   : > { %4131 = vmatpush1.msra.mxu0 %v6831_v15 }
 0x77c   : > { %v3745_v48 = vpop.permute.xlu1 %3744  ;;  %4132 = vmatprep.subr.mxu0 %v6824_v24 }
 0x77d   : > { %v3753_v29 = vsel %vm459_vm4, %v3743_v37, %v3745_v48  ;;  %4133 = vmatpush1.msra.mxu0 %v6816_v46  ;;  %v4021_v46 = vpop.permute.xlu0 %4020 }
 0x77e   : > { %v3761_v0 = vsel %vm4933_vm6, %v3753_v29, 0.0  ;;  %4736 = vmatprep.subr.msk.mxu0 %vm4933_vm6, %v3755_v13 }
 0x77f   : > { %3765 = vst [vmem:[#allocation3 + $0x8] sm:$0xff] %v3761_v0  ;;  %4737 = vmatpush1.msk.msra.mxu0 %vm4929_vm5, %v3754_v25 }
 0x780   : > { %v4569_v36 = vpop.permute.xlu1 %4568  ;;  %4738 = vmatprep.subr.msk.mxu0 %vm4933_vm6, %v3753_v29 }
 0x781   : > { %v4570_v21 = vunpack.i.l.bf16 %v4569_v36  ;;  %4739 = vmatpush1.msk.msra.mxu0 %vm4929_vm5, %v3752_v32  ;;  %v4571_v39 = vunpack.i.h.bf16 %v4569_v36  ;;  %v4098_v17 = vpop.permute.xlu0 %4097 }
 0x783   : > { %v4035_v4 = vsel %vm724_vm1, %v4029_v20, %v4570_v21 }
 0x784   : > { %v4023_v11 = vpop.permute.xlu1 %4022  ;;  %4740 = vmatprep.subr.msk.mxu0 %vm4916_vm3, %v4035_v4 }
 0x785   : > { %v4032_v7 = vsel %vm724_vm1, %v4021_v46, %v4023_v11  ;;  %v4033_v18 = vsel %vm724_vm1, %v4023_v11, %v4571_v39  ;;  %4741 = vmatpush2.msk.msra.mxu0 %vm4912_vm2, %v4034_v14 }
 0x786   : > { %4742 = vmatprep.subr.msk.mxu0 %vm4916_vm3, %v4033_v18 }
 0x787   : > { %4743 = vmatpush2.msk.msra.mxu0 %vm4912_vm2, %v4032_v7 }
 0x788   : > { %4171 = vmatmul.mubr.f32.vlgmr.msra.gmra.mxu0 %v4048_v58 }
 0x789   : > { %4267 = vmatprep.mubr.msk.f32.mxu0 %vm491_vm12, %v4051_v59 }
 0x78c   : > { %4177 = vmatmul.mubr.f32.gmra.mxu0 %v4050_v55 }
 0x791   : > { %v4093_v42 = vpop.permute.xlu1 %4092 }
 0x848   : > { %v4172_v50 = vpop.f32.mrf.mxu0 }
 0x849   : > { %v4173_v24 = vadd.f32 %v4172_v50, %v4093_v42 }
 0x84a   : > { %v4174_v54 = vpop.f32.mrf.mxu0 }
 0x84b   : > { %4183 = vst [vmem:[%s383_s16] sm:$0xff] %v4173_v24  ;;  %v4175_v49 = vadd.f32 %v4174_v54, %v4093_v42 }
 0x84c   : > { %v4178_v3 = vpop.f32.mrf.mxu0 }
 0x84d   : > { %4184 = vst [vmem:[%s383_s16 + $0x8] sm:$0xff] %v4175_v49  ;;  %v4179_v8 = vadd.f32 %v4178_v3, %v4098_v17 }
 0x84e   : > { %v4180_v63 = vpop.f32.mrf.mxu0 }
 0x84f   : > { %4185 = vst [vmem:[%s383_s16 + $0x10] sm:$0xff] %v4179_v8  ;;  %v4181_v2 = vadd.f32 %v4180_v63, %v4098_v17 }
 0x851   : > { %4186 = vst [vmem:[%s383_s16 + $0x18] sm:$0xff] %v4181_v2 }
 0x852 PF: > { %s21_s17 = sadd.s32 1, %s4750_s17  }
 0x853   : > { %p18_p4 = scmp.ge.s32.totalorder %s21_s17, 4  }
 0x855   :  { %20 = sbr.rel (!%p18_p4) target bundleno = 1 (0x1), region = 103 }

</bundles_post_ra>
